<compile_context>
chip_gen: v6e
topology: v6e:2x2x1
jax: 0.10.0
libtpu: 0.0.40
codegen_flags: <defaults>
</compile_context>

<pallas_src>
import jax
import jax.numpy as jnp
from jax.experimental import pallas as pl
from jax.experimental.pallas import tpu as pltpu

H = 256      # hidden width
D_IN = 2
D_OUT = 1


# --------------------------------------------------------------------------
# Kernel
# --------------------------------------------------------------------------
def mlp_kernel(xT_ref, w1_ref, b1_ref, w2_ref, b2_ref, w3_ref, b3_ref, oT_ref):
    """Folded-parameter MLP, batch in lanes.

    t1 = tanh(W1' x + b1')        (== 2*sigmoid(c1(x)) - 1)
    t2 = tanh(W2' t1 + b2')       (== 2*sigmoid(c2(.)) - 1)
    y  = w3' . t2 + b3'           (== c3(.))
    """
    xT = xT_ref[...]                               # (2, tb)  f32
    w1 = w1_ref[...]                               # (H, 2)   f32

    # --- Layer 1 (K=2): two VPU broadcast-FMAs, no MXU pass.
    z1 = (w1[:, 0:1] * xT[0:1, :]
          + w1[:, 1:2] * xT[1:2, :]
          + b1_ref[...])                           # (H, tb)  f32
    t1 = jnp.tanh(z1)

    # --- Layer 2 (256x256): the only MXU matmul; bf16 operands, f32 acc.
    z2 = jnp.dot(w2_ref[...], t1.astype(w2_ref.dtype),
                 preferred_element_type=jnp.float32) + b2_ref[...]
    t2 = jnp.tanh(z2)                              # (H, tb)  f32

    # --- Layer 3 (N=1): VPU multiply + sublane reduce; lane-dense store.
    y = jnp.sum(t2 * w3_ref[...], axis=0, keepdims=True) + b3_ref[...]
    oT_ref[...] = y.astype(oT_ref.dtype)           # (1, tb)


# --------------------------------------------------------------------------
# Tiling helpers
# --------------------------------------------------------------------------
def _num_tensorcores():
    """2 for megacore chips (v7x / v4), 1 for v5e / v6e (single TC)."""
    try:
        kind = jax.devices()[0].device_kind.lower()
    except Exception:
        return 1
    if "v7" in kind:
        return 2
    if "v4" in kind and "lite" not in kind:
        return 2
    return 1


def _pick_tb(Bp, n_tc, max_tb=2048):
    """Bp is a multiple of 256.  Returns a batch tile that divides Bp, is a
    multiple of 256, is <= max_tb, and yields >= n_tc grid steps when the
    batch is large enough (megacore)."""
    m = Bp // 256
    want_steps = n_tc if m >= n_tc else 1
    cap = max(1, min(m // want_steps, max_tb // 256))
    best = 1
    for d in range(1, cap + 1):
        if m % d == 0:
            best = d
    return 256 * best


# --------------------------------------------------------------------------
# Forward wrapper
# --------------------------------------------------------------------------
def mlp_forward(x, params, *, max_tb=2048):
    """x: (B, 2) f32; params: output of prepare_params().  Returns (B, 1)."""
    w1k, b1k, w2k, b2k, w3k, b3k = params
    B = x.shape[0]
    Bp = ((B + 255) // 256) * 256                  # pad batch -> multiple of 256

    xT = x.astype(jnp.float32).T                   # (2, B): batch in lanes
    if Bp != B:
        xT = jnp.pad(xT, ((0, 0), (0, Bp - B)))

    n_tc = _num_tensorcores()
    tb = _pick_tb(Bp, n_tc, max_tb)
    grid = (Bp // tb,)

    def resident(shape):
        # Constant index_map -> weights/biases stay resident in VMEM.
        return pl.BlockSpec(shape, lambda i: (0, 0))

    w2_bytes = w2k.size * w2k.dtype.itemsize
    cost = pl.CostEstimate(
        flops=2 * Bp * (D_IN * H + H * H + H * D_OUT),
        transcendentals=Bp * 2 * H,
        bytes_accessed=4 * Bp * (D_IN + D_OUT) + w2_bytes
        + 4 * (H * D_IN + H + H + H + 1),
    )

    outT = pl.pallas_call(
        mlp_kernel,
        out_shape=jax.ShapeDtypeStruct((1, Bp), jnp.float32),
        grid_spec=pltpu.PrefetchScalarGridSpec(
            num_scalar_prefetch=0,
            grid=grid,
            in_specs=[
                pl.BlockSpec((D_IN, tb), lambda i: (0, i)),   # x (batch in lanes)
                resident((H, D_IN)),                          # 0.5*W1    [256, 2]
                resident((H, 1)),                             # 0.5*b1
                resident((H, H)),                             # 0.25*W2   (bf16)
                resident((H, 1)),                             # b2'
                resident((H, 1)),                             # 0.5*w3
                resident((1, 1)),                             # b3'
            ],
            out_specs=pl.BlockSpec((1, tb), lambda i: (0, i)),
        ),
        compiler_params=pltpu.CompilerParams(
            dimension_semantics=("parallel",),
            vmem_limit_bytes=32 * 1024 * 1024,
        ),
        cost_estimate=cost,
    )(xT, w1k, b1k, w2k, b2k, w3k, b3k)

    return outT[:, :B].T                           # (B, 1)


# --------------------------------------------------------------------------
# Parameter preparation (one-time, NOT in the forward path)
# --------------------------------------------------------------------------
def prepare_params(params_pt, *, use_bf16=True):
    """Fold the sigmoid affine constants into PyTorch-convention params and
    (optionally) cast the big matmul weight to bf16 once."""
    (w1, b1), (w2, b2), (w3, b3) = params_pt
    w1 = jnp.asarray(w1, jnp.float32); b1 = jnp.asarray(b1, jnp.float32)
    w2 = jnp.asarray(w2, jnp.float32); b2 = jnp.asarray(b2, jnp.float32)
    w3 = jnp.asarray(w3, jnp.float32); b3 = jnp.asarray(b3, jnp.float32)

    w1k = 0.5 * w1                                         # (H, 2)
    b1k = (0.5 * b1).reshape(H, 1)                         # (H, 1)
    # b2 correction computed in f32 BEFORE any cast of W2.
    b2k = (0.5 * b2 + 0.25 * jnp.sum(w2, axis=1)).reshape(H, 1)
    w2k = 0.25 * w2                                        # power-of-two: exact in bf16
    if use_bf16:
        w2k = w2k.astype(jnp.bfloat16)
    w3k = (0.5 * w3).reshape(H, 1)                         # (H, 1)
    b3k = (b3 + 0.5 * jnp.sum(w3)).reshape(1, 1)           # (1, 1)
    return (w1k, b1k, w2k, b2k, w3k, b3k)


def init_params(key):
    """PyTorch-convention params: W [out, in], b [out] ~ U(+-1/sqrt(fan_in))."""
    ks = jax.random.split(key, 6)

    def linear(kw, kb, fan_in, fan_out):
        bound = float(fan_in) ** -0.5
        w = jax.random.uniform(kw, (fan_out, fan_in), jnp.float32, -bound, bound)
        b = jax.random.uniform(kb, (fan_out,), jnp.float32, -bound, bound)
        return w, b

    return (linear(ks[0], ks[1], D_IN, H),
            linear(ks[2], ks[3], H, H),
            linear(ks[4], ks[5], H, D_OUT))


def mlp_reference(x, params_pt):
    (w1, b1), (w2, b2), (w3, b3) = params_pt
    h1 = jax.nn.sigmoid(x @ w1.T + b1)
    h2 = jax.nn.sigmoid(h1 @ w2.T + b2)
    return h2 @ w3.T + b3


# --------------------------------------------------------------------------
if __name__ == "__main__":
    key = jax.random.PRNGKey(0)
    k_x, k_p = jax.random.split(key)

    B = 512
    x = jax.random.normal(k_x, (B, D_IN), dtype=jnp.float32)
    params_pt = init_params(k_p)
    ref = mlp_reference(x, params_pt)

    # Full-precision path: matches the f32 reference tightly.
    params_f32 = prepare_params(params_pt, use_bf16=False)
    out_f32 = jax.block_until_ready(
        jax.jit(lambda xx: mlp_forward(xx, params_f32))(x))
    assert out_f32.shape == (B, D_OUT)
    assert jnp.allclose(out_f32, ref, atol=1e-4, rtol=1e-4), "f32 mismatch"

    # Default (bf16 MXU) path: looser tolerance for the bf16 matmul.
    params_bf16 = prepare_params(params_pt, use_bf16=True)
    out_bf16 = jax.block_until_ready(
        jax.jit(lambda xx: mlp_forward(xx, params_bf16))(x))
    assert out_bf16.shape == (B, D_OUT)
    assert jnp.allclose(out_bf16, ref, atol=2e-2, rtol=2e-2), "bf16 mismatch"

    # Awkward batch size exercises the zero-pad path (no tiny-tile fallback).
    x_small = jax.random.normal(k_x, (72, D_IN), dtype=jnp.float32)
    out_small = jax.block_until_ready(mlp_forward(x_small, params_bf16))
    ref_small = mlp_reference(x_small, params_pt)
    assert out_small.shape == (72, D_OUT)
    assert jnp.allclose(out_small, ref_small, atol=2e-2, rtol=2e-2), "pad mismatch"

    print("KERNEL_OK")
</pallas_src>

<mosaic_0001>
module attributes {stable_mosaic.version = 11 : i64} {
  func.func @mlp_kernel(%arg0: i32, %arg1: memref<2x512xf32, #tpu.memory_space<vmem>>, %arg2: memref<256x2xf32, #tpu.memory_space<vmem>>, %arg3: memref<256x1xf32, #tpu.memory_space<vmem>>, %arg4: memref<256x256xf32, #tpu.memory_space<vmem>>, %arg5: memref<256x1xf32, #tpu.memory_space<vmem>>, %arg6: memref<256x1xf32, #tpu.memory_space<vmem>>, %arg7: memref<1x1xf32, #tpu.memory_space<vmem>>, %arg8: memref<1x512xf32, #tpu.memory_space<vmem>>) attributes {dimension_semantics = [#tpu.dimension_semantics<parallel>], iteration_bounds = array<i64: 1>, scalar_prefetch = 0 : i64, scratch_operands = 0 : i64, tpu.core_type = #tpu.core_type<tc>, window_params = [{transform_indices = @transform_0, window_bounds = array<i64: 2, 512>}, {pipeline_mode = #tpu.pipeline_mode<synchronous>, transform_indices = @transform_1, window_bounds = array<i64: 256, 2>}, {pipeline_mode = #tpu.pipeline_mode<synchronous>, transform_indices = @transform_2, window_bounds = array<i64: 256, 1>}, {pipeline_mode = #tpu.pipeline_mode<synchronous>, transform_indices = @transform_3, window_bounds = array<i64: 256, 256>}, {pipeline_mode = #tpu.pipeline_mode<synchronous>, transform_indices = @transform_4, window_bounds = array<i64: 256, 1>}, {pipeline_mode = #tpu.pipeline_mode<synchronous>, transform_indices = @transform_5, window_bounds = array<i64: 256, 1>}, {pipeline_mode = #tpu.pipeline_mode<synchronous>, transform_indices = @transform_6, window_bounds = array<i64: 1, 1>}, {transform_indices = @transform_7, window_bounds = array<i64: 1, 512>}]} {
    %c0 = arith.constant 0 : index
    %c0_0 = arith.constant 0 : index
    %0 = vector.load %arg1[%c0, %c0_0] : memref<2x512xf32, #tpu.memory_space<vmem>>, vector<2x512xf32>
    %c0_1 = arith.constant 0 : index
    %c0_2 = arith.constant 0 : index
    %1 = vector.load %arg2[%c0_1, %c0_2] : memref<256x2xf32, #tpu.memory_space<vmem>>, vector<256x2xf32>
    %2 = vector.extract_strided_slice %1 {offsets = [0, 0], sizes = [256, 1], strides = [1, 1]} : vector<256x2xf32> to vector<256x1xf32>
    %3 = vector.extract_strided_slice %0 {offsets = [0, 0], sizes = [1, 512], strides = [1, 1]} : vector<2x512xf32> to vector<1x512xf32>
    %4 = vector.broadcast %2 : vector<256x1xf32> to vector<256x512xf32>
    %5 = vector.broadcast %3 : vector<1x512xf32> to vector<256x512xf32>
    %6 = arith.mulf %4, %5 : vector<256x512xf32>
    %7 = vector.extract_strided_slice %1 {offsets = [0, 1], sizes = [256, 1], strides = [1, 1]} : vector<256x2xf32> to vector<256x1xf32>
    %8 = vector.extract_strided_slice %0 {offsets = [1, 0], sizes = [1, 512], strides = [1, 1]} : vector<2x512xf32> to vector<1x512xf32>
    %9 = vector.broadcast %7 : vector<256x1xf32> to vector<256x512xf32>
    %10 = vector.broadcast %8 : vector<1x512xf32> to vector<256x512xf32>
    %11 = arith.mulf %9, %10 : vector<256x512xf32>
    %12 = arith.addf %6, %11 : vector<256x512xf32>
    %c0_3 = arith.constant 0 : index
    %c0_4 = arith.constant 0 : index
    %13 = vector.load %arg3[%c0_3, %c0_4] : memref<256x1xf32, #tpu.memory_space<vmem>>, vector<256x1xf32>
    %14 = vector.broadcast %13 : vector<256x1xf32> to vector<256x512xf32>
    %15 = arith.addf %12, %14 : vector<256x512xf32>
    %16 = math.tanh %15 : vector<256x512xf32>
    %c0_5 = arith.constant 0 : index
    %c0_6 = arith.constant 0 : index
    %17 = vector.load %arg4[%c0_5, %c0_6] : memref<256x256xf32, #tpu.memory_space<vmem>>, vector<256x256xf32>
    %cst = arith.constant dense<0.000000e+00> : vector<256x512xf32>
    %18 = tpu.matmul %17, %16, %cst {dimension_numbers = #tpu.dot_dimension_numbers<[1], [0], [0], [1], [0, 0, 1, 1], [], []>} : vector<256x256xf32>, vector<256x512xf32>, vector<256x512xf32> -> vector<256x512xf32>
    %c0_7 = arith.constant 0 : index
    %c0_8 = arith.constant 0 : index
    %19 = vector.load %arg5[%c0_7, %c0_8] : memref<256x1xf32, #tpu.memory_space<vmem>>, vector<256x1xf32>
    %20 = vector.broadcast %19 : vector<256x1xf32> to vector<256x512xf32>
    %21 = arith.addf %18, %20 : vector<256x512xf32>
    %22 = math.tanh %21 : vector<256x512xf32>
    %c0_9 = arith.constant 0 : index
    %c0_10 = arith.constant 0 : index
    %23 = vector.load %arg6[%c0_9, %c0_10] : memref<256x1xf32, #tpu.memory_space<vmem>>, vector<256x1xf32>
    %24 = vector.broadcast %23 : vector<256x1xf32> to vector<256x512xf32>
    %25 = arith.mulf %22, %24 : vector<256x512xf32>
    %cst_11 = arith.constant dense<0.000000e+00> : vector<512xf32>
    %26 = vector.multi_reduction <add>, %25, %cst_11 [0] : vector<256x512xf32> to vector<512xf32>
    %27 = vector.shape_cast %26 : vector<512xf32> to vector<1x512xf32>
    %c0_12 = arith.constant 0 : index
    %c0_13 = arith.constant 0 : index
    %28 = vector.load %arg7[%c0_12, %c0_13] : memref<1x1xf32, #tpu.memory_space<vmem>>, vector<1x1xf32>
    %29 = vector.broadcast %28 : vector<1x1xf32> to vector<1x512xf32>
    %30 = arith.addf %27, %29 : vector<1x512xf32>
    %c0_14 = arith.constant 0 : index
    %c0_15 = arith.constant 0 : index
    %31 = vector.load %arg8[%c0_14, %c0_15] : memref<1x512xf32, #tpu.memory_space<vmem>>, vector<1x512xf32>
    tpu.vector_store %arg8[%c0_14, %c0_15], %30 {strides = array<i32>} : memref<1x512xf32, #tpu.memory_space<vmem>>, vector<1x512xf32>,
    return
  }
  func.func @transform_0(%arg0: i32) -> (i32, i32) {
    %c0_i32 = arith.constant 0 : i32
    %c0_i32_0 = arith.constant 0 : i32
    return %c0_i32, %arg0 : i32, i32
  }
  func.func @transform_1(%arg0: i32) -> (i32, i32) {
    %c0_i32 = arith.constant 0 : i32
    %c0_i32_0 = arith.constant 0 : i32
    %c0_i32_1 = arith.constant 0 : i32
    return %c0_i32, %c0_i32_0 : i32, i32
  }
  func.func @transform_2(%arg0: i32) -> (i32, i32) {
    %c0_i32 = arith.constant 0 : i32
    %c0_i32_0 = arith.constant 0 : i32
    %c0_i32_1 = arith.constant 0 : i32
    return %c0_i32, %c0_i32_0 : i32, i32
  }
  func.func @transform_3(%arg0: i32) -> (i32, i32) {
    %c0_i32 = arith.constant 0 : i32
    %c0_i32_0 = arith.constant 0 : i32
    %c0_i32_1 = arith.constant 0 : i32
    return %c0_i32, %c0_i32_0 : i32, i32
  }
  func.func @transform_4(%arg0: i32) -> (i32, i32) {
    %c0_i32 = arith.constant 0 : i32
    %c0_i32_0 = arith.constant 0 : i32
    %c0_i32_1 = arith.constant 0 : i32
    return %c0_i32, %c0_i32_0 : i32, i32
  }
  func.func @transform_5(%arg0: i32) -> (i32, i32) {
    %c0_i32 = arith.constant 0 : i32
    %c0_i32_0 = arith.constant 0 : i32
    %c0_i32_1 = arith.constant 0 : i32
    return %c0_i32, %c0_i32_0 : i32, i32
  }
  func.func @transform_6(%arg0: i32) -> (i32, i32) {
    %c0_i32 = arith.constant 0 : i32
    %c0_i32_0 = arith.constant 0 : i32
    %c0_i32_1 = arith.constant 0 : i32
    return %c0_i32, %c0_i32_0 : i32, i32
  }
  func.func @transform_7(%arg0: i32) -> (i32, i32) {
    %c0_i32 = arith.constant 0 : i32
    %c0_i32_0 = arith.constant 0 : i32
    return %c0_i32, %arg0 : i32, i32
  }
}

</mosaic_0001>

<bundles_post_ra>
// kernel: _lambda_.1
= control target key start
LH: loop header
LB: loop body
LE: loop exit
PB: predicated region body
PF: predicated region fallthrough
CT: control target
= control target key end

     0   :  { %s5110_s0 = inlined_call_operand.hbm [shape: f32[2,512], index: 0, kind: input, shape index: {}]   ;;  %s5111_s1 = inlined_call_operand.hbm [shape: f32[256,2], index: 1, kind: input, shape index: {}]   ;;  %s5112_s2 = inlined_call_operand.hbm [shape: f32[256,1], index: 2, kind: input, shape index: {}]   ;;  %s5113_s3 = inlined_call_operand.hbm [shape: f32[256,256], index: 3, kind: input, shape index: {}]   ;;  %s5114_s4 = inlined_call_operand.hbm [shape: f32[256,1], index: 4, kind: input, shape index: {}]   ;;  %s5115_s5 = inlined_call_operand.hbm [shape: f32[256,1], index: 5, kind: input, shape index: {}]   ;;  %s5116_s6 = inlined_call_operand.<no memory space> [shape: f32[1,1], index: 6, kind: input, shape index: {}]   ;;  %s5117_s7 = inlined_call_operand.hbm [shape: f32[1,512], index: 7, kind: output, shape index: {}]  }
   0x1   :  { %v12_v0 = vstv %s5116_s6 }
   0x2   :  { %13 = vst [vmem:[#allocation2] sm:$0x1] %v12_v0 }
   0x3   :  { %14 = vsyncpa [#allocation4], 0 }
   0x4   :  { %15 = vsyncpa [#allocation7], 0 }
   0x5   :  { %16 = vsyncpa [#allocation10], 0 }
   0x6   :  { %17 = vsyncpa [#allocation13], 0 }
   0x7   :  { %18 = vsyncpa [#allocation5], 0  ;;  %s3468_s26 = smov [#allocation6]  }
   0x8   :  { %s34_s27 = sshll.u32 %s3468_s26, 4  ;;  %s35_s27 = int_to_ptr.vmem [resolvable:$true] %s34_s27 }
   0x9   :  { %s3326_s28 = scalar_lea.vmem %s35_s27, 4096  ;;  %p3331_p1 = scmp.lt.s32.totalorder %s35_s27, %s35_s27 }
   0xa   :  { %p3327_p0 = scmp.ne.s32.totalorder %s35_s27, %s3326_s28  ;;  %p3332_p2 = scmp.lt.s32.totalorder %s3326_s28, %s3326_s28 }
   0xc   :  { %p3333_p3 = por %p3332_p2, %p3331_p1 }
   0xe   :  { %p3334_p4 = pnand %p3333_p3, %p3327_p0 }
  0x10   :  { %3337 = shalt.err (!%p3334_p4)
}
  0x11   :  { %s3469_s29 = smov 128   ;;  %s3470_s30 = smov 8  }
  0x12   :  { %40 = dma.hbm_to_vmem [thread:$0]  %s5111_s1, 4096, %s35_s27, [#allocation7], %s3469_s29, %s3469_s29, %s3470_s30  }
  0x13   :  { %s3471_s9 = smov [#allocation9]  }
  0x14   :  { %s58_s10 = sshll.u32 %s3471_s9, 4  ;;  %s59_s10 = int_to_ptr.vmem [resolvable:$true] %s58_s10 }
  0x15   :  { %s3346_s11 = scalar_lea.vmem %s59_s10, 8192  ;;  %p3351_p6 = scmp.lt.s32.totalorder %s59_s10, %s59_s10 }
  0x16   :  { %p3347_p5 = scmp.ne.s32.totalorder %s59_s10, %s3346_s11  ;;  %p3352_p7 = scmp.lt.s32.totalorder %s3346_s11, %s3346_s11 }
  0x18   :  { %p3353_p8 = por %p3352_p7, %p3351_p6 }
  0x1a   :  { %p3354_p9 = pnand %p3353_p8, %p3347_p5 }
  0x1c   :  { %3357 = shalt.err (!%p3354_p9)
}
  0x1d   :  { %s3472_s12 = smov 256   ;;  %s3473_s13 = smov 16  }
  0x1e   :  { %64 = dma.hbm_to_vmem [thread:$0]  %s5113_s3, 8192, %s59_s10, [#allocation10], %s3472_s12, %s3472_s12, %s3473_s13  }
  0x1f   :  { %s3474_s16 = smov [#allocation3]   ;;  %s3475_s18 = smov [#allocation8]  }
  0x20   :  { %s25_s17 = sshll.u32 %s3474_s16, 4  ;;  %s46_s1 = sshll.u32 %s3475_s18, 4  ;;  %s26_s17 = int_to_ptr.vmem [resolvable:$true] %s25_s17  ;;  %s47_s1 = int_to_ptr.vmem [resolvable:$true] %s46_s1 }
  0x21   :  { %s3366_s19 = scalar_lea.vmem %s26_s17, 128  ;;  %p3371_p11 = scmp.lt.s32.totalorder %s26_s17, %s26_s17 }
  0x22   :  { %p3367_p10 = scmp.ne.s32.totalorder %s26_s17, %s3366_s19  ;;  %p3372_p12 = scmp.lt.s32.totalorder %s3366_s19, %s3366_s19 }
  0x24   :  { %p3373_p13 = por %p3372_p12, %p3371_p11 }
  0x26   :  { %p3374_p0 = pnand %p3373_p13, %p3367_p10 }
  0x28   :  { %3377 = shalt.err (!%p3374_p0)
}
  0x29   :  { %28 = dma.hbm_to_vmem [thread:$0]  %s5110_s0, 128, %s26_s17, [#allocation4]  }
  0x2a   :  { %s3386_s22 = scalar_lea.vmem %s47_s1, 4096  ;;  %p3391_p2 = scmp.lt.s32.totalorder %s47_s1, %s47_s1 }
  0x2b   :  { %p3387_p1 = scmp.ne.s32.totalorder %s47_s1, %s3386_s22  ;;  %p3392_p3 = scmp.lt.s32.totalorder %s3386_s22, %s3386_s22 }
  0x2d   :  { %p3393_p4 = por %p3392_p3, %p3391_p2 }
  0x2f   :  { %p3394_p5 = pnand %p3393_p4, %p3387_p1 }
  0x31   :  { %3397 = shalt.err (!%p3394_p5)
}
  0x32   :  { %52 = dma.hbm_to_vmem [thread:$0]  %s5112_s2, 4096, %s47_s1, [#allocation7], %s3469_s29, %s3469_s29, %s3470_s30  }
  0x33   :  { %s3476_s24 = smov [#allocation11]   ;;  %s3477_s26 = smov [#allocation12]  }
  0x34   :  { %s70_s25 = sshll.u32 %s3476_s24, 4  ;;  %s82_s27 = sshll.u32 %s3477_s26, 4  ;;  %s71_s25 = int_to_ptr.vmem [resolvable:$true] %s70_s25  ;;  %s83_s27 = int_to_ptr.vmem [resolvable:$true] %s82_s27 }
  0x35   :  { %s3406_s0 = scalar_lea.vmem %s71_s25, 4096  ;;  %p3411_p7 = scmp.lt.s32.totalorder %s71_s25, %s71_s25 }
  0x36   :  { %p3407_p6 = scmp.ne.s32.totalorder %s71_s25, %s3406_s0  ;;  %p3412_p8 = scmp.lt.s32.totalorder %s3406_s0, %s3406_s0 }
  0x38   :  { %p3413_p9 = por %p3412_p8, %p3411_p7 }
  0x3a   :  { %p3414_p10 = pnand %p3413_p9, %p3407_p6 }
  0x3c   :  { %3417 = shalt.err (!%p3414_p10)
}
  0x3d   :  { %76 = dma.hbm_to_vmem [thread:$0]  %s5114_s4, 4096, %s71_s25, [#allocation10], %s3469_s29, %s3469_s29, %s3470_s30  }
  0x3e   :  { %s3426_s2 = scalar_lea.vmem %s83_s27, 4096  ;;  %p3431_p12 = scmp.lt.s32.totalorder %s83_s27, %s83_s27 }
  0x3f   :  { %p3427_p11 = scmp.ne.s32.totalorder %s83_s27, %s3426_s2  ;;  %p3432_p13 = scmp.lt.s32.totalorder %s3426_s2, %s3426_s2 }
  0x41   :  { %p3433_p0 = por %p3432_p13, %p3431_p12 }
  0x43   :  { %p3434_p1 = pnand %p3433_p0, %p3427_p11 }
  0x45   :  { %3437 = shalt.err (!%p3434_p1)
}
  0x46   :  { %88 = dma.hbm_to_vmem [thread:$0]  %s5115_s5, 4096, %s83_s27, [#allocation13], %s3469_s29, %s3469_s29, %s3470_s30  }
  0x47   :  { %3458 = dma.done.wait [#allocation4], 128  }
  0x48   :  { %3459 = vsyncadd [#allocation4], 4294967168 }
  0x49   :  { %3460 = dma.done.wait [#allocation7], 8192  }
  0x4a   :  { %3461 = vsyncadd [#allocation7], 4294959104 }
  0x4b   :  { %3462 = dma.done.wait [#allocation10], 12288  }
  0x4c   :  { %3463 = vsyncadd [#allocation10], 4294955008 }
  0x4d   :  { %3464 = dma.done.wait [#allocation13], 4096  }
  0x4e   :  { %3465 = vsyncadd [#allocation13], 4294963200  ;;  %v5121_v1 = vmov 1   ;;  %v5119_v2 = vmov 0   ;;  %v112_v3 = vld [vmem:[#allocation6 + $0x10] sm:$0xff]  ;;  %v110_v4 = vld [vmem:[#allocation6] sm:$0xff] }
  0x4f   :  { %2782 = vset.pattern.permute.xlu0 %v5121_v1  ;;  %2781 = vset.pattern.permute.xlu1 %v5119_v2  ;;  %v3557_v5 = vld [vmem:[#allocation6 + $0x18] sm:$0xff]  ;;  %v124_v6 = vld [vmem:[#allocation6 + $0x70] sm:$0xff]  ;;  %v115_v7 = vld [vmem:[#allocation6 + $0x28] sm:$0xff]  ;;  %s3481_s4 = smov [#allocation14]  }
  0x50   :  { %154 = vperm.xlu1 %2781, %v112_v3   ;;  %468 = vperm.xlu0 %2782, %v110_v4   ;;  %v121_v8 = vld [vmem:[#allocation6 + $0x58] sm:$0xff]  ;;  %v118_v10 = vld [vmem:[#allocation6 + $0x40] sm:$0xff]  ;;  %v3563_v11 = vld [vmem:[#allocation6 + $0x48] sm:$0xff]  ;;  %s2755_s5 = sshll.u32 %s3481_s4, 4  ;;  %s2756_s5 = int_to_ptr.vmem [resolvable:$true] %s2755_s5 }
  0x51   :  { %v3560_v9 = vld [vmem:[#allocation6 + $0x38] sm:$0xff]  ;;  %v123_v12 = vld [vmem:[#allocation6 + $0x68] sm:$0xff]  ;;  %v140_v13 = vld [vmem:[#allocation6 + $0xf0] sm:$0xff]  ;;  %s3438_s29 = scalar_lea.vmem %s2756_s5, 64  ;;  %p3443_p3 = scmp.lt.s32.totalorder %s2756_s5, %s2756_s5 }
  0x52   :  { %v125_v14 = vld [vmem:[#allocation6 + $0x78] sm:$0xff]  ;;  %v3567_v15 = vld [vmem:[#allocation6 + $0x88] sm:$0xff]  ;;  %v3572_v18 = vld [vmem:[#allocation6 + $0x20] sm:$0xff]  ;;  %p3439_p2 = scmp.ne.s32.totalorder %s2756_s5, %s3438_s29  ;;  %p3444_p4 = scmp.lt.s32.totalorder %s3438_s29, %s3438_s29 }
  0x53   :  { %v111_v16 = vld [vmem:[#allocation6 + $0x8] sm:$0xff]  ;;  %v3570_v17 = vld [vmem:[#allocation6 + $0x98] sm:$0xff]  ;;  %v3578_v20 = vld [vmem:[#allocation6 + $0x30] sm:$0xff] }
  0x54   :  { %159 = vperm.xlu1 %2781, %v3557_v5   ;;  %524 = vperm.xlu0 %2782, %v124_v6   ;;  %v3576_v19 = vld [vmem:[#allocation6 + $0xa8] sm:$0xff]  ;;  %v3582_v21 = vld [vmem:[#allocation6 + $0xb8] sm:$0xff]  ;;  %v120_v23 = vld [vmem:[#allocation6 + $0x50] sm:$0xff]  ;;  %p3445_p5 = por %p3444_p4, %p3443_p3 }
  0x55   :  { %v3585_v22 = vld [vmem:[#allocation6 + $0xc8] sm:$0xff]  ;;  %v3588_v24 = vld [vmem:[#allocation6 + $0xd8] sm:$0xff]  ;;  %v122_v25 = vld [vmem:[#allocation6 + $0x60] sm:$0xff] }
  0x56   :  { %v3591_v26 = vld [vmem:[#allocation6 + $0xe8] sm:$0xff]  ;;  %v3594_v27 = vld [vmem:[#allocation6 + $0xf8] sm:$0xff]  ;;  %v3596_v28 = vld [vmem:[#allocation6 + $0x80] sm:$0xff]  ;;  %p3446_p6 = pnand %p3445_p5, %p3439_p2 }
  0x57   :  { %v3600_v29 = vld [vmem:[#allocation6 + $0x90] sm:$0xff]  ;;  %v3604_v30 = vld [vmem:[#allocation6 + $0xa0] sm:$0xff]  ;;  %v900_v36 = vld [vmem:[#allocation8 + $0x68] sm:$0xff] }
  0x58   :  { %169 = vperm.xlu1 %2781, %v115_v7   ;;  %512 = vperm.xlu0 %2782, %v121_v8   ;;  %v3607_v31 = vld [vmem:[#allocation6 + $0xb0] sm:$0xff]  ;;  %v134_v32 = vld [vmem:[#allocation6 + $0xc0] sm:$0xff]  ;;  %v902_v37 = vld [vmem:[#allocation8 + $0x78] sm:$0xff] }
  0x59   :  { %v3610_v33 = vld [vmem:[#allocation6 + $0xd0] sm:$0xff]  ;;  %v3614_v35 = vld [vmem:[#allocation6 + $0xe0] sm:$0xff]  ;;  %v898_v39 = vld [vmem:[#allocation8 + $0x58] sm:$0xff] }
  0x5a   :  { %v901_v34 = vld [vmem:[#allocation8 + $0x70] sm:$0xff]  ;;  %v899_v38 = vld [vmem:[#allocation8 + $0x60] sm:$0xff]  ;;  %v896_v40 = vld [vmem:[#allocation8 + $0x48] sm:$0xff] }
  0x5b   :  { %v897_v41 = vld [vmem:[#allocation8 + $0x50] sm:$0xff]  ;;  %v918_v44 = vld [vmem:[#allocation8 + $0xf8] sm:$0xff]  ;;  %v915_v45 = vld [vmem:[#allocation8 + $0xe0] sm:$0xff] }
  0x5c   :  { %179 = vperm.xlu1 %2781, %v3560_v9   ;;  %500 = vperm.xlu0 %2782, %v118_v10   ;;  %v893_v42 = vld [vmem:[#allocation8 + $0x30] sm:$0xff]  ;;  %v895_v46 = vld [vmem:[#allocation8 + $0x40] sm:$0xff]  ;;  %v912_v47 = vld [vmem:[#allocation8 + $0xc8] sm:$0xff] }
  0x5d   :  { %v889_v43 = vld [vmem:[#allocation8 + $0x10] sm:$0xff]  ;;  %v894_v48 = vld [vmem:[#allocation8 + $0x38] sm:$0xff]  ;;  %v892_v56 = vld [vmem:[#allocation8 + $0x28] sm:$0xff] }
  0x5e   :  { %v909_v49 = vld [vmem:[#allocation8 + $0xb0] sm:$0xff]  ;;  %v891_v59 = vld [vmem:[#allocation8 + $0x20] sm:$0xff]  ;;  %v890_v62 = vld [vmem:[#allocation8 + $0x18] sm:$0xff] }
  0x60   :  { %189 = vperm.xlu1 %2781, %v3563_v11   ;;  %488 = vperm.xlu0 %2782, %v115_v7  }
  0x64   :  { %199 = vperm.xlu1 %2781, %v121_v8   ;;  %476 = vperm.xlu0 %2782, %v112_v3   ;;  %v906_v3 = vld [vmem:[#allocation8 + $0x98] sm:$0xff]  ;;  %v888_v8 = vld [vmem:[#allocation8 + $0x8] sm:$0xff] }
  0x68   :  { %209 = vperm.xlu1 %2781, %v123_v12   ;;  %588 = vperm.xlu0 %2782, %v140_v13  }
  0x6c   :  { %219 = vperm.xlu1 %2781, %v125_v14   ;;  %2793 = vset.pattern.permute.xlu0 %v5119_v2 }
  0x6d   :  { %144 = vperm.xlu0 %2793, %v110_v4  }
  0x70   :  { %229 = vperm.xlu1 %2781, %v3567_v15  }
  0x71   :  { %149 = vperm.xlu0 %2793, %v111_v16  }
  0x74   :  { %239 = vperm.xlu1 %2781, %v3570_v17  }
  0x75   :  { %164 = vperm.xlu0 %2793, %v3572_v18  }
  0x78   :  { %249 = vperm.xlu1 %2781, %v3576_v19  }
  0x79   :  { %174 = vperm.xlu0 %2793, %v3578_v20  }
  0x7c   :  { %259 = vperm.xlu1 %2781, %v3582_v21  }
  0x7d   :  { %184 = vperm.xlu0 %2793, %v118_v10   ;;  %v1399_v10 = vld [vmem:[#allocation11] sm:$0xff] }
  0x80   :  { %269 = vperm.xlu1 %2781, %v3585_v22  }
  0x81   :  { %194 = vperm.xlu0 %2793, %v120_v23  }
  0x84   :  { %279 = vperm.xlu1 %2781, %v3588_v24  }
  0x85   :  { %204 = vperm.xlu0 %2793, %v122_v25  }
  0x88   :  { %289 = vperm.xlu1 %2781, %v3591_v26  }
  0x89   :  { %214 = vperm.xlu0 %2793, %v124_v6   ;;  %v904_v6 = vld [vmem:[#allocation8 + $0x88] sm:$0xff] }
  0x8c   :  { %299 = vperm.xlu1 %2781, %v3594_v27  }
  0x8d   :  { %224 = vperm.xlu0 %2793, %v3596_v28  }
  0x90   :  { %2783 = vset.pattern.permute.xlu1 %v5121_v1 }
  0x91   :  { %472 = vperm.xlu1 %2783, %v111_v16   ;;  %234 = vperm.xlu0 %2793, %v3600_v29  }
  0x95   :  { %528 = vperm.xlu1 %2783, %v125_v14   ;;  %244 = vperm.xlu0 %2793, %v3604_v30   ;;  %v1401_v14 = vld [vmem:[#allocation11 + $0x10] sm:$0xff] }
  0x99   :  { %520 = vperm.xlu1 %2783, %v123_v12   ;;  %254 = vperm.xlu0 %2793, %v3607_v31   ;;  %v887_v12 = vld [vmem:[#allocation8] sm:$0xff] }
  0x9d   :  { %516 = vperm.xlu1 %2783, %v122_v25   ;;  %264 = vperm.xlu0 %2793, %v134_v32  }
  0xa1   :  { %2784 = vset.pattern.permute.xlu1 %v5119_v2  ;;  %274 = vperm.xlu0 %2793, %v3610_v33  }
  0xa2   :  { %991 = vperm.xlu1 %2784, %v901_v34  }
  0xa5   :  { %284 = vperm.xlu0 %2793, %v3614_v35  }
  0xa6   :  { %986 = vperm.xlu1 %2784, %v900_v36   ;;  %v1409_v36 = vld [vmem:[#allocation11 + $0x50] sm:$0xff] }
  0xa9   :  { %294 = vperm.xlu0 %2793, %v140_v13  }
  0xaa   :  { %2785 = vset.pattern.permute.xlu1 %v5121_v1 }
  0xab   :  { %508 = vperm.xlu1 %2785, %v120_v23  }
  0xad   :  { %996 = vperm.xlu0 %2793, %v902_v37   ;;  %v916_v37 = vld [vmem:[#allocation8 + $0xe8] sm:$0xff] }
  0xaf   :  { %504 = vperm.xlu1 %2785, %v3563_v11  }
  0xb1   :  { %981 = vperm.xlu0 %2793, %v899_v38  }
  0xb3   :  { %2786 = vset.pattern.permute.xlu1 %v5119_v2 }
  0xb4   :  { %976 = vperm.xlu1 %2786, %v898_v39   ;;  %v1411_v39 = vld [vmem:[#allocation11 + $0x60] sm:$0xff] }
  0xb5   :  { %966 = vperm.xlu0 %2793, %v896_v40  }
  0xb8   :  { %971 = vperm.xlu1 %2786, %v897_v41  }
  0xb9   :  { %951 = vperm.xlu0 %2793, %v893_v42   ;;  %v1413_v42 = vld [vmem:[#allocation11 + $0x70] sm:$0xff] }
  0xbc   :  { %2787 = vset.pattern.permute.xlu1 %v5121_v1 }
  0xbd   :  { %496 = vperm.xlu1 %2787, %v3560_v9   ;;  %931 = vperm.xlu0 %2793, %v889_v43   ;;  %v5118_v43 = vlaneseq }
  0xc1   :  { %492 = vperm.xlu1 %2787, %v3578_v20   ;;  %1076 = vperm.xlu0 %2793, %v918_v44  }
  0xc5   :  { %2788 = vset.pattern.permute.xlu1 %v5119_v2  ;;  %1061 = vperm.xlu0 %2793, %v915_v45  }
  0xc6   :  { %961 = vperm.xlu1 %2788, %v895_v46   ;;  %v1415_v46 = vld [vmem:[#allocation11 + $0x80] sm:$0xff] }
  0xc9   :  { %1046 = vperm.xlu0 %2793, %v912_v47   ;;  %v3708_v47 = vshrl.u32 %v5118_v43, 7 }
  0xca   :  { %956 = vperm.xlu1 %2788, %v894_v48   ;;  %v914_v48 = vld [vmem:[#allocation8 + $0xd8] sm:$0xff] }
  0xcb   :  { %v3624_v50 = vpop.permute.xlu1 %154  ;;  %v3626_v51 = vpop.permute.xlu0 %468  ;;  %5166 = vst [vmem:[#allocation36_spill] sm:$0xff] %v3708_v47 }
  0xcc   :  { %5150 = vst [vmem:[#allocation20_spill] sm:$0xff] %v3624_v50  ;;  %5151 = vst [vmem:[#allocation21_spill] sm:$0xff] %v3626_v51 }
  0xcd   :  { %1031 = vperm.xlu0 %2793, %v909_v49  }
  0xce   :  { %2789 = vset.pattern.permute.xlu1 %v5121_v1 }
  0xcf   :  { %v3629_v52 = vpop.permute.xlu1 %159  ;;  %484 = vperm.xlu1 %2789, %v3572_v18   ;;  %v3632_v53 = vpop.permute.xlu0 %524 }
  0xd1   :  { %2801 = vset.pattern.permute.xlu0 %v5121_v1 }
  0xd2   :  { %576 = vperm.xlu0 %2801, %v3588_v24   ;;  %v1405_v24 = vld [vmem:[#allocation11 + $0x30] sm:$0xff] }
  0xd3   :  { %v3636_v54 = vpop.permute.xlu1 %169  ;;  %480 = vperm.xlu1 %2789, %v3557_v5   ;;  %v3639_v55 = vpop.permute.xlu0 %512 }
  0xd6   :  { %564 = vperm.xlu0 %2801, %v134_v32   ;;  %v917_v32 = vld [vmem:[#allocation8 + $0xf0] sm:$0xff] }
  0xd7   :  { %v3641_v57 = vpop.permute.xlu1 %179  ;;  %2790 = vset.pattern.permute.xlu1 %v5119_v2  ;;  %v3644_v58 = vpop.permute.xlu0 %500 }
  0xd8   :  { %946 = vperm.xlu1 %2790, %v892_v56  }
  0xda   :  { %552 = vperm.xlu0 %2801, %v3576_v19   ;;  %v1403_v19 = vld [vmem:[#allocation11 + $0x20] sm:$0xff] }
  0xdb   :  { %v3647_v60 = vpop.permute.xlu1 %189  ;;  %v3649_v61 = vpop.permute.xlu0 %488 }
  0xdc   :  { %941 = vperm.xlu1 %2790, %v891_v59   ;;  %v1417_v59 = vld [vmem:[#allocation11 + $0x90] sm:$0xff] }
  0xde   :  { %540 = vperm.xlu0 %2801, %v3600_v29   ;;  %v1407_v29 = vld [vmem:[#allocation11 + $0x40] sm:$0xff] }
  0xdf   :  { %v3652_v63 = vpop.permute.xlu1 %199  ;;  %v3654_v0 = vpop.permute.xlu0 %476 }
  0xe0   :  { %5152 = vst [vmem:[#allocation22_spill] sm:$0xff] %v3654_v0  ;;  %936 = vperm.xlu1 %2790, %v890_v62   ;;  %v309_v62 = vsub.s32 2, %v3708_v47 }
  0xe2   :  { %2804 = vset.pattern.permute.xlu0 %v5119_v2 }
  0xe3   :  { %v3657_v4 = vpop.permute.xlu1 %209  ;;  %1016 = vperm.xlu0 %2804, %v906_v3   ;;  %v3659_v5 = vpop.permute.xlu0 %588  ;;  %v313_v3 = vsub.s32 4, %v3708_v47 }
  0xe4   :  { %5153 = vst [vmem:[#allocation23_spill] sm:$0xff] %v3659_v5  ;;  %2791 = vset.pattern.permute.xlu1 %v5121_v1 }
  0xe5   :  { %592 = vperm.xlu1 %2791, %v3594_v27  }
  0xe7   :  { %v3663_v7 = vpop.permute.xlu1 %219  ;;  %1006 = vperm.xlu0 %2804, %v904_v6   ;;  %v913_v6 = vld [vmem:[#allocation8 + $0xd0] sm:$0xff] }
  0xe8   :  { %v3665_v9 = vpop.permute.xlu0 %144 }
  0xe9   :  { %5154 = vst [vmem:[#allocation24_spill] sm:$0xff] %v3665_v9  ;;  %2792 = vset.pattern.permute.xlu1 %v5119_v2  ;;  %v2233_v9 = vld [vmem:[#allocation12] sm:$0xff] }
  0xea   :  { %926 = vperm.xlu1 %2792, %v888_v8   ;;  %v317_v8 = vsub.s32 6, %v3708_v47 }
  0xeb   :  { %v3668_v11 = vpop.permute.xlu1 %229  ;;  %1433 = vperm.xlu0 %2804, %v1399_v10  }
  0xec   :  { %5155 = vst [vmem:[#allocation25_spill] sm:$0xff] %v3668_v11  ;;  %v3670_v13 = vpop.permute.xlu0 %149  ;;  %v911_v11 = vld [vmem:[#allocation8 + $0xc0] sm:$0xff] }
  0xed   :  { %5156 = vst [vmem:[#allocation26_spill] sm:$0xff] %v3670_v13 }
  0xee   :  { %921 = vperm.xlu1 %2792, %v887_v12  }
  0xef   :  { %v3672_v16 = vpop.permute.xlu1 %239  ;;  %1443 = vperm.xlu0 %2804, %v1401_v14   ;;  %v1419_v14 = vld [vmem:[#allocation11 + $0xa0] sm:$0xff] }
  0xf0   :  { %5157 = vst [vmem:[#allocation27_spill] sm:$0xff] %v3672_v16  ;;  %v3674_v18 = vpop.permute.xlu0 %164 }
  0xf1   :  { %5158 = vst [vmem:[#allocation28_spill] sm:$0xff] %v3674_v18 }
  0xf2   :  { %2794 = vset.pattern.permute.xlu1 %v5121_v1 }
  0xf3   :  { %v3677_v20 = vpop.permute.xlu1 %249  ;;  %584 = vperm.xlu1 %2794, %v3591_v26   ;;  %1453 = vperm.xlu0 %2804, %v1403_v19   ;;  %v597_v19 = vsub.s32 1, %v3708_v47 }
  0xf4   :  { %5159 = vst [vmem:[#allocation29_spill] sm:$0xff] %v3677_v20  ;;  %v3680_v23 = vpop.permute.xlu0 %174 }
  0xf7   :  { %v3682_v25 = vpop.permute.xlu1 %259  ;;  %580 = vperm.xlu1 %2794, %v3614_v35   ;;  %1463 = vperm.xlu0 %2804, %v1405_v24   ;;  %v601_v24 = vsub.s32 3, %v3708_v47 }
  0xf8   :  { %5160 = vst [vmem:[#allocation30_spill] sm:$0xff] %v3682_v25  ;;  %v3685_v27 = vpop.permute.xlu0 %184 }
  0xfb   :  { %v3687_v34 = vpop.permute.xlu1 %269  ;;  %2795 = vset.pattern.permute.xlu1 %v5119_v2  ;;  %1473 = vperm.xlu0 %2804, %v1407_v29   ;;  %v605_v29 = vsub.s32 5, %v3708_v47 }
  0xfc   :  { %5161 = vst [vmem:[#allocation31_spill] sm:$0xff] %v3687_v34  ;;  %1071 = vperm.xlu1 %2795, %v917_v32   ;;  %v3690_v26 = vpop.permute.xlu0 %194  ;;  %v609_v32 = vsub.s32 7, %v3708_v47 }
  0xff   :  { %v3692_v38 = vpop.permute.xlu1 %279  ;;  %1483 = vperm.xlu0 %2804, %v1409_v36  }
 0x100   :  { %5162 = vst [vmem:[#allocation32_spill] sm:$0xff] %v3692_v38  ;;  %1066 = vperm.xlu1 %2795, %v916_v37   ;;  %v3694_v35 = vpop.permute.xlu0 %204 }
 0x103   :  { %v3696_v40 = vpop.permute.xlu1 %289  ;;  %1493 = vperm.xlu0 %2804, %v1411_v39  }
 0x104   :  { %5163 = vst [vmem:[#allocation33_spill] sm:$0xff] %v3696_v40  ;;  %2796 = vset.pattern.permute.xlu1 %v5121_v1  ;;  %v3699_v41 = vpop.permute.xlu0 %214  ;;  %v5188_v40 = vmov 0  }
 0x105   :  { %572 = vperm.xlu1 %2796, %v3610_v33   ;;  %v3716_v33 = vsub.s32 0, %v3708_v47 }
 0x107   :  { %v3702_v44 = vpop.permute.xlu1 %299  ;;  %1503 = vperm.xlu0 %2804, %v1413_v42   ;;  %5169 = vst [vmem:[#allocation39_spill] sm:$0xff] %v3716_v33 }
 0x108   :  { %5164 = vst [vmem:[#allocation34_spill] sm:$0xff] %v3702_v44  ;;  %v3704_v45 = vpop.permute.xlu0 %224 }
 0x109   :  { %5165 = vst [vmem:[#allocation35_spill] sm:$0xff] %v3704_v45  ;;  %568 = vperm.xlu1 %2796, %v3585_v22   ;;  %v109_v22 = vld [vmem:[#allocation3] sm:$0xff] }
 0x10a   :  { %v306_v36 = vrot.slane %v109_v22, %v3716_v33  ;;  %v310_v37 = vrot.slane %v109_v22, %v309_v62  ;;  %v314_v39 = vrot.slane %v109_v22, %v313_v3  ;;  %v318_v42 = vrot.slane %v109_v22, %v317_v8 }
 0x10b   :  { %1513 = vperm.xlu0 %2804, %v1415_v46   ;;  %v598_v43 = vrot.slane %v109_v22, %v597_v19  ;;  %v606_v1 = vrot.slane %v109_v22, %v605_v29  ;;  %v5172_v3 = vmov 1  }
 0x10c   :  { %v3710_v49 = vpop.permute.xlu1 %472  ;;  %v3712_v56 = vpop.permute.xlu0 %234  ;;  %v3738_v47 = vrot.slane %v310_v37, %v3716_v33  ;;  %v3741_v62 = vrot.slane %v314_v39, %v3716_v33 }
 0x10d   :  { %5167 = vst [vmem:[#allocation37_spill] sm:$0xff] %v3710_v49  ;;  %5168 = vst [vmem:[#allocation38_spill] sm:$0xff] %v3712_v56  ;;  %2797 = vset.pattern.permute.xlu1 %v5119_v2  ;;  %v602_v2 = vrot.slane %v109_v22, %v601_v24  ;;  %v3735_v56 = vrot.slane %v306_v36, %v3716_v33  ;;  %v3752_v24 = vrot.slane %v598_v43, %v597_v19 }
 0x10e   :  { %1056 = vperm.xlu1 %2797, %v914_v48   ;;  %v3766_v37 = vmul.f32 %v3738_v47, %v3624_v50  ;;  %v3770_v39 = vmul.f32 %v3741_v62, %v3624_v50  ;;  %v3782_v43 = vmul.f32 %v3741_v62, %v3629_v52  ;;  %v3811_v20 = vmul.f32 %v3741_v62, %v3636_v54 }
 0x10f   :  { %1523 = vperm.xlu0 %2804, %v1417_v59   ;;  %v1421_v59 = vld [vmem:[#allocation11 + $0xb0] sm:$0xff]  ;;  %v3754_v29 = vrot.slane %v602_v2, %v597_v19  ;;  %v3774_v2 = vmul.f32 %v3735_v56, %v3629_v52  ;;  %v3829_v38 = vmul.f32 %v3735_v56, %v3641_v57  ;;  %v3837_v34 = vmul.f32 %v3741_v62, %v3641_v57 }
 0x110   :  { %v3721_v10 = vpop.permute.xlu1 %528  ;;  %v3723_v12 = vpop.permute.xlu0 %244  ;;  %5175 = vst [vmem:[#allocation44_spill] sm:$0xff] %v3770_v39  ;;  %5178 = vst [vmem:[#allocation47_spill] sm:$0xff] %v3782_v43  ;;  %v383_v44 = vmul.f32 %v3735_v56, %v3652_v63  ;;  %v395_v51 = vmul.f32 %v3735_v56, %v3699_v41  ;;  %v3880_v43 = vmul.f32 %v3735_v56, %v3647_v60 }
 0x111   :  { %5170 = vst [vmem:[#allocation40_spill] sm:$0xff] %v3723_v12  ;;  %v610_v12 = vrot.slane %v109_v22, %v609_v32  ;;  %v3756_v32 = vrot.slane %v606_v1, %v597_v19  ;;  %5176 = vst [vmem:[#allocation45_spill] sm:$0xff] %v3774_v2  ;;  %v3778_v1 = vmul.f32 %v3738_v47, %v3629_v52 }
 0x112   :  { %1051 = vperm.xlu1 %2797, %v913_v6   ;;  %v3746_v6 = vrot.slane %v318_v42, %v3716_v33  ;;  %v688_v42 = vmul.f32 %v3754_v29, %v3632_v53  ;;  %5183 = vst [vmem:[#allocation52_spill] sm:$0xff] %v3811_v20  ;;  %5185 = vst [vmem:[#allocation54_spill] sm:$0xff] %v3829_v38  ;;  %v3850_v49 = vmul.f32 %v3754_v29, %v3644_v58 }
 0x113   :  { %1533 = vperm.xlu0 %2804, %v1419_v14   ;;  %v1423_v14 = vld [vmem:[#allocation11 + $0xc0] sm:$0xff]  ;;  %v3758_v36 = vrot.slane %v610_v12, %v597_v19  ;;  %5177 = vst [vmem:[#allocation46_spill] sm:$0xff] %v3778_v1  ;;  %v687_v19 = vmul.f32 %v3752_v24, %v3632_v53  ;;  %v677_v25 = vmul.f32 %v3756_v32, %v3639_v55  ;;  %5187 = vst [vmem:[#allocation56_spill] sm:$0xff] %v3837_v34 }
 0x114   :  { %v3730_v46 = vpop.permute.xlu1 %520  ;;  %v3732_v48 = vpop.permute.xlu0 %254  ;;  %v3786_v12 = vmul.f32 %v3746_v6, %v3629_v52  ;;  %v1425_v52 = vld [vmem:[#allocation11 + $0xd0] sm:$0xff]  ;;  %v3815_v16 = vmul.f32 %v3746_v6, %v3636_v54  ;;  %v3842_v5 = vmul.f32 %v3746_v6, %v3641_v57  ;;  %5191 = vst [vmem:[#allocation59_spill] sm:$0xff] %v3850_v49  ;;  %v386_v39 = vmul.f32 %v3746_v6, %v3652_v63 }
 0x115   :  { %5171 = vst [vmem:[#allocation41_spill] sm:$0xff] %v3732_v48  ;;  %v3797_v33 = vmul.f32 %v3758_v36, %v3632_v53  ;;  %v676_v48 = vmul.f32 %v3754_v29, %v3639_v55  ;;  %v3884_v1 = vmul.f32 %v3738_v47, %v3647_v60  ;;  %v3888_v2 = vmul.f32 %v3741_v62, %v3647_v60 }
 0x116   :  { %2798 = vset.pattern.permute.xlu1 %v5172_v3  ;;  %5179 = vst [vmem:[#allocation48_spill] sm:$0xff] %v3786_v12  ;;  %5184 = vst [vmem:[#allocation53_spill] sm:$0xff] %v3815_v16  ;;  %v3898_v16 = vmul.f32 %v3752_v24, %v3649_v61  ;;  %v398_v20 = vmul.f32 %v3746_v6, %v3699_v41  ;;  %v815_v34 = vadd.f32 %v687_v19, %v395_v51 }
 0x117   :  { %560 = vperm.xlu1 %2798, %v3582_v21   ;;  %1543 = vperm.xlu0 %2804, %v1421_v59   ;;  %v3762_v21 = vmul.f32 %v3735_v56, %v3624_v50  ;;  %v689_v59 = vmul.f32 %v3756_v32, %v3632_v53  ;;  %5189 = vst [vmem:[#allocation57_spill] sm:$0xff] %v3842_v5 }
 0x118   :  { %v3748_v8 = vpop.permute.xlu1 %516  ;;  %v3750_v22 = vpop.permute.xlu0 %264  ;;  %v640_v50 = vmul.f32 %v3754_v29, %v3654_v0  ;;  %v3894_v0 = vmul.f32 %v3746_v6, %v3647_v60  ;;  %5195 = vst [vmem:[#allocation63_spill] sm:$0xff] %v3898_v16  ;;  %v392_v16 = vmul.f32 %v3738_v47, %v3657_v4  ;;  %v393_v51 = vmul.f32 %v3741_v62, %v3657_v4 }
 0x119   :  { %5173 = vst [vmem:[#allocation42_spill] sm:$0xff] %v3750_v22  ;;  %5174 = vst [vmem:[#allocation43_spill] sm:$0xff] %v3762_v21  ;;  %v675_v22 = vmul.f32 %v3752_v24, %v3639_v55  ;;  %v910_v21 = vld [vmem:[#allocation8 + $0xb8] sm:$0xff]  ;;  %v390_v38 = vmul.f32 %v3746_v6, %v3694_v35  ;;  %v679_v49 = vmul.f32 %v3752_v24, %v3748_v8 }
 0x11b   :  { %556 = vperm.xlu1 %2798, %v3607_v31   ;;  %1553 = vperm.xlu0 %2804, %v1423_v14   ;;  %v3803_v31 = vmul.f32 %v3735_v56, %v3636_v54  ;;  %v3807_v14 = vmul.f32 %v3738_v47, %v3636_v54  ;;  %v3833_v54 = vmul.f32 %v3738_v47, %v3641_v57 }
 0x11c   :  { %v3799_v45 = vpop.permute.xlu0 %274  ;;  %v385_v57 = vmul.f32 %v3741_v62, %v3652_v63 }
 0x11d   :  { %5180 = vst [vmem:[#allocation49_spill] sm:$0xff] %v3799_v45  ;;  %5181 = vst [vmem:[#allocation50_spill] sm:$0xff] %v3803_v31  ;;  %v3817_v53 = vpop.permute.xlu1 %991  ;;  %v678_v45 = vmul.f32 %v3758_v36, %v3639_v55  ;;  %v3846_v55 = vmul.f32 %v3752_v24, %v3644_v58  ;;  %v3904_v31 = vadd.f32 %v675_v22, %v383_v44 }
 0x11e   :  { %5182 = vst [vmem:[#allocation51_spill] sm:$0xff] %v3807_v14  ;;  %5186 = vst [vmem:[#allocation55_spill] sm:$0xff] %v3833_v54  ;;  %v2235_v14 = vld [vmem:[#allocation12 + $0x10] sm:$0xff]  ;;  %v391_v54 = vmul.f32 %v3735_v56, %v3657_v4  ;;  %v683_v44 = vmul.f32 %v3752_v24, %v3730_v46  ;;  %v401_v22 = vmul.f32 %v3741_v62, %v3663_v7 }
 0x11f   :  { %2799 = vset.pattern.permute.xlu1 %v5188_v40  ;;  %1563 = vperm.xlu0 %2804, %v1425_v52   ;;  %5190 = vst [vmem:[#allocation58_spill] sm:$0xff] %v3846_v55  ;;  %v384_v52 = vmul.f32 %v3738_v47, %v3652_v63  ;;  %v396_v63 = vmul.f32 %v3738_v47, %v3699_v41 }
 0x120   :  { %1041 = vperm.xlu1 %2799, %v911_v11   ;;  %v3854_v13 = vpop.permute.xlu0 %284  ;;  %v3868_v11 = vmul.f32 %v3756_v32, %v3644_v58  ;;  %v3910_v60 = vadd.f32 %v678_v45, %v386_v39  ;;  %v2237_v39 = vld [vmem:[#allocation12 + $0x20] sm:$0xff]  ;;  %v1135_v19 = vadd.f32 %v3817_v53, %v815_v34 }
 0x121   :  { %5192 = vst [vmem:[#allocation60_spill] sm:$0xff] %v3854_v13  ;;  %v3864_v12 = vpop.permute.xlu1 %986  ;;  %v3872_v13 = vmul.f32 %v3758_v36, %v3644_v58  ;;  %v397_v58 = vmul.f32 %v3741_v62, %v3699_v41  ;;  %v3906_v5 = vadd.f32 %v676_v48, %v384_v52  ;;  %v816_v41 = vadd.f32 %v688_v42, %v396_v63 }
 0x122   :  { %5193 = vst [vmem:[#allocation61_spill] sm:$0xff] %v3868_v11  ;;  %v399_v48 = vmul.f32 %v3735_v56, %v3663_v7  ;;  %v3941_v42 = vmul.f32 %v3738_v47, %v3663_v7  ;;  %v2239_v11 = vld [vmem:[#allocation12 + $0x30] sm:$0xff]  ;;  %2806 = vtanh.f32 %v1135_v19 }
 0x123   :  { %5194 = vst [vmem:[#allocation62_spill] sm:$0xff] %v3872_v13  ;;  %2267 = vperm.xlu0 %2804, %v2233_v9   ;;  %v3908_v9 = vadd.f32 %v677_v25, %v385_v57  ;;  %v394_v25 = vmul.f32 %v3746_v6, %v3657_v4  ;;  %v817_v45 = vadd.f32 %v689_v59, %v397_v58 }
 0x124   :  { %1036 = vperm.xlu1 %2799, %v910_v21   ;;  %v3902_v18 = vpop.permute.xlu0 %294  ;;  %v685_v4 = vmul.f32 %v3756_v32, %v3730_v46  ;;  %v3945_v59 = vmul.f32 %v3746_v6, %v3663_v7  ;;  %v1136_v34 = vadd.f32 %v3817_v53, %v816_v41  ;;  %v389_v57 = vmul.f32 %v3741_v62, %v3694_v35 }
 0x125   :  { %5196 = vst [vmem:[#allocation64_spill] sm:$0xff] %v3902_v18  ;;  %v3919_v18 = vadd.f32 %v640_v50, %v3766_v37  ;;  %v684_v50 = vmul.f32 %v3754_v29, %v3730_v46  ;;  %v818_v37 = vadd.f32 %v3797_v33, %v398_v20  ;;  %v387_v20 = vmul.f32 %v3735_v56, %v3694_v35 }
 0x126   :  { %v3916_v21 = vpop.permute.xlu1 %508  ;;  %v388_v33 = vmul.f32 %v3738_v47, %v3694_v35  ;;  %v691_v7 = vmul.f32 %v3752_v24, %v3721_v10  ;;  %v1137_v63 = vadd.f32 %v3817_v53, %v817_v45  ;;  %v811_v58 = vadd.f32 %v683_v44, %v391_v54 }
 0x127   :  { %5197 = vst [vmem:[#allocation65_spill] sm:$0xff] %v3919_v18  ;;  %2277 = vperm.xlu0 %2804, %v2235_v14   ;;  %v686_v14 = vmul.f32 %v3758_v36, %v3730_v46  ;;  %v693_v46 = vmul.f32 %v3756_v32, %v3721_v10  ;;  %v1138_v41 = vadd.f32 %v3817_v53, %v818_v37  ;;  %2808 = vtanh.f32 %v1136_v34 }
 0x128   :  { %2800 = vset.pattern.permute.xlu1 %v5172_v3  ;;  %v812_v13 = vadd.f32 %v684_v50, %v392_v16  ;;  %v813_v55 = vadd.f32 %v685_v4, %v393_v51  ;;  %v1131_v18 = vadd.f32 %v3864_v12, %v811_v58  ;;  %v680_v54 = vmul.f32 %v3754_v29, %v3748_v8  ;;  %v908_v51 = vld [vmem:[#allocation8 + $0xa8] sm:$0xff]  ;;  %v2241_v4 = vld [vmem:[#allocation12 + $0x40] sm:$0xff] }
 0x129   :  { %548 = vperm.xlu1 %2800, %v3604_v30   ;;  %v3954_v30 = vpop.permute.xlu0 %996  ;;  %v814_v35 = vadd.f32 %v686_v14, %v394_v25  ;;  %v681_v16 = vmul.f32 %v3756_v32, %v3748_v8  ;;  %2810 = vtanh.f32 %v1137_v63  ;;  %v819_v45 = vadd.f32 %v691_v7, %v399_v48 }
 0x12a   :  { %v3956_v52 = vpop.permute.xlu1 %504  ;;  %v1132_v44 = vadd.f32 %v3864_v12, %v812_v13  ;;  %v1133_v53 = vadd.f32 %v3864_v12, %v813_v55  ;;  %2812 = vtanh.f32 %v1138_v41  ;;  %v3983_v13 = vmul.f32 %v3735_v56, %v3680_v23 }
 0x12b   :  { %2287 = vperm.xlu0 %2804, %v2237_v39   ;;  %v1134_v37 = vadd.f32 %v3864_v12, %v814_v35  ;;  %v821_v39 = vadd.f32 %v693_v46, %v401_v22  ;;  %2814 = vtanh.f32 %v1131_v18  ;;  %v1139_v55 = vadd.f32 %v3954_v30, %v819_v45 }
 0x12c   :  { %v807_v48 = vadd.f32 %v679_v49, %v387_v20  ;;  %2816 = vtanh.f32 %v1132_v44  ;;  %v808_v12 = vadd.f32 %v680_v54, %v388_v33  ;;  %v3994_v22 = vmul.f32 %v3741_v62, %v3680_v23  ;;  %v907_v49 = vld [vmem:[#allocation8 + $0xa0] sm:$0xff]  ;;  %v2243_v33 = vld [vmem:[#allocation12 + $0x50] sm:$0xff] }
 0x12d   :  { %544 = vperm.xlu1 %2800, %v3570_v17   ;;  %v682_v17 = vmul.f32 %v3758_v36, %v3748_v8  ;;  %v982_v25 = vpop.permute.xlu0 %981  ;;  %v1141_v8 = vadd.f32 %v3954_v30, %v821_v39  ;;  %2818 = vtanh.f32 %v1133_v53  ;;  %v809_v18 = vadd.f32 %v681_v16, %v389_v57 }
 0x12e   :  { %v1127_v19 = vadd.f32 %v982_v25, %v807_v48  ;;  %v4000_v20 = vmul.f32 %v3735_v56, %v3690_v26  ;;  %2820 = vtanh.f32 %v1134_v37  ;;  %v1128_v7 = vadd.f32 %v982_v25, %v808_v12  ;;  %v2245_v37 = vld [vmem:[#allocation12 + $0x60] sm:$0xff] }
 0x12f   :  { %v977_v50 = vpop.permute.xlu1 %976  ;;  %2297 = vperm.xlu0 %2804, %v2239_v11   ;;  %v3989_v11 = vmul.f32 %v3738_v47, %v3680_v23  ;;  %v810_v34 = vadd.f32 %v682_v17, %v390_v38  ;;  %v4004_v63 = vmul.f32 %v3738_v47, %v3690_v26  ;;  %2822 = vtanh.f32 %v1139_v55 }
 0x130   :  { %v667_v57 = vmul.f32 %v3752_v24, %v3956_v52  ;;  %v1129_v58 = vadd.f32 %v982_v25, %v809_v18  ;;  %2824 = vtanh.f32 %v1141_v8  ;;  %v668_v46 = vmul.f32 %v3754_v29, %v3956_v52  ;;  %v2247_v8 = vld [vmem:[#allocation12 + $0x70] sm:$0xff] }
 0x131   :  { %2802 = vset.pattern.permute.xlu1 %v5188_v40  ;;  %v1130_v41 = vadd.f32 %v982_v25, %v810_v34  ;;  %v967_v54 = vpop.permute.xlu0 %966  ;;  %v692_v38 = vmul.f32 %v3754_v29, %v3721_v10  ;;  %v381_v35 = vmul.f32 %v3741_v62, %v3690_v26  ;;  %v669_v44 = vmul.f32 %v3756_v32, %v3956_v52 }
 0x132   :  { %1026 = vperm.xlu1 %2802, %v908_v51   ;;  %2826 = vtanh.f32 %v1127_v19  ;;  %v1123_v16 = vadd.f32 %v977_v50, %v3904_v31  ;;  %v4019_v53 = vmul.f32 %v3746_v6, %v3690_v26  ;;  %v670_v45 = vmul.f32 %v3758_v36, %v3956_v52 }
 0x133   :  { %v3996_v14 = vpop.permute.xlu1 %971  ;;  %2307 = vperm.xlu0 %2804, %v2241_v4   ;;  %2828 = vtanh.f32 %v1128_v7  ;;  %v1124_v51 = vadd.f32 %v977_v50, %v3906_v5  ;;  %v1125_v39 = vadd.f32 %v977_v50, %v3908_v9  ;;  %v795_v25 = vadd.f32 %v667_v57, %v3880_v43  ;;  %v4030_v4 = vpop.eup %2806 }
 0x134   :  { %2830 = vtanh.f32 %v1129_v58  ;;  %v694_v31 = vmul.f32 %v3758_v36, %v3721_v10  ;;  %v1126_v26 = vadd.f32 %v977_v50, %v3910_v60  ;;  %v796_v52 = vadd.f32 %v668_v46, %v3884_v1  ;;  %v4036_v55 = vpop.eup %2808 }
 0x135   :  { %2832 = vtanh.f32 %v1130_v41  ;;  %v820_v5 = vadd.f32 %v692_v38, %v3941_v42  ;;  %v671_v9 = vmul.f32 %v3752_v24, %v3916_v21  ;;  %v797_v43 = vadd.f32 %v669_v44, %v3888_v2  ;;  %v4047_v42 = vpop.permute.xlu0 %951 }
 0x136   :  { %1021 = vperm.xlu1 %2802, %v907_v49   ;;  %2834 = vtanh.f32 %v1123_v16  ;;  %v1115_v10 = vadd.f32 %v967_v54, %v795_v25  ;;  %v4042_v48 = vpop.eup %2810  ;;  %v672_v1 = vmul.f32 %v3754_v29, %v3916_v21  ;;  %v1116_v60 = vadd.f32 %v967_v54, %v796_v52 }
 0x137   :  { %2317 = vperm.xlu0 %2804, %v2243_v33   ;;  %2836 = vtanh.f32 %v1124_v51  ;;  %v4051_v12 = vpop.eup %2812  ;;  %v1117_v2 = vadd.f32 %v967_v54, %v797_v43  ;;  %v822_v18 = vadd.f32 %v694_v31, %v3945_v59  ;;  %v799_v33 = vadd.f32 %v671_v9, %v4000_v20  ;;  %v2251_v9 = vld [vmem:[#allocation12 + $0x90] sm:$0xff] }
 0x138   :  { %v4024_v17 = vpop.permute.xlu1 %496  ;;  %2838 = vtanh.f32 %v1125_v39  ;;  %v4056_v19 = vpop.eup %2814  ;;  %v1140_v57 = vadd.f32 %v3954_v30, %v820_v5  ;;  %v371_v38 = vmul.f32 %v3735_v56, %v3685_v27  ;;  %v373_v52 = vmul.f32 %v3741_v62, %v3685_v27 }
 0x139   :  { %2840 = vtanh.f32 %v1126_v26  ;;  %v4062_v7 = vpop.eup %2816  ;;  %v1142_v46 = vadd.f32 %v3954_v30, %v822_v18 }
 0x13a   :  { %2803 = vset.pattern.permute.xlu1 %v5172_v3  ;;  %v798_v3 = vadd.f32 %v670_v45, %v3894_v0  ;;  %v674_v0 = vmul.f32 %v3758_v36, %v3916_v21  ;;  %2842 = vtanh.f32 %v1115_v10  ;;  %v4069_v58 = vpop.eup %2818  ;;  %v905_v45 = vld [vmem:[#allocation8 + $0x90] sm:$0xff] }
 0x13b   :  { %536 = vperm.xlu1 %2803, %v3567_v15   ;;  %2327 = vperm.xlu0 %2804, %v2245_v37   ;;  %v673_v15 = vmul.f32 %v3756_v32, %v3916_v21  ;;  %2844 = vtanh.f32 %v1116_v60  ;;  %v800_v21 = vadd.f32 %v672_v1, %v4004_v63  ;;  %v4075_v20 = vpop.eup %2820  ;;  %v4086_v37 = vpop.permute.xlu0 %931  ;;  %v5198_v10 = vld [vmem:[#allocation65_spill] sm:$0xff] }
 0x13c   :  { %v4049_v50 = vpop.permute.xlu1 %492  ;;  %v1118_v49 = vadd.f32 %v967_v54, %v798_v3  ;;  %v2249_v54 = vld [vmem:[#allocation12 + $0x80] sm:$0xff]  ;;  %2846 = vtanh.f32 %v1117_v2  ;;  %v4082_v51 = vpop.eup %2822  ;;  %v802_v30 = vadd.f32 %v674_v0, %v4019_v53  ;;  %v1088_v1 = vadd.f32 %v4086_v37, %v5198_v10 }
 0x13d   :  { %v655_v34 = vmul.f32 %v3752_v24, %v4049_v50  ;;  %v656_v59 = vmul.f32 %v3754_v29, %v4049_v50  ;;  %v657_v41 = vmul.f32 %v3756_v32, %v4049_v50  ;;  %v801_v44 = vadd.f32 %v673_v15, %v381_v35  ;;  %v4089_v25 = vpop.eup %2824  ;;  %v5199_v15 = vld [vmem:[#allocation58_spill] sm:$0xff] }
 0x13e   :  { %2848 = vtanh.f32 %v1118_v49  ;;  %v1120_v63 = vadd.f32 %v3996_v14, %v800_v21  ;;  %v372_v35 = vmul.f32 %v3738_v47, %v3685_v27  ;;  %v791_v2 = vadd.f32 %v5199_v15, %v371_v38  ;;  %v5200_v49 = vld [vmem:[#allocation59_spill] sm:$0xff] }
 0x13f   :  { %532 = vperm.xlu1 %2803, %v3596_v28   ;;  %2337 = vperm.xlu0 %2804, %v2247_v8   ;;  %v1119_v28 = vadd.f32 %v3996_v14, %v799_v33  ;;  %v783_v39 = vadd.f32 %v655_v34, %v3983_v13  ;;  %v1121_v31 = vadd.f32 %v3996_v14, %v801_v44  ;;  %2850 = vtanh.f32 %v1140_v57  ;;  %v4096_v53 = vpop.eup %2826 }
 0x140   :  { %v784_v26 = vadd.f32 %v656_v59, %v3989_v11  ;;  %v1122_v13 = vadd.f32 %v3996_v14, %v802_v30  ;;  %2852 = vtanh.f32 %v1142_v46  ;;  %v785_v5 = vadd.f32 %v657_v41, %v3994_v22  ;;  %v4102_v43 = vpop.eup %2828  ;;  %v903_v14 = vld [vmem:[#allocation8 + $0x80] sm:$0xff]  ;;  %v5201_v59 = vld [vmem:[#allocation61_spill] sm:$0xff] }
 0x141   :  { %v4080_v16 = vpop.permute.xlu1 %961  ;;  %v4106_v11 = vmul.f32 %v3754_v29, %v3649_v61  ;;  %2854 = vtanh.f32 %v1119_v28  ;;  %v4114_v60 = vpop.eup %2830  ;;  %v374_v22 = vmul.f32 %v3746_v6, %v3685_v27  ;;  %v1103_v8 = vadd.f32 %v4047_v42, %v783_v39  ;;  %v1427_v46 = vld [vmem:[#allocation11 + $0xe0] sm:$0xff]  ;;  %v1400_v28 = vld [vmem:[#allocation11 + $0x8] sm:$0xff] }
 0x142   :  { %2856 = vtanh.f32 %v1120_v63  ;;  %v4120_v18 = vpop.eup %2832  ;;  %v1104_v0 = vadd.f32 %v4047_v42, %v784_v26  ;;  %v792_v34 = vadd.f32 %v5200_v49, %v372_v35  ;;  %v660_v27 = vmul.f32 %v3754_v29, %v4024_v17  ;;  %v5202_v63 = vld [vmem:[#allocation62_spill] sm:$0xff] }
 0x143   :  { %2805 = vset.pattern.permute.xlu1 %v5188_v40  ;;  %2347 = vperm.xlu0 %2804, %v2249_v54   ;;  %v366_v40 = vmul.f32 %v3746_v6, %v3680_v23  ;;  %2858 = vtanh.f32 %v1121_v31  ;;  %v659_v23 = vmul.f32 %v3752_v24, %v4024_v17  ;;  %v4126_v33 = vpop.eup %2834  ;;  %v1105_v57 = vadd.f32 %v4047_v42, %v785_v5  ;;  %v1402_v49 = vld [vmem:[#allocation11 + $0x18] sm:$0xff] }
 0x144   :  { %1011 = vperm.xlu1 %2805, %v905_v45   ;;  %2860 = vtanh.f32 %v1122_v13  ;;  %v793_v21 = vadd.f32 %v5201_v59, %v373_v52  ;;  %v4132_v41 = vpop.eup %2836  ;;  %v662_v54 = vmul.f32 %v3758_v36, %v4024_v17  ;;  %v658_v38 = vmul.f32 %v3758_v36, %v4049_v50  ;;  %v5203_v13 = vld [vmem:[#allocation54_spill] sm:$0xff] }
 0x145   :  { %v4112_v3 = vpop.permute.xlu1 %956  ;;  %2862 = vtanh.f32 %v1088_v1  ;;  %v1111_v44 = vadd.f32 %v4080_v16, %v791_v2  ;;  %v4139_v45 = vpop.eup %2838  ;;  %v661_v30 = vmul.f32 %v3756_v32, %v4024_v17  ;;  %v794_v39 = vadd.f32 %v5202_v63, %v374_v22  ;;  %v5204_v1 = vld [vmem:[#allocation55_spill] sm:$0xff]  ;;  %v1428_v22 = vld [vmem:[#allocation11 + $0xe8] sm:$0xff] }
 0x146   :  { %2864 = vtanh.f32 %v1103_v8  ;;  %v1112_v35 = vadd.f32 %v4080_v16, %v792_v34  ;;  %v4145_v26 = vpop.eup %2840  ;;  %v653_v52 = vmul.f32 %v3756_v32, %v3649_v61  ;;  %v1113_v50 = vadd.f32 %v4080_v16, %v793_v21  ;;  %v5205_v2 = vld [vmem:[#allocation57_spill] sm:$0xff]  ;;  %v5208_v21 = vld [vmem:[#allocation63_spill] sm:$0xff] }
 0x147   :  { %2357 = vperm.xlu0 %2804, %v2251_v9   ;;  %2866 = vtanh.f32 %v1104_v0  ;;  %v787_v5 = vadd.f32 %v659_v23, %v5203_v13  ;;  %v4151_v9 = vpop.eup %2842  ;;  %v654_v17 = vmul.f32 %v3758_v36, %v3649_v61  ;;  %v1114_v10 = vadd.f32 %v4080_v16, %v794_v39  ;;  %v5206_v61 = vld [vmem:[#allocation56_spill] sm:$0xff] }
 0x148   :  { %1001 = vperm.xlu1 %2805, %v903_v14   ;;  %2868 = vtanh.f32 %v1105_v57  ;;  %v788_v14 = vadd.f32 %v660_v27, %v5204_v1  ;;  %v4157_v8 = vpop.eup %2844  ;;  %v786_v15 = vadd.f32 %v658_v38, %v366_v40  ;;  %v790_v0 = vadd.f32 %v662_v54, %v5205_v2  ;;  %v5207_v27 = vld [vmem:[#allocation50_spill] sm:$0xff]  ;;  %v5209_v38 = vld [vmem:[#allocation51_spill] sm:$0xff]  ;;  %v5210_v39 = vld [vmem:[#allocation28_spill] sm:$0xff] }
 0x149   :  { %2870 = vtanh.f32 %v1111_v44  ;;  %v1107_v23 = vadd.f32 %v4112_v3, %v787_v5  ;;  %v4161_v34 = vpop.eup %2846  ;;  %v789_v57 = vadd.f32 %v661_v30, %v5206_v61  ;;  %v780_v44 = vadd.f32 %v4106_v11, %v5209_v38  ;;  %v5211_v13 = vld [vmem:[#allocation52_spill] sm:$0xff] }
 0x14a   :  { %v485_v31 = vpop.permute.xlu1 %484  ;;  %2872 = vtanh.f32 %v1112_v35  ;;  %v1108_v16 = vadd.f32 %v4112_v3, %v788_v14  ;;  %v1110_v40 = vadd.f32 %v4112_v3, %v790_v0  ;;  %v355_v30 = vmul.f32 %v3735_v56, %v5210_v39 }
 0x14b   :  { %1573 = vperm.xlu0 %2804, %v1427_v46   ;;  %v779_v46 = vadd.f32 %v5208_v21, %v5207_v27  ;;  %2874 = vtanh.f32 %v1113_v50  ;;  %v647_v54 = vmul.f32 %v3752_v24, %v485_v31  ;;  %v1109_v35 = vadd.f32 %v4112_v3, %v789_v57 }
 0x14c   :  { %1438 = vperm.xlu1 %2805, %v1400_v28   ;;  %v4167_v28 = vpop.eup %2848  ;;  %2876 = vtanh.f32 %v1114_v10  ;;  %v781_v5 = vadd.f32 %v653_v52, %v5211_v13  ;;  %v1106_v50 = vadd.f32 %v4047_v42, %v786_v15  ;;  %v648_v14 = vmul.f32 %v3754_v29, %v485_v31  ;;  %v5212_v52 = vld [vmem:[#allocation53_spill] sm:$0xff] }
 0x14d   :  { %v2851_v63 = vpop.eup %2850  ;;  %2878 = vtanh.f32 %v1107_v23  ;;  %v356_v2 = vmul.f32 %v3738_v47, %v5210_v39  ;;  %v357_v3 = vmul.f32 %v3741_v62, %v5210_v39  ;;  %v782_v10 = vadd.f32 %v654_v17, %v5212_v52 }
 0x14e   :  { %v481_v59 = vpop.permute.xlu1 %480  ;;  %v2853_v1 = vpop.eup %2852  ;;  %1591 = vmatprep.subr.mxu0 %v2851_v63  ;;  %2880 = vtanh.f32 %v1108_v16  ;;  %v358_v15 = vmul.f32 %v3746_v6, %v5210_v39  ;;  %v650_v0 = vmul.f32 %v3758_v36, %v485_v31 }
 0x14f   :  { %1578 = vperm.xlu0 %2804, %v1428_v22   ;;  %v649_v22 = vmul.f32 %v3756_v32, %v485_v31  ;;  %v4180_v11 = vpop.eup %2854  ;;  %1848 = vmatprep.subr.mxu1 %v2853_v1  ;;  %2882 = vtanh.f32 %v1110_v40  ;;  %v645_v21 = vmul.f32 %v3756_v32, %v481_v59 }
 0x150   :  { %1448 = vperm.xlu1 %2805, %v1402_v49   ;;  %1592 = vmatpush1.msra.mxu0 %v4082_v51  ;;  %v2857_v42 = vpop.eup %2856  ;;  %v775_v49 = vadd.f32 %v647_v54, %v355_v30  ;;  %2884 = vtanh.f32 %v1109_v35  ;;  %v778_v40 = vadd.f32 %v650_v0, %v358_v15  ;;  %v5215_v35 = vld [vmem:[#allocation46_spill] sm:$0xff] }
 0x151   :  { %1849 = vmatpush1.msra.mxu1 %v4089_v25  ;;  %1593 = vmatprep.subr.mxu0 %v4036_v55  ;;  %v4193_v61 = vpop.eup %2858  ;;  %2886 = vtanh.f32 %v1106_v50  ;;  %v776_v25 = vadd.f32 %v648_v14, %v356_v2  ;;  %v777_v31 = vadd.f32 %v649_v22, %v357_v3  ;;  %v5217_v14 = vld [vmem:[#allocation20_spill] sm:$0xff]  ;;  %v5218_v22 = vld [vmem:[#allocation43_spill] sm:$0xff] }
 0x152   :  { %1850 = vmatprep.subr.mxu1 %v4051_v12  ;;  %1594 = vmatpush1.msra.mxu0 %v4030_v4  ;;  %v2861_v16 = vpop.eup %2860  ;;  %v643_v4 = vmul.f32 %v3752_v24, %v481_v59  ;;  %v644_v12 = vmul.f32 %v3754_v29, %v481_v59  ;;  %v5219_v2 = vld [vmem:[#allocation48_spill] sm:$0xff] }
 0x153   :  { %v947_v23 = vpop.permute.xlu1 %946  ;;  %1851 = vmatpush1.msra.mxu1 %v4042_v48  ;;  %1595 = vmatprep.subr.mxu0 %v4062_v7  ;;  %v4199_v27 = vpop.eup %2862  ;;  %v5213_v48 = vld [vmem:[#allocation22_spill] sm:$0xff] }
 0x154   :  { %v1099_v51 = vadd.f32 %v947_v23, %v779_v46  ;;  %v1100_v17 = vadd.f32 %v947_v23, %v780_v44  ;;  %v1101_v57 = vadd.f32 %v947_v23, %v781_v5  ;;  %v1102_v55 = vadd.f32 %v947_v23, %v782_v10  ;;  %1852 = vmatprep.subr.mxu1 %v4075_v20  ;;  %v4206_v46 = vpop.eup %2864  ;;  %v5216_v5 = vld [vmem:[#allocation47_spill] sm:$0xff]  ;;  %v5220_v23 = vld [vmem:[#allocation21_spill] sm:$0xff] }
 0x155   :  { %1596 = vmatpush1.msra.mxu0 %v4056_v19  ;;  %v639_v7 = vmul.f32 %v3752_v24, %v5213_v48  ;;  %1853 = vmatpush1.msra.mxu1 %v4069_v58  ;;  %v646_v20 = vmul.f32 %v3758_v36, %v481_v59  ;;  %v4213_v54 = vpop.eup %2866  ;;  %v641_v58 = vmul.f32 %v3756_v32, %v5213_v48 }
 0x156   :  { %2888 = vtanh.f32 %v1099_v51  ;;  %1597 = vmatprep.subr.mxu0 %v4102_v43  ;;  %1854 = vmatprep.subr.mxu1 %v4120_v18  ;;  %v4217_v39 = vpop.eup %2868  ;;  %v642_v43 = vmul.f32 %v3758_v36, %v5213_v48  ;;  %v772_v13 = vadd.f32 %v644_v12, %v5215_v35  ;;  %v773_v1 = vadd.f32 %v645_v21, %v5216_v5  ;;  %v5222_v12 = vld [vmem:[#allocation24_spill] sm:$0xff]  ;;  %v5223_v21 = vld [vmem:[#allocation26_spill] sm:$0xff] }
 0x157   :  { %2890 = vtanh.f32 %v1100_v17  ;;  %v942_v19 = vpop.permute.xlu1 %941  ;;  %1598 = vmatpush1.msra.mxu0 %v4096_v53  ;;  %1855 = vmatpush1.msra.mxu1 %v4114_v60  ;;  %v2871_v59 = vpop.eup %2870  ;;  %v5214_v53 = vld [vmem:[#allocation45_spill] sm:$0xff]  ;;  %v350_v60 = vmul.f32 %v3746_v6, %v5217_v14  ;;  %v343_v48 = vmul.f32 %v3735_v56, %v5223_v21  ;;  %v346_v14 = vmul.f32 %v3746_v6, %v5223_v21 }
 0x158   :  { %2892 = vtanh.f32 %v1101_v57  ;;  %v1095_v38 = vadd.f32 %v942_v19, %v775_v49  ;;  %v1096_v44 = vadd.f32 %v942_v19, %v776_v25  ;;  %v1097_v63 = vadd.f32 %v942_v19, %v777_v31  ;;  %1599 = vmatprep.subr.mxu0 %v4132_v41  ;;  %1856 = vmatprep.subr.mxu1 %v4145_v26  ;;  %v2873_v50 = vpop.eup %2872  ;;  %v5221_v57 = vld [vmem:[#allocation44_spill] sm:$0xff] }
 0x159   :  { %2894 = vtanh.f32 %v1102_v55  ;;  %v1098_v18 = vadd.f32 %v942_v19, %v778_v40  ;;  %1600 = vmatpush1.msra.mxu0 %v4126_v33  ;;  %v771_v30 = vadd.f32 %v643_v4, %v5214_v53  ;;  %v767_v41 = vadd.f32 %v639_v7, %v5218_v22  ;;  %1857 = vmatpush1.msra.mxu1 %v4139_v45  ;;  %v2875_v3 = vpop.eup %2874  ;;  %v1429_v45 = vld [vmem:[#allocation11 + $0xf0] sm:$0xff]  ;;  %v1404_v4 = vld [vmem:[#allocation11 + $0x28] sm:$0xff] }
 0x15a   :  { %2896 = vtanh.f32 %v1095_v38  ;;  %1601 = vmatprep.subr.mxu0 %v2857_v42  ;;  %v774_v33 = vadd.f32 %v646_v20, %v5219_v2  ;;  %1858 = vmatprep.subr.mxu1 %v2861_v16  ;;  %v2877_v0 = vpop.eup %2876  ;;  %v4238_v49 = vmul.f32 %v3752_v24, %v5220_v23  ;;  %v770_v51 = vadd.f32 %v642_v43, %v350_v60  ;;  %v5224_v40 = vld [vmem:[#allocation34_spill] sm:$0xff]  ;;  %v5225_v38 = vld [vmem:[#allocation37_spill] sm:$0xff]  ;;  %v2257_v2 = vld [vmem:[#allocation12 + $0xc0] sm:$0xff] }
 0x15b   :  { %2898 = vtanh.f32 %v1096_v44  ;;  %v937_v26 = vpop.permute.xlu1 %936  ;;  %1602 = vmatpush1.msra.mxu0 %v4180_v11  ;;  %1859 = vmatpush1.msra.mxu1 %v4193_v61  ;;  %v2879_v17 = vpop.eup %2878  ;;  %v4244_v11 = vmul.f32 %v3754_v29, %v5220_v23  ;;  %v769_v16 = vadd.f32 %v641_v58, %v5221_v57  ;;  %v1087_v55 = vadd.f32 %v4086_v37, %v767_v41 }
 0x15c   :  { %2900 = vtanh.f32 %v1097_v63  ;;  %v1091_v52 = vadd.f32 %v937_v26, %v771_v30  ;;  %v1092_v10 = vadd.f32 %v937_v26, %v772_v13  ;;  %v1093_v15 = vadd.f32 %v937_v26, %v773_v1  ;;  %1603 = vmatprep.subr.mxu0 %v4157_v8  ;;  %1860 = vmatprep.subr.mxu1 %v4167_v28  ;;  %v2881_v61 = vpop.eup %2880  ;;  %v1430_v63 = vld [vmem:[#allocation11 + $0xf8] sm:$0xff] }
 0x15d   :  { %2902 = vtanh.f32 %v1098_v18  ;;  %v1094_v42 = vadd.f32 %v937_v26, %v774_v33  ;;  %1604 = vmatpush1.msra.mxu0 %v4151_v9  ;;  %v4252_v8 = vmul.f32 %v3756_v32, %v5220_v23  ;;  %v4256_v25 = vmul.f32 %v3758_v36, %v5220_v23  ;;  %1861 = vmatpush1.msra.mxu1 %v4161_v34  ;;  %v2883_v28 = vpop.eup %2882  ;;  %v1406_v13 = vld [vmem:[#allocation11 + $0x38] sm:$0xff]  ;;  %v4288_v26 = vpop.permute.xlu0 %1076 }
 0x15e   :  { %2904 = vtanh.f32 %v1091_v52  ;;  %v1090_v31 = vadd.f32 %v4086_v37, %v770_v51  ;;  %1605 = vmatprep.subr.mxu0 %v2873_v50  ;;  %v339_v9 = vmul.f32 %v3735_v56, %v5222_v12  ;;  %v1089_v7 = vadd.f32 %v4086_v37, %v769_v16  ;;  %1862 = vmatprep.subr.mxu1 %v2877_v0  ;;  %v2885_v19 = vpop.eup %2884 }
 0x15f   :  { %2906 = vtanh.f32 %v1092_v10  ;;  %1583 = vperm.xlu0 %2804, %v1429_v45   ;;  %v464_v34 = vmul.f32 %v3738_v47, %v5224_v40  ;;  %v635_v44 = vmul.f32 %v3752_v24, %v5225_v38  ;;  %1606 = vmatpush1.msra.mxu0 %v2871_v59  ;;  %v2887_v43 = vpop.eup %2886  ;;  %v340_v37 = vmul.f32 %v3738_v47, %v5222_v12  ;;  %v1408_v45 = vld [vmem:[#allocation11 + $0x48] sm:$0xff] }
 0x160   :  { %2908 = vtanh.f32 %v1093_v15  ;;  %v593_v20 = vpop.permute.xlu1 %592  ;;  %1863 = vmatpush1.msra.mxu1 %v2875_v3  ;;  %v344_v18 = vmul.f32 %v3738_v47, %v5223_v21  ;;  %v636_v53 = vmul.f32 %v3754_v29, %v5225_v38  ;;  %1458 = vperm.xlu1 %2805, %v1404_v4   ;;  %v345_v59 = vmul.f32 %v3741_v62, %v5223_v21 }
 0x161   :  { %2910 = vtanh.f32 %v1094_v42  ;;  %v756_v58 = vmul.f32 %v3754_v29, %v593_v20  ;;  %1607 = vmatprep.subr.mxu0 %v2881_v61  ;;  %v637_v35 = vmul.f32 %v3756_v32, %v5225_v38  ;;  %1864 = vmatprep.subr.mxu1 %v2883_v28  ;;  %v341_v50 = vmul.f32 %v3741_v62, %v5222_v12  ;;  %v2259_v61 = vld [vmem:[#allocation12 + $0xd0] sm:$0xff] }
 0x162   :  { %2912 = vtanh.f32 %v1087_v55  ;;  %1608 = vmatpush1.msra.mxu0 %v2879_v17  ;;  %v638_v60 = vmul.f32 %v3758_v36, %v5225_v38  ;;  %1865 = vmatpush1.msra.mxu1 %v2885_v19  ;;  %v342_v41 = vmul.f32 %v3746_v6, %v5222_v12  ;;  %v763_v3 = vadd.f32 %v635_v44, %v343_v48  ;;  %v1336_v48 = vld [vmem:[#allocation9 + $0x8] sm:$0xff] }
 0x163   :  { %v2889_v30 = vpop.eup %2888  ;;  %2914 = vtanh.f32 %v1090_v31  ;;  %v884_v5 = vadd.f32 %v756_v58, %v464_v34  ;;  %1588 = vperm.xlu0 %2804, %v1430_v63   ;;  %1609 = vmatprep.subr.mxu0 %v4213_v54  ;;  %v759_v52 = vadd.f32 %v4238_v49, %v339_v9  ;;  %v764_v0 = vadd.f32 %v636_v53, %v344_v18  ;;  %v2261_v18 = vld [vmem:[#allocation12 + $0xe0] sm:$0xff] }
 0x164   :  { %v2891_v1 = vpop.eup %2890  ;;  %2916 = vtanh.f32 %v1089_v7  ;;  %1866 = vmatprep.subr.mxu1 %v2887_v43  ;;  %1468 = vperm.xlu1 %2805, %v1406_v13   ;;  %v760_v23 = vadd.f32 %v4244_v11, %v340_v37  ;;  %v755_v54 = vmul.f32 %v3752_v24, %v593_v20  ;;  %v765_v42 = vadd.f32 %v637_v35, %v345_v59 }
 0x165   :  { %v2893_v22 = vpop.eup %2892  ;;  %v927_v33 = vpop.permute.xlu1 %926  ;;  %1610 = vmatpush1.msra.mxu0 %v4206_v46  ;;  %v1204_v15 = vadd.f32 %v4288_v26, %v884_v5  ;;  %1867 = vmatpush1.msra.mxu1 %v4217_v39  ;;  %v758_v49 = vmul.f32 %v3758_v36, %v593_v20  ;;  %v766_v46 = vadd.f32 %v638_v60, %v346_v14 }
 0x166   :  { %v2895_v10 = vpop.eup %2894  ;;  %1611 = vmatprep.subr.mxu0 %v2891_v1  ;;  %v1083_v17 = vadd.f32 %v927_v33, %v763_v3  ;;  %v1084_v16 = vadd.f32 %v927_v33, %v764_v0  ;;  %v463_v11 = vmul.f32 %v3735_v56, %v5224_v40  ;;  %v757_v39 = vmul.f32 %v3756_v32, %v593_v20  ;;  %v1410_v20 = vld [vmem:[#allocation11 + $0x58] sm:$0xff]  ;;  %v4311_v1 = vpop.permute.xlu0 %1061  ;;  %v5227_v3 = vld [vmem:[#allocation60_spill] sm:$0xff] }
 0x167   :  { %v2897_v51 = vpop.eup %2896  ;;  %2387 = vperm.xlu0 %2804, %v2257_v2   ;;  %1868 = vmatprep.subr.mxu1 %v2895_v10  ;;  %v1085_v31 = vadd.f32 %v927_v33, %v765_v42  ;;  %v466_v12 = vmul.f32 %v3746_v6, %v5224_v40  ;;  %2918 = vtanh.f32 %v1204_v15  ;;  %v1086_v9 = vadd.f32 %v927_v33, %v766_v46  ;;  %v5228_v10 = vld [vmem:[#allocation64_spill] sm:$0xff]  ;;  %v1414_v15 = vld [vmem:[#allocation11 + $0x78] sm:$0xff] }
 0x168   :  { %v2899_v57 = vpop.eup %2898  ;;  %1612 = vmatpush1.msra.mxu0 %v2889_v30  ;;  %1869 = vmatpush1.msra.mxu1 %v2893_v22  ;;  %v761_v21 = vadd.f32 %v4252_v8, %v341_v50  ;;  %v465_v19 = vmul.f32 %v3741_v62, %v5224_v40  ;;  %v883_v34 = vadd.f32 %v755_v54, %v463_v11  ;;  %2920 = vtanh.f32 %v1083_v17  ;;  %v2263_v22 = vld [vmem:[#allocation12 + $0xf0] sm:$0xff] }
 0x169   :  { %v2901_v55 = vpop.eup %2900  ;;  %v922_v4 = vpop.permute.xlu1 %921  ;;  %1478 = vperm.xlu1 %2805, %v1408_v45   ;;  %1613 = vmatprep.subr.mxu0 %v2899_v57  ;;  %v886_v63 = vadd.f32 %v758_v49, %v466_v12  ;;  %2922 = vtanh.f32 %v1084_v16  ;;  %v762_v58 = vadd.f32 %v4256_v25, %v342_v41  ;;  %v1412_v25 = vld [vmem:[#allocation11 + $0x68] sm:$0xff]  ;;  %v5226_v41 = vld [vmem:[#allocation23_spill] sm:$0xff]  ;;  %v461_v45 = vmul.f32 %v3741_v62, %v5228_v10  ;;  %v2701_v17 = vld [vmem:[#allocation2] sm:$0x1] }
 0x16a   :  { %v2903_v28 = vpop.eup %2902  ;;  %v1079_v38 = vadd.f32 %v922_v4, %v759_v52  ;;  %1614 = vmatpush1.msra.mxu0 %v2897_v51  ;;  %v1080_v43 = vadd.f32 %v922_v4, %v760_v23  ;;  %v885_v37 = vadd.f32 %v757_v39, %v465_v19  ;;  %2924 = vtanh.f32 %v1085_v31  ;;  %1655 = vmatprep.mubr.f32.mxu0 %v1336_v48  ;;  %v5229_v49 = vld [vmem:[#allocation33_spill] sm:$0xff]  ;;  %v4340_v11 = vpop.permute.xlu0 %1046 }
 0x16b   :  { %v2905_v7 = vpop.eup %2904  ;;  %1870 = vmatprep.subr.mxu1 %v2903_v28  ;;  %2397 = vperm.xlu0 %2804, %v2259_v61   ;;  %v1081_v53 = vadd.f32 %v922_v4, %v761_v21  ;;  %2926 = vtanh.f32 %v1086_v9  ;;  %v1082_v30 = vadd.f32 %v922_v4, %v762_v58  ;;  %v1203_v13 = vadd.f32 %v4288_v26, %v883_v34  ;;  %v1416_v28 = vld [vmem:[#allocation11 + $0x88] sm:$0xff] }
 0x16c   :  { %v2907_v44 = vpop.eup %2906  ;;  %1871 = vmatpush1.msra.mxu1 %v2901_v55  ;;  %2928 = vtanh.f32 %v1079_v38  ;;  %v1206_v50 = vadd.f32 %v4288_v26, %v886_v63  ;;  %v1205_v60 = vadd.f32 %v4288_v26, %v885_v37  ;;  %v751_v2 = vmul.f32 %v3752_v24, %v5226_v41  ;;  %1912 = vmatprep.mubr.f32.mxu1 %v1336_v48 }
 0x16d   :  { %v2909_v8 = vpop.eup %2908  ;;  %1615 = vmatprep.subr.mxu0 %v2907_v44  ;;  %1488 = vperm.xlu1 %2805, %v1410_v20   ;;  %2930 = vtanh.f32 %v1080_v43  ;;  %v451_v52 = vmul.f32 %v3735_v56, %v5227_v3  ;;  %v459_v26 = vmul.f32 %v3735_v56, %v5228_v10  ;;  %v753_v23 = vmul.f32 %v3756_v32, %v5226_v41 }
 0x16e   :  { %v2911_v40 = vpop.eup %2910  ;;  %1616 = vmatpush1.msra.mxu0 %v2905_v7  ;;  %v4307_v59 = vpop.permute.xlu1 %584  ;;  %2932 = vtanh.f32 %v1081_v53  ;;  %v460_v51 = vmul.f32 %v3738_v47, %v5228_v10  ;;  %v754_v54 = vmul.f32 %v3758_v36, %v5226_v41  ;;  %v462_v42 = vmul.f32 %v3746_v6, %v5228_v10 }
 0x16f   :  { %v2913_v35 = vpop.eup %2912  ;;  %1872 = vmatprep.subr.mxu1 %v2911_v40  ;;  %1617 = vmatprep.subr.mxu0 %v4199_v27  ;;  %v752_v27 = vmul.f32 %v3754_v29, %v5226_v41  ;;  %2934 = vtanh.f32 %v1082_v30  ;;  %v455_v46 = vmul.f32 %v3735_v56, %v5229_v49  ;;  %v456_v16 = vmul.f32 %v3738_v47, %v5229_v49  ;;  %v1418_v30 = vld [vmem:[#allocation11 + $0x98] sm:$0xff] }
 0x170   :  { %v2915_v5 = vpop.eup %2914  ;;  %2407 = vperm.xlu0 %2804, %v2261_v18   ;;  %1873 = vmatpush1.msra.mxu1 %v2909_v8  ;;  %2936 = vtanh.f32 %v1203_v13  ;;  %v457_v55 = vmul.f32 %v3741_v62, %v5229_v49  ;;  %v458_v39 = vmul.f32 %v3746_v6, %v5229_v49  ;;  %v452_v31 = vmul.f32 %v3738_v47, %v5227_v3 }
 0x171   :  { %v2917_v14 = vpop.eup %2916  ;;  %1874 = vmatprep.subr.mxu1 %v2915_v5  ;;  %1618 = vmatpush1.msra.mxu0 %v2913_v35  ;;  %2938 = vtanh.f32 %v1206_v50  ;;  %v879_v4 = vadd.f32 %v751_v2, %v459_v26  ;;  %v747_v12 = vmul.f32 %v3752_v24, %v4307_v59  ;;  %v880_v48 = vadd.f32 %v752_v27, %v460_v51 }
 0x172   :  { %1498 = vperm.xlu1 %2805, %v1412_v25   ;;  %1875 = vmatpush1.msra.mxu1 %v2917_v14  ;;  %v581_v33 = vpop.permute.xlu1 %580  ;;  %2940 = vtanh.f32 %v1205_v60  ;;  %v881_v7 = vadd.f32 %v753_v23, %v461_v45  ;;  %v748_v19 = vmul.f32 %v3754_v29, %v4307_v59  ;;  %v882_v38 = vadd.f32 %v754_v54, %v462_v42  ;;  %v1420_v23 = vld [vmem:[#allocation11 + $0xa8] sm:$0xff] }
 0x173   :  { %v743_v0 = vmul.f32 %v3752_v24, %v581_v33  ;;  %v749_v44 = vmul.f32 %v3756_v32, %v4307_v59  ;;  %v744_v63 = vmul.f32 %v3754_v29, %v581_v33  ;;  %v750_v8 = vmul.f32 %v3758_v36, %v4307_v59  ;;  %v4362_v59 = vpop.permute.xlu0 %1031 }
 0x174   :  { %2417 = vperm.xlu0 %2804, %v2263_v22   ;;  %v2919_v61 = vpop.eup %2918  ;;  %v746_v37 = vmul.f32 %v3758_v36, %v581_v33  ;;  %v453_v40 = vmul.f32 %v3741_v62, %v5227_v3  ;;  %v745_v35 = vmul.f32 %v3756_v32, %v581_v33  ;;  %v875_v5 = vadd.f32 %v747_v12, %v455_v46 }
 0x175   :  { %v871_v57 = vadd.f32 %v743_v0, %v451_v52  ;;  %v2921_v21 = vpop.eup %2920  ;;  %v454_v14 = vmul.f32 %v3746_v6, %v5227_v3  ;;  %v876_v22 = vadd.f32 %v748_v19, %v456_v16  ;;  %v872_v2 = vadd.f32 %v744_v63, %v452_v31  ;;  %v5230_v31 = vld [vmem:[#allocation31_spill] sm:$0xff] }
 0x176   :  { %1508 = vperm.xlu1 %2805, %v1414_v15   ;;  %v2923_v34 = vpop.eup %2922  ;;  %v877_v27 = vadd.f32 %v749_v44, %v457_v55  ;;  %v878_v26 = vadd.f32 %v750_v8, %v458_v39  ;;  %v873_v0 = vadd.f32 %v745_v35, %v453_v40  ;;  %v1422_v39 = vld [vmem:[#allocation11 + $0xb8] sm:$0xff] }
 0x177   :  { %v1072_v9 = vpop.permute.xlu1 %1071  ;;  %v1191_v20 = vadd.f32 %v4311_v1, %v871_v57  ;;  %v2925_v43 = vpop.eup %2924  ;;  %1619 = vmatprep.subr.mxu0 %v2923_v34  ;;  %v874_v10 = vadd.f32 %v746_v37, %v454_v14  ;;  %v1192_v57 = vadd.f32 %v4311_v1, %v872_v2  ;;  %v5232_v37 = vld [vmem:[#allocation49_spill] sm:$0xff] }
 0x178   :  { %2704 = vperm.xlu0 %2804, %v2701_v17   ;;  %v1199_v58 = vadd.f32 %v1072_v9, %v879_v4  ;;  %v1200_v18 = vadd.f32 %v1072_v9, %v880_v48  ;;  %v2927_v53 = vpop.eup %2926  ;;  %v1201_v13 = vadd.f32 %v1072_v9, %v881_v7  ;;  %1620 = vmatpush1.msra.mxu0 %v2921_v21  ;;  %v577_v46 = vpop.permute.xlu0 %576  ;;  %v5231_v48 = vld [vmem:[#allocation32_spill] sm:$0xff] }
 0x179   :  { %v2929_v50 = vpop.eup %2928  ;;  %2942 = vtanh.f32 %v1191_v20  ;;  %1876 = vmatprep.subr.mxu1 %v2927_v53  ;;  %v1202_v60 = vadd.f32 %v1072_v9, %v882_v38  ;;  %v1194_v16 = vadd.f32 %v4311_v1, %v874_v10  ;;  %v1193_v55 = vadd.f32 %v4311_v1, %v873_v0  ;;  %v1424_v20 = vld [vmem:[#allocation11 + $0xc8] sm:$0xff] }
 0x17a   :  { %1518 = vperm.xlu1 %2805, %v1416_v28   ;;  %v2931_v41 = vpop.eup %2930  ;;  %2944 = vtanh.f32 %v1199_v58  ;;  %1877 = vmatpush1.msra.mxu1 %v2925_v43  ;;  %v440_v4 = vmul.f32 %v3738_v47, %v5230_v31  ;;  %v739_v28 = vmul.f32 %v3752_v24, %v577_v46  ;;  %v439_v9 = vmul.f32 %v3735_v56, %v5230_v31 }
 0x17b   :  { %v1067_v25 = vpop.permute.xlu1 %1066  ;;  %v2933_v52 = vpop.eup %2932  ;;  %2946 = vtanh.f32 %v1200_v18  ;;  %1621 = vmatprep.subr.mxu0 %v2931_v41  ;;  %v4375_v21 = vmul.f32 %v3741_v62, %v5230_v31  ;;  %v740_v1 = vmul.f32 %v3754_v29, %v577_v46  ;;  %v447_v7 = vmul.f32 %v3735_v56, %v5231_v48 }
 0x17c   :  { %v1195_v33 = vadd.f32 %v1067_v25, %v875_v5  ;;  %v1196_v15 = vadd.f32 %v1067_v25, %v876_v22  ;;  %v2935_v3 = vpop.eup %2934  ;;  %2948 = vtanh.f32 %v1201_v13  ;;  %v1197_v51 = vadd.f32 %v1067_v25, %v877_v27  ;;  %1622 = vmatpush1.msra.mxu0 %v2929_v50 }
 0x17d   :  { %v2937_v45 = vpop.eup %2936  ;;  %2950 = vtanh.f32 %v1202_v60  ;;  %1878 = vmatprep.subr.mxu1 %v2935_v3  ;;  %v1198_v54 = vadd.f32 %v1067_v25, %v878_v26  ;;  %1623 = vmatprep.subr.mxu0 %v2919_v61  ;;  %v741_v19 = vmul.f32 %v3756_v32, %v577_v46  ;;  %v442_v38 = vmul.f32 %v3746_v6, %v5230_v31  ;;  %v1426_v60 = vld [vmem:[#allocation11 + $0xd8] sm:$0xff] }
 0x17e   :  { %1528 = vperm.xlu1 %2805, %v1418_v30   ;;  %v2939_v17 = vpop.eup %2938  ;;  %2952 = vtanh.f32 %v1195_v33  ;;  %1879 = vmatpush1.msra.mxu1 %v2933_v52  ;;  %v448_v44 = vmul.f32 %v3738_v47, %v5231_v48  ;;  %v449_v63 = vmul.f32 %v3741_v62, %v5231_v48  ;;  %v742_v58 = vmul.f32 %v3758_v36, %v577_v46 }
 0x17f   :  { %1624 = vmatpush2.msra.mxu0 %v2937_v45  ;;  %v2941_v49 = vpop.eup %2940  ;;  %2954 = vtanh.f32 %v1196_v15  ;;  %1880 = vmatprep.subr.mxu1 %v2939_v17  ;;  %v450_v8 = vmul.f32 %v3746_v6, %v5231_v48  ;;  %v443_v18 = vmul.f32 %v3735_v56, %v5232_v37  ;;  %v867_v30 = vadd.f32 %v739_v28, %v447_v7 }
 0x180   :  { %v573_v42 = vpop.permute.xlu1 %572  ;;  %2956 = vtanh.f32 %v1197_v51  ;;  %1881 = vmatpush2.msra.mxu1 %v2941_v49  ;;  %v444_v13 = vmul.f32 %v3738_v47, %v5232_v37  ;;  %v868_v50 = vadd.f32 %v740_v1, %v448_v44  ;;  %v869_v2 = vadd.f32 %v741_v19, %v449_v63 }
 0x181   :  { %2958 = vtanh.f32 %v1198_v54  ;;  %v735_v53 = vmul.f32 %v3752_v24, %v573_v42  ;;  %v736_v25 = vmul.f32 %v3754_v29, %v573_v42  ;;  %v737_v22 = vmul.f32 %v3756_v32, %v573_v42 }
 0x182   :  { %1538 = vperm.xlu1 %2805, %v1420_v23   ;;  %2960 = vtanh.f32 %v1192_v57  ;;  %v738_v52 = vmul.f32 %v3758_v36, %v573_v42  ;;  %v870_v26 = vadd.f32 %v742_v58, %v450_v8  ;;  %v445_v0 = vmul.f32 %v3741_v62, %v5232_v37  ;;  %v565_v58 = vpop.permute.xlu0 %564 }
 0x183   :  { %2962 = vtanh.f32 %v1194_v16  ;;  %v863_v54 = vadd.f32 %v735_v53, %v443_v18  ;;  %v446_v57 = vmul.f32 %v3746_v6, %v5232_v37  ;;  %v864_v49 = vadd.f32 %v736_v25, %v444_v13  ;;  %v2234_v16 = vld [vmem:[#allocation12 + $0x8] sm:$0xff]  ;;  %v5233_v37 = vld [vmem:[#allocation30_spill] sm:$0xff] }
 0x184   :  { %v569_v61 = vpop.permute.xlu1 %568  ;;  %2964 = vtanh.f32 %v1193_v55  ;;  %v431_v18 = vmul.f32 %v3735_v56, %v5233_v37  ;;  %v2238_v13 = vld [vmem:[#allocation12 + $0x28] sm:$0xff] }
 0x185   :  { %v732_v12 = vmul.f32 %v3754_v29, %v569_v61  ;;  %v731_v41 = vmul.f32 %v3752_v24, %v569_v61  ;;  %v734_v10 = vmul.f32 %v3758_v36, %v569_v61  ;;  %v733_v23 = vmul.f32 %v3756_v32, %v569_v61 }
 0x186   :  { %1548 = vperm.xlu1 %2805, %v1422_v39   ;;  %v4388_v43 = vpop.eup %2942  ;;  %v865_v39 = vadd.f32 %v737_v22, %v445_v0  ;;  %v866_v28 = vadd.f32 %v738_v52, %v446_v57 }
 0x187   :  { %v860_v34 = vadd.f32 %v732_v12, %v440_v4  ;;  %v2945_v35 = vpop.eup %2944  ;;  %v859_v55 = vadd.f32 %v731_v41, %v439_v9  ;;  %v862_v4 = vadd.f32 %v734_v10, %v442_v38  ;;  %v861_v48 = vadd.f32 %v733_v23, %v4375_v21  ;;  %v2236_v38 = vld [vmem:[#allocation12 + $0x18] sm:$0xff] }
 0x188   :  { %v2947_v14 = vpop.eup %2946  ;;  %v433_v41 = vmul.f32 %v3741_v62, %v5233_v37 }
 0x189   :  { %v1057_v40 = vpop.permute.xlu1 %1056  ;;  %v1180_v5 = vadd.f32 %v4340_v11, %v860_v34  ;;  %v2949_v33 = vpop.eup %2948  ;;  %1625 = vmatprep.subr.mxu0 %v2947_v14  ;;  %v1179_v44 = vadd.f32 %v4340_v11, %v859_v55  ;;  %v1182_v21 = vadd.f32 %v4340_v11, %v862_v4  ;;  %v1181_v8 = vadd.f32 %v4340_v11, %v861_v48 }
 0x18a   :  { %1558 = vperm.xlu1 %2805, %v1424_v20   ;;  %v1187_v27 = vadd.f32 %v1057_v40, %v867_v30  ;;  %v1188_v15 = vadd.f32 %v1057_v40, %v868_v50  ;;  %v2951_v3 = vpop.eup %2950  ;;  %v1189_v51 = vadd.f32 %v1057_v40, %v869_v2  ;;  %1626 = vmatpush2.msra.mxu0 %v2945_v35  ;;  %v5235_v50 = vld [vmem:[#allocation42_spill] sm:$0xff] }
 0x18b   :  { %v2953_v17 = vpop.eup %2952  ;;  %2966 = vtanh.f32 %v1180_v5  ;;  %1882 = vmatprep.subr.mxu1 %v2951_v3  ;;  %v1190_v42 = vadd.f32 %v1057_v40, %v870_v26  ;;  %v5234_v40 = vld [vmem:[#allocation41_spill] sm:$0xff]  ;;  %v727_v35 = vmul.f32 %v3752_v24, %v565_v58  ;;  %v432_v11 = vmul.f32 %v3738_v47, %v5233_v37 }
 0x18c   :  { %v2955_v46 = vpop.eup %2954  ;;  %2968 = vtanh.f32 %v1187_v27  ;;  %1883 = vmatpush2.msra.mxu1 %v2949_v33  ;;  %v427_v30 = vmul.f32 %v3735_v56, %v5234_v40  ;;  %v729_v5 = vmul.f32 %v3756_v32, %v565_v58  ;;  %v435_v14 = vmul.f32 %v3735_v56, %v5235_v50 }
 0x18d   :  { %v1052_v45 = vpop.permute.xlu1 %1051  ;;  %v2957_v31 = vpop.eup %2956  ;;  %2970 = vtanh.f32 %v1188_v15  ;;  %1627 = vmatprep.subr.mxu0 %v2955_v46  ;;  %v434_v2 = vmul.f32 %v3746_v6, %v5233_v37  ;;  %v436_v27 = vmul.f32 %v3738_v47, %v5235_v50  ;;  %v437_v33 = vmul.f32 %v3741_v62, %v5235_v50  ;;  %v2240_v15 = vld [vmem:[#allocation12 + $0x38] sm:$0xff] }
 0x18e   :  { %1568 = vperm.xlu1 %2805, %v1426_v60   ;;  %v1183_v61 = vadd.f32 %v1052_v45, %v863_v54  ;;  %v1184_v12 = vadd.f32 %v1052_v45, %v864_v49  ;;  %v2959_v1 = vpop.eup %2958  ;;  %2972 = vtanh.f32 %v1189_v51  ;;  %v1185_v7 = vadd.f32 %v1052_v45, %v865_v39  ;;  %1628 = vmatpush2.msra.mxu0 %v2953_v17 }
 0x18f   :  { %v2961_v19 = vpop.eup %2960  ;;  %2974 = vtanh.f32 %v1190_v42  ;;  %1884 = vmatprep.subr.mxu1 %v2959_v1  ;;  %v1186_v9 = vadd.f32 %v1052_v45, %v866_v28  ;;  %v730_v60 = vmul.f32 %v3758_v36, %v565_v58  ;;  %v428_v10 = vmul.f32 %v3738_v47, %v5234_v40  ;;  %v2242_v1 = vld [vmem:[#allocation12 + $0x48] sm:$0xff] }
 0x190   :  { %v2963_v34 = vpop.eup %2962  ;;  %2976 = vtanh.f32 %v1183_v61  ;;  %1885 = vmatpush2.msra.mxu1 %v2957_v31  ;;  %1629 = vmatprep.subr.mxu0 %v2961_v19  ;;  %v438_v26 = vmul.f32 %v3746_v6, %v5235_v50  ;;  %v855_v23 = vadd.f32 %v727_v35, %v435_v14  ;;  %v857_v57 = vadd.f32 %v729_v5, %v437_v33 }
 0x191   :  { %v2965_v63 = vpop.eup %2964  ;;  %2978 = vtanh.f32 %v1184_v12  ;;  %1886 = vmatprep.subr.mxu1 %v2963_v34  ;;  %1630 = vmatpush2.msra.mxu0 %v4388_v43  ;;  %v728_v43 = vmul.f32 %v3754_v29, %v565_v58  ;;  %v429_v12 = vmul.f32 %v3741_v62, %v5234_v40  ;;  %v4450_v58 = vpop.permute.xlu0 %552 }
 0x192   :  { %2272 = vperm.xlu1 %2805, %v2234_v16   ;;  %v561_v20 = vpop.permute.xlu1 %560  ;;  %2980 = vtanh.f32 %v1185_v7  ;;  %1887 = vmatpush2.msra.mxu1 %v2965_v63  ;;  %v858_v16 = vadd.f32 %v730_v60, %v438_v26  ;;  %v5236_v60 = vld [vmem:[#allocation25_spill] sm:$0xff]  ;;  %v5237_v26 = vld [vmem:[#allocation27_spill] sm:$0xff] }
 0x193   :  { %2982 = vtanh.f32 %v1186_v9  ;;  %v723_v3 = vmul.f32 %v3752_v24, %v561_v20  ;;  %v724_v45 = vmul.f32 %v3754_v29, %v561_v20  ;;  %v856_v17 = vadd.f32 %v728_v43, %v436_v27 }
 0x194   :  { %2984 = vtanh.f32 %v1179_v44  ;;  %v725_v49 = vmul.f32 %v3756_v32, %v561_v20  ;;  %v726_v61 = vmul.f32 %v3758_v36, %v561_v20  ;;  %v430_v44 = vmul.f32 %v3746_v6, %v5234_v40 }
 0x195   :  { %2986 = vtanh.f32 %v1182_v21  ;;  %v851_v9 = vadd.f32 %v723_v3, %v431_v18  ;;  %v4459_v27 = vmul.f32 %v3738_v47, %v5236_v60  ;;  %v4463_v33 = vmul.f32 %v3741_v62, %v5236_v60  ;;  %v4474_v3 = vpop.permute.xlu0 %540 }
 0x196   :  { %2282 = vperm.xlu1 %2805, %v2236_v38   ;;  %v557_v53 = vpop.permute.xlu1 %556  ;;  %2988 = vtanh.f32 %v1181_v8  ;;  %v852_v38 = vadd.f32 %v724_v45, %v432_v11  ;;  %v853_v8 = vadd.f32 %v725_v49, %v433_v41  ;;  %v854_v18 = vadd.f32 %v726_v61, %v434_v2 }
 0x197   :  { %v719_v25 = vmul.f32 %v3752_v24, %v557_v53  ;;  %v720_v46 = vmul.f32 %v3754_v29, %v557_v53  ;;  %v722_v31 = vmul.f32 %v3758_v36, %v557_v53  ;;  %v721_v48 = vmul.f32 %v3756_v32, %v557_v53 }
 0x198   :  { %v2967_v52 = vpop.eup %2966  ;;  %v4481_v45 = vmul.f32 %v3741_v62, %v5237_v26  ;;  %v717_v61 = vmul.f32 %v3756_v32, %v4450_v58 }
 0x199   :  { %v847_v22 = vadd.f32 %v719_v25, %v427_v30  ;;  %v2969_v51 = vpop.eup %2968  ;;  %v848_v21 = vadd.f32 %v720_v46, %v428_v10  ;;  %v850_v30 = vadd.f32 %v722_v31, %v430_v44  ;;  %v2244_v25 = vld [vmem:[#allocation12 + $0x58] sm:$0xff]  ;;  %v4468_v10 = vmul.f32 %v3746_v6, %v5236_v60 }
 0x19a   :  { %2292 = vperm.xlu1 %2805, %v2238_v13   ;;  %v2971_v42 = vpop.eup %2970  ;;  %v849_v13 = vadd.f32 %v721_v48, %v429_v12  ;;  %v2248_v31 = vld [vmem:[#allocation12 + $0x78] sm:$0xff] }
 0x19b   :  { %v1042_v0 = vpop.permute.xlu1 %1041  ;;  %v1167_v54 = vadd.f32 %v4362_v59, %v847_v22  ;;  %v2973_v39 = vpop.eup %2972  ;;  %1631 = vmatprep.subr.mxu0 %v2971_v42  ;;  %v4454_v22 = vmul.f32 %v3735_v56, %v5236_v60  ;;  %v1168_v41 = vadd.f32 %v4362_v59, %v848_v21  ;;  %v5240_v48 = vld [vmem:[#allocation38_spill] sm:$0xff] }
 0x19c   :  { %v1175_v55 = vadd.f32 %v1042_v0, %v855_v23  ;;  %v1176_v4 = vadd.f32 %v1042_v0, %v856_v17  ;;  %v2975_v28 = vpop.eup %2974  ;;  %v1177_v7 = vadd.f32 %v1042_v0, %v857_v57  ;;  %1632 = vmatpush2.msra.mxu0 %v2969_v51  ;;  %v1178_v20 = vadd.f32 %v1042_v0, %v858_v16  ;;  %v2246_v23 = vld [vmem:[#allocation12 + $0x68] sm:$0xff] }
 0x19d   :  { %v2977_v34 = vpop.eup %2976  ;;  %2990 = vtanh.f32 %v1167_v54  ;;  %1888 = vmatprep.subr.mxu1 %v2975_v28  ;;  %v1169_v0 = vadd.f32 %v4362_v59, %v849_v13  ;;  %v416_v51 = vmul.f32 %v3738_v47, %v5237_v26  ;;  %v4485_v54 = vmul.f32 %v3746_v6, %v5237_v26  ;;  %v5238_v57 = vld [vmem:[#allocation29_spill] sm:$0xff]  ;;  %v5239_v28 = vld [vmem:[#allocation35_spill] sm:$0xff] }
 0x19e   :  { %2302 = vperm.xlu1 %2805, %v2240_v15   ;;  %v2979_v63 = vpop.eup %2978  ;;  %2992 = vtanh.f32 %v1175_v55  ;;  %1889 = vmatpush2.msra.mxu1 %v2973_v39  ;;  %v4472_v15 = vmul.f32 %v3735_v56, %v5237_v26  ;;  %v423_v42 = vmul.f32 %v3735_v56, %v5238_v57  ;;  %v424_v46 = vmul.f32 %v3738_v47, %v5238_v57 }
 0x19f   :  { %v1037_v19 = vpop.permute.xlu1 %1036  ;;  %v2981_v53 = vpop.eup %2980  ;;  %2994 = vtanh.f32 %v1176_v4  ;;  %1633 = vmatprep.subr.mxu0 %v2979_v63  ;;  %v425_v16 = vmul.f32 %v3741_v62, %v5238_v57  ;;  %v716_v55 = vmul.f32 %v3754_v29, %v4450_v58  ;;  %v426_v39 = vmul.f32 %v3746_v6, %v5238_v57 }
 0x1a0   :  { %v1171_v37 = vadd.f32 %v1037_v19, %v851_v9  ;;  %v1172_v35 = vadd.f32 %v1037_v19, %v852_v38  ;;  %v2983_v40 = vpop.eup %2982  ;;  %2996 = vtanh.f32 %v1177_v7  ;;  %v1173_v11 = vadd.f32 %v1037_v19, %v853_v8  ;;  %1634 = vmatpush2.msra.mxu0 %v2977_v34  ;;  %v5241_v34 = vld [vmem:[#allocation40_spill] sm:$0xff]  ;;  %v4522_v38 = vpop.permute.xlu0 %1016 }
 0x1a1   :  { %v2985_v43 = vpop.eup %2984  ;;  %2998 = vtanh.f32 %v1178_v20  ;;  %1890 = vmatprep.subr.mxu1 %v2983_v40  ;;  %v1174_v5 = vadd.f32 %v1037_v19, %v854_v18  ;;  %1635 = vmatprep.subr.mxu0 %v2967_v52  ;;  %v1170_v52 = vadd.f32 %v4362_v59, %v850_v30  ;;  %v715_v59 = vmul.f32 %v3752_v24, %v4450_v58 }
 0x1a2   :  { %2312 = vperm.xlu1 %2805, %v2242_v1   ;;  %v2987_v14 = vpop.eup %2986  ;;  %3000 = vtanh.f32 %v1171_v37  ;;  %1891 = vmatpush2.msra.mxu1 %v2981_v53  ;;  %v4504_v12 = vmul.f32 %v3735_v56, %v5239_v28  ;;  %v4508_v1 = vmul.f32 %v3738_v47, %v5239_v28  ;;  %v4512_v7 = vmul.f32 %v3735_v56, %v5240_v48 }
 0x1a3   :  { %1636 = vmatpush2.msra.mxu0 %v2985_v43  ;;  %v2989_v2 = vpop.eup %2988  ;;  %3002 = vtanh.f32 %v1172_v35  ;;  %1892 = vmatprep.subr.mxu1 %v2987_v14  ;;  %v718_v19 = vmul.f32 %v3758_v36, %v4450_v58  ;;  %v419_v44 = vmul.f32 %v3735_v56, %v5241_v34  ;;  %v420_v20 = vmul.f32 %v3738_v47, %v5241_v34  ;;  %v2250_v56 = vld [vmem:[#allocation12 + $0x88] sm:$0xff] }
 0x1a4   :  { %v549_v50 = vpop.permute.xlu1 %548  ;;  %3004 = vtanh.f32 %v1173_v11  ;;  %1893 = vmatpush2.msra.mxu1 %v2989_v2  ;;  %v843_v8 = vadd.f32 %v715_v59, %v423_v42  ;;  %v844_v18 = vadd.f32 %v716_v55, %v424_v46  ;;  %v422_v26 = vmul.f32 %v3746_v6, %v5241_v34 }
 0x1a5   :  { %3006 = vtanh.f32 %v1174_v5  ;;  %v711_v63 = vmul.f32 %v3752_v24, %v549_v50  ;;  %v712_v53 = vmul.f32 %v3754_v29, %v549_v50  ;;  %v713_v40 = vmul.f32 %v3756_v32, %v549_v50 }
 0x1a6   :  { %2322 = vperm.xlu1 %2805, %v2244_v25   ;;  %3008 = vtanh.f32 %v1168_v41  ;;  %v714_v13 = vmul.f32 %v3758_v36, %v549_v50  ;;  %v845_v25 = vadd.f32 %v717_v61, %v425_v16  ;;  %v846_v60 = vadd.f32 %v718_v19, %v426_v39 }
 0x1a7   :  { %3010 = vtanh.f32 %v1170_v52  ;;  %v421_v52 = vmul.f32 %v3741_v62, %v5241_v34  ;;  %v840_v42 = vadd.f32 %v712_v53, %v420_v20  ;;  %v703_v19 = vmul.f32 %v3752_v24, %v4474_v3 }
 0x1a8   :  { %v545_v17 = vpop.permute.xlu1 %544  ;;  %3012 = vtanh.f32 %v1169_v0  ;;  %v842_v16 = vadd.f32 %v714_v13, %v422_v26  ;;  %v704_v34 = vmul.f32 %v3754_v29, %v4474_v3 }
 0x1a9   :  { %v708_v49 = vmul.f32 %v3754_v29, %v545_v17  ;;  %v707_v58 = vmul.f32 %v3752_v24, %v545_v17  ;;  %v709_v5 = vmul.f32 %v3756_v32, %v545_v17  ;;  %v710_v14 = vmul.f32 %v3758_v36, %v545_v17 }
 0x1aa   :  { %2332 = vperm.xlu1 %2805, %v2246_v23   ;;  %v4516_v9 = vpop.eup %2990  ;;  %v839_v23 = vadd.f32 %v711_v63, %v419_v44  ;;  %v841_v46 = vadd.f32 %v713_v40, %v421_v52  ;;  %v705_v63 = vmul.f32 %v3756_v32, %v4474_v3 }
 0x1ab   :  { %v836_v4 = vadd.f32 %v708_v49, %v416_v51  ;;  %v2993_v37 = vpop.eup %2992  ;;  %v835_v57 = vadd.f32 %v707_v58, %v4472_v15  ;;  %v2252_v49 = vld [vmem:[#allocation12 + $0x98] sm:$0xff]  ;;  %v837_v61 = vadd.f32 %v709_v5, %v4481_v45  ;;  %v1007_v5 = vpop.permute.xlu0 %1006 }
 0x1ac   :  { %v2995_v35 = vpop.eup %2994 }
 0x1ad   :  { %v1027_v21 = vpop.permute.xlu1 %1026  ;;  %v1156_v30 = vadd.f32 %v4522_v38, %v836_v4  ;;  %v2997_v43 = vpop.eup %2996  ;;  %1637 = vmatprep.subr.mxu0 %v2995_v35  ;;  %v1155_v45 = vadd.f32 %v4522_v38, %v835_v57  ;;  %v1157_v35 = vadd.f32 %v4522_v38, %v837_v61  ;;  %v2256_v61 = vld [vmem:[#allocation12 + $0xb8] sm:$0xff] }
 0x1ae   :  { %2342 = vperm.xlu1 %2805, %v2248_v31   ;;  %v1163_v11 = vadd.f32 %v1027_v21, %v843_v8  ;;  %v1164_v41 = vadd.f32 %v1027_v21, %v844_v18  ;;  %v2999_v2 = vpop.eup %2998  ;;  %v1165_v0 = vadd.f32 %v1027_v21, %v845_v25  ;;  %1638 = vmatpush2.msra.mxu0 %v2993_v37  ;;  %v2253_v37 = vld [vmem:[#allocation12 + $0xa0] sm:$0xff] }
 0x1af   :  { %v3001_v51 = vpop.eup %3000  ;;  %3014 = vtanh.f32 %v1156_v30  ;;  %1894 = vmatprep.subr.mxu1 %v2999_v2  ;;  %v1166_v17 = vadd.f32 %v1027_v21, %v846_v60  ;;  %v838_v31 = vadd.f32 %v710_v14, %v4485_v54  ;;  %v706_v60 = vmul.f32 %v3758_v36, %v4474_v3 }
 0x1b0   :  { %v3003_v59 = vpop.eup %3002  ;;  %3016 = vtanh.f32 %v1163_v11  ;;  %1895 = vmatpush2.msra.mxu1 %v2997_v43  ;;  %v412_v43 = vmul.f32 %v3738_v47, %v5240_v48  ;;  %v831_v2 = vadd.f32 %v703_v19, %v4512_v7 }
 0x1b1   :  { %v1022_v50 = vpop.permute.xlu1 %1021  ;;  %v3005_v39 = vpop.eup %3004  ;;  %3018 = vtanh.f32 %v1164_v41  ;;  %1639 = vmatprep.subr.mxu0 %v3003_v59 }
 0x1b2   :  { %2352 = vperm.xlu1 %2805, %v2250_v56   ;;  %v1159_v55 = vadd.f32 %v1022_v50, %v839_v23  ;;  %v1160_v4 = vadd.f32 %v1022_v50, %v840_v42  ;;  %v3007_v15 = vpop.eup %3006  ;;  %3020 = vtanh.f32 %v1165_v0  ;;  %v1161_v44 = vadd.f32 %v1022_v50, %v841_v46  ;;  %1640 = vmatpush2.msra.mxu0 %v3001_v51  ;;  %v2255_v51 = vld [vmem:[#allocation12 + $0xb0] sm:$0xff] }
 0x1b3   :  { %v3009_v20 = vpop.eup %3008  ;;  %3022 = vtanh.f32 %v1166_v17  ;;  %1896 = vmatprep.subr.mxu1 %v3007_v15  ;;  %v1162_v54 = vadd.f32 %v1022_v50, %v842_v16  ;;  %v1158_v56 = vadd.f32 %v4522_v38, %v838_v31  ;;  %v413_v38 = vmul.f32 %v3741_v62, %v5240_v48 }
 0x1b4   :  { %v3011_v8 = vpop.eup %3010  ;;  %3024 = vtanh.f32 %v1159_v55  ;;  %1897 = vmatpush2.msra.mxu1 %v3005_v39  ;;  %1641 = vmatprep.subr.mxu0 %v3009_v20  ;;  %v832_v26 = vadd.f32 %v704_v34, %v412_v43  ;;  %v2258_v20 = vld [vmem:[#allocation12 + $0xc8] sm:$0xff] }
 0x1b5   :  { %v3013_v18 = vpop.eup %3012  ;;  %3026 = vtanh.f32 %v1160_v4  ;;  %1898 = vmatprep.subr.mxu1 %v3011_v8  ;;  %1642 = vmatpush2.msra.mxu0 %v4516_v9  ;;  %v833_v0 = vadd.f32 %v705_v63, %v413_v38  ;;  %v2260_v8 = vld [vmem:[#allocation12 + $0xd8] sm:$0xff]  ;;  %v1335_v38 = vld [vmem:[#allocation9] sm:$0xff] }
 0x1b6   :  { %2362 = vperm.xlu1 %2805, %v2252_v49   ;;  %v537_v21 = vpop.permute.xlu1 %536  ;;  %3028 = vtanh.f32 %v1161_v44  ;;  %1899 = vmatpush2.msra.mxu1 %v3013_v18  ;;  %v2262_v18 = vld [vmem:[#allocation12 + $0xe8] sm:$0xff] }
 0x1b7   :  { %v699_v53 = vmul.f32 %v3752_v24, %v537_v21  ;;  %v700_v58 = vmul.f32 %v3754_v29, %v537_v21  ;;  %v701_v30 = vmul.f32 %v3756_v32, %v537_v21  ;;  %v702_v40 = vmul.f32 %v3758_v36, %v537_v21 }
 0x1b8   :  { %3030 = vtanh.f32 %v1162_v54 }
 0x1b9   :  { %v827_v13 = vadd.f32 %v699_v53, %v4454_v22  ;;  %v828_v25 = vadd.f32 %v700_v58, %v4459_v27  ;;  %v829_v11 = vadd.f32 %v701_v30, %v4463_v33  ;;  %v830_v9 = vadd.f32 %v702_v40, %v4468_v10  ;;  %v2254_v22 = vld [vmem:[#allocation12 + $0xa8] sm:$0xff] }
 0x1ba   :  { %2367 = vperm.xlu1 %2805, %v2253_v37   ;;  %v533_v14 = vpop.permute.xlu1 %532  ;;  %3032 = vtanh.f32 %v1155_v45  ;;  %v414_v33 = vmul.f32 %v3746_v6, %v5240_v48  ;;  %v405_v48 = vmul.f32 %v3741_v62, %v5239_v28 }
 0x1bb   :  { %v1147_v27 = vadd.f32 %v1007_v5, %v827_v13  ;;  %v1148_v41 = vadd.f32 %v1007_v5, %v828_v25  ;;  %3034 = vtanh.f32 %v1158_v56  ;;  %v1149_v47 = vadd.f32 %v1007_v5, %v829_v11  ;;  %v2264_v25 = vld [vmem:[#allocation12 + $0xf8] sm:$0xff] }
 0x1bc   :  { %3036 = vtanh.f32 %v1157_v35  ;;  %v1150_v52 = vadd.f32 %v1007_v5, %v830_v9  ;;  %v695_v10 = vmul.f32 %v3752_v24, %v533_v14  ;;  %v696_v3 = vmul.f32 %v3754_v29, %v533_v14  ;;  %v3015_v23 = vpop.eup %3014  ;;  %v1338_v9 = vld [vmem:[#allocation9 + $0x18] sm:$0xff] }
 0x1bd   :  { %3038 = vtanh.f32 %v1147_v27  ;;  %v697_v50 = vmul.f32 %v3756_v32, %v533_v14  ;;  %v698_v7 = vmul.f32 %v3758_v36, %v533_v14  ;;  %v834_v17 = vadd.f32 %v706_v60, %v414_v33  ;;  %v3017_v42 = vpop.eup %3016  ;;  %v1337_v14 = vld [vmem:[#allocation9 + $0x10] sm:$0xff]  ;;  %v1340_v60 = vld [vmem:[#allocation9 + $0x28] sm:$0xff]  ;;  %v1342_v27 = vld [vmem:[#allocation9 + $0x38] sm:$0xff] }
 0x1be   :  { %2372 = vperm.xlu1 %2805, %v2254_v22   ;;  %3040 = vtanh.f32 %v1148_v41  ;;  %v3019_v24 = vpop.eup %3018  ;;  %v406_v29 = vmul.f32 %v3746_v6, %v5239_v28  ;;  %v823_v62 = vadd.f32 %v695_v10, %v4504_v12  ;;  %v824_v36 = vadd.f32 %v696_v3, %v4508_v1  ;;  %v1339_v22 = vld [vmem:[#allocation9 + $0x20] sm:$0xff]  ;;  %v1341_v41 = vld [vmem:[#allocation9 + $0x30] sm:$0xff]  ;;  %v1344_v33 = vld [vmem:[#allocation9 + $0x48] sm:$0xff] }
 0x1bf   :  { %v1012_v57 = vpop.permute.xlu1 %1011  ;;  %3042 = vtanh.f32 %v1149_v47  ;;  %v3021_v16 = vpop.eup %3020  ;;  %1643 = vmatprep.subr.mxu0 %v3019_v24  ;;  %v825_v55 = vadd.f32 %v697_v50, %v405_v48  ;;  %v1343_v47 = vld [vmem:[#allocation9 + $0x40] sm:$0xff]  ;;  %v1350_v10 = vld [vmem:[#allocation9 + $0x78] sm:$0xff]  ;;  %v1349_v3 = vld [vmem:[#allocation9 + $0x70] sm:$0xff] }
 0x1c0   :  { %v1151_v59 = vadd.f32 %v1012_v57, %v831_v2  ;;  %v1152_v49 = vadd.f32 %v1012_v57, %v832_v26  ;;  %v1153_v46 = vadd.f32 %v1012_v57, %v833_v0  ;;  %3044 = vtanh.f32 %v1150_v52  ;;  %v3023_v39 = vpop.eup %3022  ;;  %1644 = vmatpush2.msra.mxu0 %v3017_v42  ;;  %v1346_v2 = vld [vmem:[#allocation9 + $0x58] sm:$0xff]  ;;  %v1345_v52 = vld [vmem:[#allocation9 + $0x50] sm:$0xff]  ;;  %v1348_v26 = vld [vmem:[#allocation9 + $0x68] sm:$0xff] }
 0x1c1   :  { %v1154_v32 = vadd.f32 %v1012_v57, %v834_v17  ;;  %v826_v4 = vadd.f32 %v698_v7, %v406_v29  ;;  %v3025_v15 = vpop.eup %3024  ;;  %1900 = vmatprep.subr.mxu1 %v3023_v39  ;;  %v1347_v0 = vld [vmem:[#allocation9 + $0x60] sm:$0xff]  ;;  %v1352_v50 = vld [vmem:[#allocation9 + $0x88] sm:$0xff]  ;;  %v1354_v48 = vld [vmem:[#allocation9 + $0x98] sm:$0xff] }
 0x1c2   :  { %2377 = vperm.xlu1 %2805, %v2255_v51   ;;  %3046 = vtanh.f32 %v1151_v59  ;;  %v3027_v34 = vpop.eup %3026  ;;  %1901 = vmatpush2.msra.mxu1 %v3021_v16  ;;  %v1353_v51 = vld [vmem:[#allocation9 + $0x90] sm:$0xff]  ;;  %v1356_v7 = vld [vmem:[#allocation9 + $0xa8] sm:$0xff]  ;;  %v1355_v57 = vld [vmem:[#allocation9 + $0xa0] sm:$0xff] }
 0x1c3   :  { %3048 = vtanh.f32 %v1152_v49  ;;  %v1002_v31 = vpop.permute.xlu1 %1001  ;;  %v3029_v12 = vpop.eup %3028  ;;  %1645 = vmatprep.subr.mxu0 %v3027_v34  ;;  %v1358_v17 = vld [vmem:[#allocation9 + $0xb8] sm:$0xff]  ;;  %v1357_v42 = vld [vmem:[#allocation9 + $0xb0] sm:$0xff]  ;;  %v1360_v59 = vld [vmem:[#allocation9 + $0xc8] sm:$0xff] }
 0x1c4   :  { %3050 = vtanh.f32 %v1153_v46  ;;  %v1143_v6 = vadd.f32 %v1002_v31, %v823_v62  ;;  %v1144_v28 = vadd.f32 %v1002_v31, %v824_v36  ;;  %v1145_v19 = vadd.f32 %v1002_v31, %v825_v55  ;;  %1646 = vmatpush2.msra.mxu0 %v3025_v15  ;;  %v1359_v49 = vld [vmem:[#allocation9 + $0xc0] sm:$0xff]  ;;  %v1362_v46 = vld [vmem:[#allocation9 + $0xd8] sm:$0xff]  ;;  %v1361_v24 = vld [vmem:[#allocation9 + $0xd0] sm:$0xff] }
 0x1c5   :  { %3052 = vtanh.f32 %v1154_v32  ;;  %v1146_v44 = vadd.f32 %v1002_v31, %v826_v4  ;;  %v3031_v1 = vpop.eup %3030  ;;  %1647 = vmatprep.subr.mxu0 %v3015_v23  ;;  %v1351_v23 = vld [vmem:[#allocation9 + $0x80] sm:$0xff]  ;;  %v1364_v29 = vld [vmem:[#allocation9 + $0xe8] sm:$0xff]  ;;  %v1366_v16 = vld [vmem:[#allocation9 + $0xf8] sm:$0xff] }
 0x1c6   :  { %2382 = vperm.xlu1 %2805, %v2256_v61   ;;  %3054 = vtanh.f32 %v1143_v6  ;;  %1902 = vmatprep.subr.mxu1 %v3031_v1  ;;  %v1363_v32 = vld [vmem:[#allocation9 + $0xe0] sm:$0xff]  ;;  %v1365_v62 = vld [vmem:[#allocation9 + $0xf0] sm:$0xff]  ;;  %v1368_v36 = vld [vmem:[#allocation9 + $0x108] sm:$0xff] }
 0x1c7   :  { %3056 = vtanh.f32 %v1144_v28  ;;  %v3033_v63 = vpop.eup %3032  ;;  %1903 = vmatpush2.msra.mxu1 %v3029_v12  ;;  %v1367_v55 = vld [vmem:[#allocation9 + $0x100] sm:$0xff]  ;;  %v1370_v39 = vld [vmem:[#allocation9 + $0x118] sm:$0xff]  ;;  %v1369_v61 = vld [vmem:[#allocation9 + $0x110] sm:$0xff] }
 0x1c8   :  { %3058 = vtanh.f32 %v1145_v19  ;;  %v3035_v45 = vpop.eup %3034  ;;  %1648 = vmatpush2.msra.mxu0 %v3033_v63  ;;  %v1372_v31 = vld [vmem:[#allocation9 + $0x128] sm:$0xff]  ;;  %v1371_v4 = vld [vmem:[#allocation9 + $0x120] sm:$0xff]  ;;  %v1374_v15 = vld [vmem:[#allocation9 + $0x138] sm:$0xff] }
 0x1c9   :  { %3060 = vtanh.f32 %v1146_v44  ;;  %v3037_v54 = vpop.eup %3036  ;;  %1904 = vmatprep.subr.mxu1 %v3035_v45  ;;  %v1373_v6 = vld [vmem:[#allocation9 + $0x130] sm:$0xff]  ;;  %v1376_v28 = vld [vmem:[#allocation9 + $0x148] sm:$0xff]  ;;  %v1375_v19 = vld [vmem:[#allocation9 + $0x140] sm:$0xff] }
 0x1ca   :  { %2392 = vperm.xlu1 %2805, %v2258_v20   ;;  %v3039_v21 = vpop.eup %3038  ;;  %1905 = vmatpush2.msra.mxu1 %v3037_v54  ;;  %v1378_v34 = vld [vmem:[#allocation9 + $0x158] sm:$0xff]  ;;  %v1377_v44 = vld [vmem:[#allocation9 + $0x150] sm:$0xff]  ;;  %v1380_v12 = vld [vmem:[#allocation9 + $0x168] sm:$0xff] }
 0x1cb   :  { %v3041_v37 = vpop.eup %3040  ;;  %v1379_v1 = vld [vmem:[#allocation9 + $0x160] sm:$0xff]  ;;  %v1382_v20 = vld [vmem:[#allocation9 + $0x178] sm:$0xff]  ;;  %v1381_v63 = vld [vmem:[#allocation9 + $0x170] sm:$0xff] }
 0x1cc   :  { %v3043_v53 = vpop.eup %3042  ;;  %v1384_v45 = vld [vmem:[#allocation9 + $0x188] sm:$0xff]  ;;  %v1383_v54 = vld [vmem:[#allocation9 + $0x180] sm:$0xff] }
 0x1cd   :  { %v3045_v58 = vpop.eup %3044 }
 0x1ce   :  { %2402 = vperm.xlu1 %2805, %v2260_v8   ;;  %v1385_v8 = vld [vmem:[#allocation9 + $0x190] sm:$0xff] }
 0x1cf   :  { %v3047_v30 = vpop.eup %3046 }
 0x1d0   :  { %v3049_v35 = vpop.eup %3048 }
 0x1d1   :  { %v3051_v56 = vpop.eup %3050  ;;  %1649 = vmatprep.subr.mxu0 %v3049_v35  ;;  %v1391_v35 = vld [vmem:[#allocation9 + $0x1c0] sm:$0xff] }
 0x1d2   :  { %v3053_v40 = vpop.eup %3052  ;;  %2412 = vperm.xlu1 %2805, %v2262_v18   ;;  %1650 = vmatpush2.msra.mxu0 %v3047_v30  ;;  %v1389_v30 = vld [vmem:[#allocation9 + $0x1b0] sm:$0xff]  ;;  %v1392_v18 = vld [vmem:[#allocation9 + $0x1c8] sm:$0xff] }
 0x1d3   :  { %v3055_v13 = vpop.eup %3054  ;;  %1906 = vmatprep.subr.mxu1 %v3053_v40  ;;  %1651 = vmatprep.subr.mxu0 %v3041_v37  ;;  %v1388_v37 = vld [vmem:[#allocation9 + $0x1a8] sm:$0xff]  ;;  %v1393_v40 = vld [vmem:[#allocation9 + $0x1d0] sm:$0xff] }
 0x1d4   :  { %v3057_v11 = vpop.eup %3056  ;;  %1907 = vmatpush2.msra.mxu1 %v3051_v56  ;;  %1652 = vmatpush2.msra.mxu0 %v3039_v21  ;;  %v1386_v21 = vld [vmem:[#allocation9 + $0x198] sm:$0xff] }
 0x1d5   :  { %v3059_v43 = vpop.eup %3058  ;;  %1908 = vmatprep.subr.mxu1 %v3045_v58  ;;  %1653 = vmatprep.subr.mxu0 %v3057_v11  ;;  %v1390_v58 = vld [vmem:[#allocation9 + $0x1b8] sm:$0xff] }
 0x1d6   :  { %v3061_v5 = vpop.eup %3060  ;;  %2422 = vperm.xlu1 %2805, %v2264_v25   ;;  %1909 = vmatpush2.msra.mxu1 %v3043_v53  ;;  %v1387_v53 = vld [vmem:[#allocation9 + $0x1a0] sm:$0xff]  ;;  %v1394_v56 = vld [vmem:[#allocation9 + $0x1d8] sm:$0xff] }
 0x1d7   :  { %1910 = vmatprep.subr.mxu1 %v3061_v5  ;;  %1654 = vmatpush2.msra.mxu0 %v3055_v13  ;;  %v1396_v13 = vld [vmem:[#allocation9 + $0x1e8] sm:$0xff]  ;;  %v1395_v25 = vld [vmem:[#allocation9 + $0x1e0] sm:$0xff]  ;;  %v1398_v11 = vld [vmem:[#allocation9 + $0x1f8] sm:$0xff]  ;;  %v1439_v5 = vpop.permute.xlu1 %1438 }
 0x1d8   :  { %1911 = vmatpush2.msra.mxu1 %v3059_v43  ;;  %1656 = vmatmul.mubr.f32.vlgmr.msra.gmra.mxu0 %v1335_v38  ;;  %v1397_v43 = vld [vmem:[#allocation9 + $0x1f0] sm:$0xff] }
 0x1d9   :  { %1913 = vmatmul.mubr.f32.vlgmr.msra.gmra.mxu1 %v1335_v38  ;;  %1661 = vmatprep.mubr.f32.mxu0 %v1338_v9  ;;  %v1434_v38 = vpop.permute.xlu0 %1433 }
 0x1da   :  { %1918 = vmatprep.mubr.f32.mxu1 %v1338_v9 }
 0x1dc   :  { %1662 = vmatmul.mubr.f32.gmra.mxu0 %v1337_v14 }
 0x1dd   :  { %1919 = vmatmul.mubr.f32.gmra.mxu1 %v1337_v14  ;;  %1667 = vmatprep.mubr.f32.mxu0 %v1340_v60  ;;  %v1444_v9 = vpop.permute.xlu0 %1443  ;;  %v4576_v14 = vpop.permute.xlu1 %1448 }
 0x1de   :  { %1924 = vmatprep.mubr.f32.mxu1 %v1340_v60 }
 0x1e0   :  { %1668 = vmatmul.mubr.f32.gmra.mxu0 %v1339_v22 }
 0x1e1   :  { %1925 = vmatmul.mubr.f32.gmra.mxu1 %v1339_v22  ;;  %1673 = vmatprep.mubr.f32.mxu0 %v1342_v27  ;;  %v4578_v60 = vpop.permute.xlu0 %1453  ;;  %v4580_v22 = vpop.permute.xlu1 %1458 }
 0x1e2   :  { %1930 = vmatprep.mubr.f32.mxu1 %v1342_v27 }
 0x1e4   :  { %1674 = vmatmul.mubr.f32.gmra.mxu0 %v1341_v41 }
 0x1e5   :  { %1931 = vmatmul.mubr.f32.gmra.mxu1 %v1341_v41  ;;  %1679 = vmatprep.mubr.f32.mxu0 %v1344_v33  ;;  %v4582_v27 = vpop.permute.xlu0 %1463  ;;  %v4584_v41 = vpop.permute.xlu1 %1468 }
 0x1e6   :  { %1936 = vmatprep.mubr.f32.mxu1 %v1344_v33 }
 0x1e8   :  { %1680 = vmatmul.mubr.f32.gmra.mxu0 %v1343_v47 }
 0x1e9   :  { %1937 = vmatmul.mubr.f32.gmra.mxu1 %v1343_v47  ;;  %1685 = vmatprep.mubr.f32.mxu0 %v1346_v2  ;;  %v4586_v33 = vpop.permute.xlu0 %1473  ;;  %v4588_v47 = vpop.permute.xlu1 %1478 }
 0x1ea   :  { %1942 = vmatprep.mubr.f32.mxu1 %v1346_v2 }
 0x1ec   :  { %1686 = vmatmul.mubr.f32.gmra.mxu0 %v1345_v52 }
 0x1ed   :  { %1943 = vmatmul.mubr.f32.gmra.mxu1 %v1345_v52  ;;  %1691 = vmatprep.mubr.f32.mxu0 %v1348_v26  ;;  %v4590_v2 = vpop.permute.xlu0 %1483  ;;  %v4592_v52 = vpop.permute.xlu1 %1488 }
 0x1ee   :  { %1948 = vmatprep.mubr.f32.mxu1 %v1348_v26 }
 0x1f0   :  { %1692 = vmatmul.mubr.f32.gmra.mxu0 %v1347_v0 }
 0x1f1   :  { %1949 = vmatmul.mubr.f32.gmra.mxu1 %v1347_v0  ;;  %1697 = vmatprep.mubr.f32.mxu0 %v1350_v10  ;;  %v4594_v26 = vpop.permute.xlu0 %1493  ;;  %v4596_v0 = vpop.permute.xlu1 %1498 }
 0x1f2   :  { %1954 = vmatprep.mubr.f32.mxu1 %v1350_v10 }
 0x1f4   :  { %1698 = vmatmul.mubr.f32.gmra.mxu0 %v1349_v3 }
 0x1f5   :  { %1955 = vmatmul.mubr.f32.gmra.mxu1 %v1349_v3  ;;  %1703 = vmatprep.mubr.f32.mxu0 %v1352_v50  ;;  %v4598_v10 = vpop.permute.xlu0 %1503  ;;  %v4600_v3 = vpop.permute.xlu1 %1508 }
 0x1f6   :  { %1960 = vmatprep.mubr.f32.mxu1 %v1352_v50 }
 0x1f8   :  { %1704 = vmatmul.mubr.f32.gmra.mxu0 %v1351_v23 }
 0x1f9   :  { %1961 = vmatmul.mubr.f32.gmra.mxu1 %v1351_v23  ;;  %1709 = vmatprep.mubr.f32.mxu0 %v1354_v48  ;;  %v4602_v50 = vpop.permute.xlu0 %1513  ;;  %v4604_v23 = vpop.permute.xlu1 %1518 }
 0x1fa   :  { %1966 = vmatprep.mubr.f32.mxu1 %v1354_v48 }
 0x1fc   :  { %1710 = vmatmul.mubr.f32.gmra.mxu0 %v1353_v51 }
 0x1fd   :  { %1967 = vmatmul.mubr.f32.gmra.mxu1 %v1353_v51  ;;  %1715 = vmatprep.mubr.f32.mxu0 %v1356_v7  ;;  %v4606_v48 = vpop.permute.xlu0 %1523 }
 0x1fe   :  { %1972 = vmatprep.mubr.f32.mxu1 %v1356_v7  ;;  %v4608_v7 = vpop.permute.xlu1 %1528 }
 0x200   :  { %1716 = vmatmul.mubr.f32.gmra.mxu0 %v1355_v57 }
 0x201   :  { %1973 = vmatmul.mubr.f32.gmra.mxu1 %v1355_v57  ;;  %1721 = vmatprep.mubr.f32.mxu0 %v1358_v17 }
 0x202   :  { %1978 = vmatprep.mubr.f32.mxu1 %v1358_v17 }
 0x204   :  { %1722 = vmatmul.mubr.f32.gmra.mxu0 %v1357_v42 }
 0x205   :  { %1979 = vmatmul.mubr.f32.gmra.mxu1 %v1357_v42  ;;  %1727 = vmatprep.mubr.f32.mxu0 %v1360_v59 }
 0x206   :  { %1984 = vmatprep.mubr.f32.mxu1 %v1360_v59 }
 0x208   :  { %1728 = vmatmul.mubr.f32.gmra.mxu0 %v1359_v49 }
 0x209   :  { %1985 = vmatmul.mubr.f32.gmra.mxu1 %v1359_v49  ;;  %1733 = vmatprep.mubr.f32.mxu0 %v1362_v46 }
 0x20a   :  { %1990 = vmatprep.mubr.f32.mxu1 %v1362_v46 }
 0x20c   :  { %1734 = vmatmul.mubr.f32.gmra.mxu0 %v1361_v24 }
 0x20d   :  { %1991 = vmatmul.mubr.f32.gmra.mxu1 %v1361_v24  ;;  %1739 = vmatprep.mubr.f32.mxu0 %v1364_v29 }
 0x20e   :  { %1996 = vmatprep.mubr.f32.mxu1 %v1364_v29 }
 0x210   :  { %1740 = vmatmul.mubr.f32.gmra.mxu0 %v1363_v32 }
 0x211   :  { %1997 = vmatmul.mubr.f32.gmra.mxu1 %v1363_v32  ;;  %1745 = vmatprep.mubr.f32.mxu0 %v1366_v16 }
 0x212   :  { %2002 = vmatprep.mubr.f32.mxu1 %v1366_v16 }
 0x214   :  { %1746 = vmatmul.mubr.f32.gmra.mxu0 %v1365_v62 }
 0x215   :  { %2003 = vmatmul.mubr.f32.gmra.mxu1 %v1365_v62  ;;  %1751 = vmatprep.mubr.f32.mxu0 %v1368_v36  ;;  %v4610_v62 = vpop.permute.xlu0 %1533 }
 0x216   :  { %2008 = vmatprep.mubr.f32.mxu1 %v1368_v36 }
 0x218   :  { %1752 = vmatmul.mubr.f32.gmra.mxu0 %v1367_v55 }
 0x219   :  { %2009 = vmatmul.mubr.f32.gmra.mxu1 %v1367_v55  ;;  %1757 = vmatprep.mubr.f32.mxu0 %v1370_v39 }
 0x21a   :  { %2014 = vmatprep.mubr.f32.mxu1 %v1370_v39  ;;  %v4612_v39 = vpop.permute.xlu1 %1538 }
 0x21c   :  { %1758 = vmatmul.mubr.f32.gmra.mxu0 %v1369_v61 }
 0x21d   :  { %2015 = vmatmul.mubr.f32.gmra.mxu1 %v1369_v61  ;;  %1763 = vmatprep.mubr.f32.mxu0 %v1372_v31 }
 0x21e   :  { %2020 = vmatprep.mubr.f32.mxu1 %v1372_v31 }
 0x220   :  { %1764 = vmatmul.mubr.f32.gmra.mxu0 %v1371_v4 }
 0x221   :  { %2021 = vmatmul.mubr.f32.gmra.mxu1 %v1371_v4  ;;  %1769 = vmatprep.mubr.f32.mxu0 %v1374_v15 }
 0x222   :  { %2026 = vmatprep.mubr.f32.mxu1 %v1374_v15 }
 0x224   :  { %1770 = vmatmul.mubr.f32.gmra.mxu0 %v1373_v6 }
 0x225   :  { %2027 = vmatmul.mubr.f32.gmra.mxu1 %v1373_v6  ;;  %1775 = vmatprep.mubr.f32.mxu0 %v1376_v28 }
 0x226   :  { %2032 = vmatprep.mubr.f32.mxu1 %v1376_v28 }
 0x228   :  { %1776 = vmatmul.mubr.f32.gmra.mxu0 %v1375_v19 }
 0x229   :  { %2033 = vmatmul.mubr.f32.gmra.mxu1 %v1375_v19  ;;  %1781 = vmatprep.mubr.f32.mxu0 %v1378_v34 }
 0x22a   :  { %2038 = vmatprep.mubr.f32.mxu1 %v1378_v34 }
 0x22c   :  { %1782 = vmatmul.mubr.f32.gmra.mxu0 %v1377_v44 }
 0x22d   :  { %2039 = vmatmul.mubr.f32.gmra.mxu1 %v1377_v44  ;;  %1787 = vmatprep.mubr.f32.mxu0 %v1380_v12 }
 0x22e   :  { %2044 = vmatprep.mubr.f32.mxu1 %v1380_v12 }
 0x230   :  { %1788 = vmatmul.mubr.f32.gmra.mxu0 %v1379_v1 }
 0x231   :  { %2045 = vmatmul.mubr.f32.gmra.mxu1 %v1379_v1  ;;  %1793 = vmatprep.mubr.f32.mxu0 %v1382_v20  ;;  %v4614_v1 = vpop.permute.xlu0 %1543 }
 0x232   :  { %2050 = vmatprep.mubr.f32.mxu1 %v1382_v20 }
 0x234   :  { %1794 = vmatmul.mubr.f32.gmra.mxu0 %v1381_v63 }
 0x235   :  { %2051 = vmatmul.mubr.f32.gmra.mxu1 %v1381_v63  ;;  %1799 = vmatprep.mubr.f32.mxu0 %v1384_v45 }
 0x236   :  { %2056 = vmatprep.mubr.f32.mxu1 %v1384_v45  ;;  %v4616_v45 = vpop.permute.xlu1 %1548 }
 0x238   :  { %1800 = vmatmul.mubr.f32.gmra.mxu0 %v1383_v54 }
 0x239   :  { %2057 = vmatmul.mubr.f32.gmra.mxu1 %v1383_v54  ;;  %1805 = vmatprep.mubr.f32.mxu0 %v1386_v21 }
 0x23a   :  { %2062 = vmatprep.mubr.f32.mxu1 %v1386_v21 }
 0x23c   :  { %1806 = vmatmul.mubr.f32.gmra.mxu0 %v1385_v8 }
 0x23d   :  { %2063 = vmatmul.mubr.f32.gmra.mxu1 %v1385_v8  ;;  %1811 = vmatprep.mubr.f32.mxu0 %v1388_v37 }
 0x23e   :  { %2068 = vmatprep.mubr.f32.mxu1 %v1388_v37 }
 0x240   :  { %1812 = vmatmul.mubr.f32.gmra.mxu0 %v1387_v53 }
 0x241   :  { %2069 = vmatmul.mubr.f32.gmra.mxu1 %v1387_v53  ;;  %1817 = vmatprep.mubr.f32.mxu0 %v1390_v58 }
 0x242   :  { %2074 = vmatprep.mubr.f32.mxu1 %v1390_v58 }
 0x244   :  { %1818 = vmatmul.mubr.f32.gmra.mxu0 %v1389_v30 }
 0x245   :  { %2075 = vmatmul.mubr.f32.gmra.mxu1 %v1389_v30  ;;  %1823 = vmatprep.mubr.f32.mxu0 %v1392_v18 }
 0x246   :  { %2080 = vmatprep.mubr.f32.mxu1 %v1392_v18 }
 0x248   :  { %1824 = vmatmul.mubr.f32.gmra.mxu0 %v1391_v35 }
 0x249   :  { %2081 = vmatmul.mubr.f32.gmra.mxu1 %v1391_v35  ;;  %1829 = vmatprep.mubr.f32.mxu0 %v1394_v56 }
 0x24a   :  { %2086 = vmatprep.mubr.f32.mxu1 %v1394_v56 }
 0x24c   :  { %1830 = vmatmul.mubr.f32.gmra.mxu0 %v1393_v40 }
 0x24d   :  { %2087 = vmatmul.mubr.f32.gmra.mxu1 %v1393_v40  ;;  %1835 = vmatprep.mubr.f32.mxu0 %v1396_v13 }
 0x24e   :  { %2092 = vmatprep.mubr.f32.mxu1 %v1396_v13 }
 0x250   :  { %1836 = vmatmul.mubr.f32.gmra.mxu0 %v1395_v25 }
 0x251   :  { %2093 = vmatmul.mubr.f32.gmra.mxu1 %v1395_v25  ;;  %1841 = vmatprep.mubr.f32.mxu0 %v1398_v11 }
 0x252   :  { %2098 = vmatprep.mubr.f32.mxu1 %v1398_v11  ;;  %v4629_v11 = vpop.permute.xlu0 %1553 }
 0x254   :  { %1842 = vmatmul.mubr.f32.gmra.mxu0 %v1397_v43 }
 0x255   :  { %2099 = vmatmul.mubr.f32.gmra.mxu1 %v1397_v43 }
 0x298   :  { %v1657_v51 = vpop.f32.mrf.mxu0 }
 0x299   :  { %v1658_v57 = vadd.f32 %v1657_v51, %v1434_v38  ;;  %v1914_v17 = vpop.f32.mrf.mxu1 }
 0x29a   :  { %v1915_v42 = vadd.f32 %v1914_v17, %v1434_v38  ;;  %v1659_v59 = vpop.f32.mrf.mxu0 }
 0x29b   :  { %3062 = vtanh.f32 %v1658_v57  ;;  %v1660_v49 = vadd.f32 %v1659_v59, %v1434_v38  ;;  %v1916_v46 = vpop.f32.mrf.mxu1 }
 0x29c   :  { %3064 = vtanh.f32 %v1915_v42  ;;  %v1917_v24 = vadd.f32 %v1916_v46, %v1434_v38  ;;  %v1663_v29 = vpop.f32.mrf.mxu0 }
 0x29d   :  { %3066 = vtanh.f32 %v1660_v49  ;;  %v1664_v32 = vadd.f32 %v1663_v29, %v1439_v5  ;;  %v1920_v16 = vpop.f32.mrf.mxu1 }
 0x29e   :  { %3068 = vtanh.f32 %v1917_v24  ;;  %v1921_v36 = vadd.f32 %v1920_v16, %v1439_v5  ;;  %v1665_v55 = vpop.f32.mrf.mxu0 }
 0x29f   :  { %3070 = vtanh.f32 %v1664_v32  ;;  %v1666_v61 = vadd.f32 %v1665_v55, %v1439_v5  ;;  %v1922_v31 = vpop.f32.mrf.mxu1 }
 0x2a0   :  { %3072 = vtanh.f32 %v1921_v36  ;;  %v1923_v4 = vadd.f32 %v1922_v31, %v1439_v5  ;;  %v1669_v15 = vpop.f32.mrf.mxu0  ;;  %v4643_v31 = vpop.permute.xlu0 %1563 }
 0x2a1   :  { %3074 = vtanh.f32 %v1666_v61  ;;  %v1670_v6 = vadd.f32 %v1669_v15, %v1444_v9  ;;  %v1926_v28 = vpop.f32.mrf.mxu1 }
 0x2a2   :  { %3076 = vtanh.f32 %v1923_v4  ;;  %v1927_v19 = vadd.f32 %v1926_v28, %v1444_v9  ;;  %v1671_v34 = vpop.f32.mrf.mxu0 }
 0x2a3   :  { %3078 = vtanh.f32 %v1670_v6  ;;  %v1672_v44 = vadd.f32 %v1671_v34, %v1444_v9  ;;  %v1928_v12 = vpop.f32.mrf.mxu1 }
 0x2a4   :  { %3080 = vtanh.f32 %v1927_v19  ;;  %v1929_v20 = vadd.f32 %v1928_v12, %v1444_v9  ;;  %v1675_v63 = vpop.f32.mrf.mxu0  ;;  %v4634_v9 = vpop.permute.xlu1 %1558 }
 0x2a5   :  { %3082 = vtanh.f32 %v1672_v44  ;;  %v1676_v54 = vadd.f32 %v1675_v63, %v4576_v14  ;;  %v1932_v21 = vpop.f32.mrf.mxu1 }
 0x2a6   :  { %3084 = vtanh.f32 %v1929_v20  ;;  %v1933_v8 = vadd.f32 %v1932_v21, %v4576_v14  ;;  %v1677_v37 = vpop.f32.mrf.mxu0 }
 0x2a7   :  { %3086 = vtanh.f32 %v1676_v54  ;;  %v1678_v53 = vadd.f32 %v1677_v37, %v4576_v14  ;;  %v1934_v58 = vpop.f32.mrf.mxu1 }
 0x2a8   :  { %v4621_v30 = vpop.eup %3062  ;;  %3088 = vtanh.f32 %v1933_v8  ;;  %v1935_v18 = vadd.f32 %v1934_v58, %v4576_v14  ;;  %v1681_v35 = vpop.f32.mrf.mxu0 }
 0x2a9   :  { %v4624_v56 = vpop.eup %3064  ;;  %3090 = vtanh.f32 %v1678_v53  ;;  %v1682_v40 = vadd.f32 %v1681_v35, %v4578_v60  ;;  %v1938_v13 = vpop.f32.mrf.mxu1 }
 0x2aa   :  { %v4627_v25 = vpop.eup %3066  ;;  %3092 = vtanh.f32 %v1935_v18  ;;  %v1939_v43 = vadd.f32 %v1938_v13, %v4578_v60  ;;  %v1683_v38 = vpop.f32.mrf.mxu0 }
 0x2ab   :  { %v4632_v5 = vpop.eup %3068  ;;  %3094 = vtanh.f32 %v1682_v40  ;;  %v1684_v14 = vadd.f32 %v1683_v38, %v4578_v60  ;;  %v1940_v51 = vpop.f32.mrf.mxu1 }
 0x2ac   :  { %v3071_v57 = vpop.eup %3070  ;;  %3096 = vtanh.f32 %v1939_v43  ;;  %v1941_v17 = vadd.f32 %v1940_v51, %v4578_v60  ;;  %v1687_v42 = vpop.f32.mrf.mxu0 }
 0x2ad   :  { %v3073_v59 = vpop.eup %3072  ;;  %3098 = vtanh.f32 %v1684_v14  ;;  %v1688_v49 = vadd.f32 %v1687_v42, %v4580_v22  ;;  %v1944_v46 = vpop.f32.mrf.mxu1 }
 0x2ae   :  { %v3075_v24 = vpop.eup %3074  ;;  %3100 = vtanh.f32 %v1941_v17  ;;  %v1945_v29 = vadd.f32 %v1944_v46, %v4580_v22  ;;  %v1689_v32 = vpop.f32.mrf.mxu0 }
 0x2af   :  { %v3077_v16 = vpop.eup %3076  ;;  %3102 = vtanh.f32 %v1688_v49  ;;  %v1690_v36 = vadd.f32 %v1689_v32, %v4580_v22  ;;  %v1946_v55 = vpop.f32.mrf.mxu1 }
 0x2b0   :  { %v4641_v61 = vpop.eup %3078  ;;  %3104 = vtanh.f32 %v1945_v29  ;;  %v1947_v60 = vadd.f32 %v1946_v55, %v4580_v22  ;;  %v1693_v4 = vpop.f32.mrf.mxu0 }
 0x2b1   :  { %v4646_v15 = vpop.eup %3080  ;;  %v4648_v6 = vpop.permute.xlu1 %1568  ;;  %3106 = vtanh.f32 %v1690_v36  ;;  %v1694_v28 = vadd.f32 %v1693_v4, %v4582_v27 }
 0x2b2   :  { %v1950_v19 = vpop.f32.mrf.mxu1  ;;  %v4651_v34 = vpop.eup %3082  ;;  %3108 = vtanh.f32 %v1947_v60 }
 0x2b3   :  { %v1951_v44 = vadd.f32 %v1950_v19, %v4582_v27  ;;  %v1695_v12 = vpop.f32.mrf.mxu0  ;;  %v4654_v20 = vpop.eup %3084  ;;  %3110 = vtanh.f32 %v1694_v28 }
 0x2b4   :  { %v1696_v22 = vadd.f32 %v1695_v12, %v4582_v27  ;;  %v1952_v63 = vpop.f32.mrf.mxu1  ;;  %v4657_v54 = vpop.eup %3086 }
 0x2b5   :  { %3112 = vtanh.f32 %v1951_v44  ;;  %v1953_v21 = vadd.f32 %v1952_v63, %v4582_v27  ;;  %v1699_v8 = vpop.f32.mrf.mxu0  ;;  %v4660_v37 = vpop.eup %3088 }
 0x2b6   :  { %3114 = vtanh.f32 %v1696_v22  ;;  %v1700_v53 = vadd.f32 %v1699_v8, %v4584_v41  ;;  %v1956_v58 = vpop.f32.mrf.mxu1  ;;  %v4663_v18 = vpop.eup %3090 }
 0x2b7   :  { %v2268_v35 = vpop.permute.xlu0 %2267  ;;  %3116 = vtanh.f32 %v1953_v21  ;;  %v1957_v40 = vadd.f32 %v1956_v58, %v4584_v41  ;;  %v1701_v13 = vpop.f32.mrf.mxu0 }
 0x2b8   :  { %v4666_v43 = vpop.eup %3092  ;;  %v2273_v38 = vpop.permute.xlu1 %2272  ;;  %3118 = vtanh.f32 %v1700_v53  ;;  %v1702_v27 = vadd.f32 %v1701_v13, %v4584_v41  ;;  %v2425_v32 = vmul.f32 %v4621_v30, %v2268_v35  ;;  %v2427_v28 = vmul.f32 %v4624_v56, %v2268_v35 }
 0x2b9   :  { %v1958_v14 = vpop.f32.mrf.mxu1  ;;  %v4669_v51 = vpop.eup %3094  ;;  %v2429_v17 = vmul.f32 %v3071_v57, %v2273_v38  ;;  %v2431_v42 = vmul.f32 %v3073_v59, %v2273_v38  ;;  %3120 = vtanh.f32 %v1957_v40  ;;  %v2430_v36 = vmul.f32 %v3075_v24, %v2273_v38 }
 0x2ba   :  { %v1959_v49 = vadd.f32 %v1958_v14, %v4584_v41  ;;  %v1705_v46 = vpop.f32.mrf.mxu0  ;;  %v4672_v29 = vpop.eup %3096  ;;  %3122 = vtanh.f32 %v1702_v27  ;;  %v2432_v19 = vmul.f32 %v3077_v16, %v2273_v38  ;;  %v2426_v44 = vmul.f32 %v4627_v25, %v2268_v35 }
 0x2bb   :  { %v1706_v55 = vadd.f32 %v1705_v46, %v4586_v33  ;;  %v1962_v60 = vpop.f32.mrf.mxu1  ;;  %v4676_v4 = vpop.eup %3098  ;;  %v2428_v30 = vmul.f32 %v4632_v5, %v2268_v35  ;;  %v2553_v21 = vadd.f32 %v2429_v17, %v2425_v32  ;;  %v2627_v56 = vadd.f32 %v2431_v42, %v2427_v28 }
 0x2bc   :  { %3124 = vtanh.f32 %v1959_v49  ;;  %v1963_v57 = vadd.f32 %v1962_v60, %v4586_v33  ;;  %v1707_v59 = vpop.f32.mrf.mxu0  ;;  %v4680_v41 = vpop.eup %3100  ;;  %v2590_v58 = vadd.f32 %v2430_v36, %v2426_v44 }
 0x2bd   :  { %3126 = vtanh.f32 %v1706_v55  ;;  %v1708_v24 = vadd.f32 %v1707_v59, %v4586_v33  ;;  %v1964_v12 = vpop.f32.mrf.mxu1  ;;  %v4685_v22 = vpop.eup %3102  ;;  %v2664_v13 = vadd.f32 %v2432_v19, %v2428_v30 }
 0x2be   :  { %v2278_v63 = vpop.permute.xlu0 %2277  ;;  %3128 = vtanh.f32 %v1963_v57  ;;  %v1965_v16 = vadd.f32 %v1964_v12, %v4586_v33  ;;  %v1711_v8 = vpop.f32.mrf.mxu0 }
 0x2bf   :  { %v4688_v53 = vpop.eup %3104  ;;  %v2433_v25 = vmul.f32 %v4641_v61, %v2278_v63  ;;  %3130 = vtanh.f32 %v1708_v24  ;;  %v1712_v5 = vadd.f32 %v1711_v8, %v4588_v47  ;;  %v1968_v35 = vpop.f32.mrf.mxu1  ;;  %v2435_v38 = vmul.f32 %v4646_v15, %v2278_v63 }
 0x2c0   :  { %v4692_v40 = vpop.eup %3106  ;;  %3132 = vtanh.f32 %v1965_v16  ;;  %v1969_v27 = vadd.f32 %v1968_v35, %v4588_v47  ;;  %v1713_v14 = vpop.f32.mrf.mxu0  ;;  %v2434_v42 = vmul.f32 %v4651_v34, %v2278_v63  ;;  %v2436_v61 = vmul.f32 %v4654_v20, %v2278_v63 }
 0x2c1   :  { %v4696_v33 = vpop.eup %3108  ;;  %v2283_v17 = vpop.permute.xlu1 %2282  ;;  %3134 = vtanh.f32 %v1712_v5  ;;  %v1714_v49 = vadd.f32 %v1713_v14, %v4588_v47  ;;  %v2554_v19 = vadd.f32 %v2553_v21, %v2433_v25  ;;  %v2628_v44 = vadd.f32 %v2627_v56, %v2435_v38 }
 0x2c2   :  { %v1970_v46 = vpop.f32.mrf.mxu1  ;;  %v4701_v32 = vpop.eup %3110  ;;  %v2437_v36 = vmul.f32 %v4657_v54, %v2283_v17  ;;  %v2439_v15 = vmul.f32 %v4660_v37, %v2283_v17  ;;  %3136 = vtanh.f32 %v1969_v27  ;;  %v2438_v34 = vmul.f32 %v4663_v18, %v2283_v17 }
 0x2c3   :  { %v1971_v55 = vadd.f32 %v1970_v46, %v4588_v47  ;;  %v1717_v60 = vpop.f32.mrf.mxu0  ;;  %v4706_v28 = vpop.eup %3112  ;;  %3138 = vtanh.f32 %v1714_v49  ;;  %v2440_v54 = vmul.f32 %v4666_v43, %v2283_v17  ;;  %v2591_v24 = vadd.f32 %v2590_v58, %v2434_v42 }
 0x2c4   :  { %v1718_v20 = vadd.f32 %v1717_v60, %v4590_v2  ;;  %v1974_v57 = vpop.f32.mrf.mxu1  ;;  %v4710_v59 = vpop.eup %3114  ;;  %v2665_v12 = vadd.f32 %v2664_v13, %v2436_v61  ;;  %v2555_v8 = vadd.f32 %v2554_v19, %v2437_v36  ;;  %v2629_v25 = vadd.f32 %v2628_v44, %v2439_v15 }
 0x2c5   :  { %3140 = vtanh.f32 %v1971_v55  ;;  %v1975_v37 = vadd.f32 %v1974_v57, %v4590_v2  ;;  %v1719_v30 = vpop.f32.mrf.mxu0  ;;  %v4714_v47 = vpop.eup %3116  ;;  %v2592_v35 = vadd.f32 %v2591_v24, %v2438_v34 }
 0x2c6   :  { %3142 = vtanh.f32 %v1718_v20  ;;  %v1720_v18 = vadd.f32 %v1719_v30, %v4590_v2  ;;  %v1976_v63 = vpop.f32.mrf.mxu1  ;;  %v4717_v21 = vpop.eup %3118  ;;  %v2666_v14 = vadd.f32 %v2665_v12, %v2440_v54 }
 0x2c7   :  { %v2288_v16 = vpop.permute.xlu0 %2287  ;;  %3144 = vtanh.f32 %v1975_v37  ;;  %v1977_v43 = vadd.f32 %v1976_v63, %v4590_v2  ;;  %v1723_v56 = vpop.f32.mrf.mxu0 }
 0x2c8   :  { %v4720_v5 = vpop.eup %3120  ;;  %v2441_v38 = vmul.f32 %v4669_v51, %v2288_v16  ;;  %3146 = vtanh.f32 %v1720_v18  ;;  %v1724_v58 = vadd.f32 %v1723_v56, %v4592_v52  ;;  %v1980_v13 = vpop.f32.mrf.mxu1  ;;  %v2443_v17 = vmul.f32 %v4672_v29, %v2288_v16 }
 0x2c9   :  { %v4724_v27 = vpop.eup %3122  ;;  %3148 = vtanh.f32 %v1977_v43  ;;  %v1981_v42 = vadd.f32 %v1980_v13, %v4592_v52  ;;  %v1725_v61 = vpop.f32.mrf.mxu0  ;;  %v2442_v46 = vmul.f32 %v4676_v4, %v2288_v16  ;;  %v2444_v51 = vmul.f32 %v4680_v41, %v2288_v16 }
 0x2ca   :  { %v4728_v2 = vpop.eup %3124  ;;  %v2293_v49 = vpop.permute.xlu1 %2292  ;;  %3150 = vtanh.f32 %v1724_v58  ;;  %v1726_v36 = vadd.f32 %v1725_v61, %v4592_v52  ;;  %v2556_v57 = vadd.f32 %v2555_v8, %v2441_v38  ;;  %v2630_v37 = vadd.f32 %v2629_v25, %v2443_v17 }
 0x2cb   :  { %v1982_v15 = vpop.f32.mrf.mxu1  ;;  %v4733_v55 = vpop.eup %3126  ;;  %v2445_v60 = vmul.f32 %v4685_v22, %v2293_v49  ;;  %v2447_v29 = vmul.f32 %v4688_v53, %v2293_v49  ;;  %3152 = vtanh.f32 %v1981_v42  ;;  %v2446_v4 = vmul.f32 %v4692_v40, %v2293_v49 }
 0x2cc   :  { %v1983_v19 = vadd.f32 %v1982_v15, %v4592_v52  ;;  %v1729_v34 = vpop.f32.mrf.mxu0  ;;  %v4738_v20 = vpop.eup %3128  ;;  %3154 = vtanh.f32 %v1726_v36  ;;  %v2448_v22 = vmul.f32 %v4696_v33, %v2293_v49  ;;  %v2593_v24 = vadd.f32 %v2592_v35, %v2442_v46 }
 0x2cd   :  { %v1730_v41 = vadd.f32 %v1729_v34, %v4594_v26  ;;  %v1986_v44 = vpop.f32.mrf.mxu1  ;;  %v4742_v54 = vpop.eup %3130  ;;  %v2667_v12 = vadd.f32 %v2666_v14, %v2444_v51  ;;  %v2557_v8 = vadd.f32 %v2556_v57, %v2445_v60  ;;  %v2631_v43 = vadd.f32 %v2630_v37, %v2447_v29 }
 0x2ce   :  { %3156 = vtanh.f32 %v1983_v19  ;;  %v1987_v53 = vadd.f32 %v1986_v44, %v4594_v26  ;;  %v1731_v30 = vpop.f32.mrf.mxu0  ;;  %v4746_v52 = vpop.eup %3132  ;;  %v2594_v38 = vadd.f32 %v2593_v24, %v2446_v4 }
 0x2cf   :  { %3158 = vtanh.f32 %v1730_v41  ;;  %v1732_v40 = vadd.f32 %v1731_v30, %v4594_v26  ;;  %v1988_v18 = vpop.f32.mrf.mxu1  ;;  %v4749_v63 = vpop.eup %3134  ;;  %v2668_v17 = vadd.f32 %v2667_v12, %v2448_v22 }
 0x2d0   :  { %v2298_v16 = vpop.permute.xlu0 %2297  ;;  %3160 = vtanh.f32 %v1987_v53  ;;  %v1989_v33 = vadd.f32 %v1988_v18, %v4594_v26  ;;  %v1735_v25 = vpop.f32.mrf.mxu0 }
 0x2d1   :  { %v4752_v56 = vpop.eup %3136  ;;  %v2449_v58 = vmul.f32 %v4701_v32, %v2298_v16  ;;  %3162 = vtanh.f32 %v1732_v40  ;;  %v1736_v35 = vadd.f32 %v1735_v25, %v4596_v0  ;;  %v1992_v13 = vpop.f32.mrf.mxu1  ;;  %v2451_v42 = vmul.f32 %v4706_v28, %v2298_v16 }
 0x2d2   :  { %v4756_v14 = vpop.eup %3138  ;;  %3164 = vtanh.f32 %v1989_v33  ;;  %v1993_v61 = vadd.f32 %v1992_v13, %v4596_v0  ;;  %v1737_v49 = vpop.f32.mrf.mxu0  ;;  %v2450_v51 = vmul.f32 %v4710_v59, %v2298_v16  ;;  %v2452_v32 = vmul.f32 %v4714_v47, %v2298_v16 }
 0x2d3   :  { %v4760_v26 = vpop.eup %3140  ;;  %v2303_v46 = vpop.permute.xlu1 %2302  ;;  %3166 = vtanh.f32 %v1736_v35  ;;  %v1738_v36 = vadd.f32 %v1737_v49, %v4596_v0  ;;  %v2558_v4 = vadd.f32 %v2557_v8, %v2449_v58  ;;  %v2632_v22 = vadd.f32 %v2631_v43, %v2451_v42 }
 0x2d4   :  { %v1994_v15 = vpop.f32.mrf.mxu1  ;;  %v4765_v60 = vpop.eup %3142  ;;  %v2453_v29 = vmul.f32 %v4717_v21, %v2303_v46  ;;  %v2455_v28 = vmul.f32 %v4720_v5, %v2303_v46  ;;  %3168 = vtanh.f32 %v1993_v61  ;;  %v2454_v59 = vmul.f32 %v4724_v27, %v2303_v46 }
 0x2d5   :  { %v1995_v19 = vadd.f32 %v1994_v15, %v4596_v0  ;;  %v1741_v34 = vpop.f32.mrf.mxu0  ;;  %v4770_v57 = vpop.eup %3144  ;;  %3170 = vtanh.f32 %v1738_v36  ;;  %v2456_v21 = vmul.f32 %v4728_v2, %v2303_v46  ;;  %v2595_v30 = vadd.f32 %v2594_v38, %v2450_v51 }
 0x2d6   :  { %v1742_v47 = vadd.f32 %v1741_v34, %v4598_v10  ;;  %v1998_v41 = vpop.f32.mrf.mxu1  ;;  %v4774_v44 = vpop.eup %3146  ;;  %v2669_v24 = vadd.f32 %v2668_v17, %v2452_v32  ;;  %v2559_v18 = vadd.f32 %v2558_v4, %v2453_v29  ;;  %v2633_v16 = vadd.f32 %v2632_v22, %v2455_v28 }
 0x2d7   :  { %v2308_v37 = vpop.permute.xlu0 %2307  ;;  %3172 = vtanh.f32 %v1995_v19  ;;  %v1999_v5 = vadd.f32 %v1998_v41, %v4598_v10  ;;  %v1743_v0 = vpop.f32.mrf.mxu0  ;;  %v2596_v33 = vadd.f32 %v2595_v30, %v2454_v59 }
 0x2d8   :  { %v4778_v53 = vpop.eup %3148  ;;  %3174 = vtanh.f32 %v1742_v47  ;;  %v1744_v27 = vadd.f32 %v1743_v0, %v4598_v10  ;;  %v2000_v12 = vpop.f32.mrf.mxu1  ;;  %v2457_v25 = vmul.f32 %v4733_v55, %v2308_v37  ;;  %v2670_v17 = vadd.f32 %v2669_v24, %v2456_v21 }
 0x2d9   :  { %v4781_v40 = vpop.eup %3150  ;;  %3176 = vtanh.f32 %v1999_v5  ;;  %v2001_v8 = vadd.f32 %v2000_v12, %v4598_v10  ;;  %v1747_v2 = vpop.f32.mrf.mxu0  ;;  %v2459_v42 = vmul.f32 %v4738_v20, %v2308_v37  ;;  %v2458_v46 = vmul.f32 %v4742_v54, %v2308_v37 }
 0x2da   :  { %v4784_v43 = vpop.eup %3152  ;;  %3178 = vtanh.f32 %v1744_v27  ;;  %v1748_v38 = vadd.f32 %v1747_v2, %v4600_v3  ;;  %v2004_v58 = vpop.f32.mrf.mxu1  ;;  %v2460_v55 = vmul.f32 %v4746_v52, %v2308_v37  ;;  %v2560_v54 = vadd.f32 %v2559_v18, %v2457_v25 }
 0x2db   :  { %v4788_v35 = vpop.eup %3154  ;;  %v2313_v13 = vpop.permute.xlu1 %2312  ;;  %3180 = vtanh.f32 %v2001_v8  ;;  %v2005_v61 = vadd.f32 %v2004_v58, %v4600_v3  ;;  %v2634_v41 = vadd.f32 %v2633_v16, %v2459_v42  ;;  %v2597_v22 = vadd.f32 %v2596_v33, %v2458_v46 }
 0x2dc   :  { %v1749_v10 = vpop.f32.mrf.mxu0  ;;  %v4792_v49 = vpop.eup %3156  ;;  %3182 = vtanh.f32 %v1748_v38  ;;  %v2461_v29 = vmul.f32 %v4749_v63, %v2313_v13  ;;  %v2463_v20 = vmul.f32 %v4752_v56, %v2313_v13  ;;  %v2462_v52 = vmul.f32 %v4756_v14, %v2313_v13 }
 0x2dd   :  { %v1750_v51 = vadd.f32 %v1749_v10, %v4600_v3  ;;  %v2006_v32 = vpop.f32.mrf.mxu1  ;;  %v4797_v36 = vpop.eup %3158  ;;  %3184 = vtanh.f32 %v2005_v61  ;;  %v2464_v63 = vmul.f32 %v4760_v26, %v2313_v13  ;;  %v2671_v21 = vadd.f32 %v2670_v17, %v2460_v55 }
 0x2de   :  { %v2318_v15 = vpop.permute.xlu0 %2317  ;;  %v2007_v28 = vadd.f32 %v2006_v32, %v4600_v3  ;;  %v1753_v19 = vpop.f32.mrf.mxu0  ;;  %v2561_v24 = vadd.f32 %v2560_v54, %v2461_v29  ;;  %v2635_v27 = vadd.f32 %v2634_v41, %v2463_v20  ;;  %v2598_v16 = vadd.f32 %v2597_v22, %v2462_v52 }
 0x2df   :  { %v4802_v34 = vpop.eup %3160  ;;  %3186 = vtanh.f32 %v1750_v51  ;;  %v1754_v4 = vadd.f32 %v1753_v19, %v4602_v50  ;;  %v2010_v59 = vpop.f32.mrf.mxu1  ;;  %v2465_v8 = vmul.f32 %v4765_v60, %v2318_v15  ;;  %v2672_v58 = vadd.f32 %v2671_v21, %v2464_v63 }
 0x2e0   :  { %v4806_v47 = vpop.eup %3162  ;;  %3188 = vtanh.f32 %v2007_v28  ;;  %v2011_v56 = vadd.f32 %v2010_v59, %v4602_v50  ;;  %v1755_v37 = vpop.f32.mrf.mxu0  ;;  %v2467_v13 = vmul.f32 %v4770_v57, %v2318_v15  ;;  %v2466_v61 = vmul.f32 %v4774_v44, %v2318_v15 }
 0x2e1   :  { %v4810_v3 = vpop.eup %3164  ;;  %3190 = vtanh.f32 %v1754_v4  ;;  %v1756_v14 = vadd.f32 %v1755_v37, %v4602_v50  ;;  %v2012_v5 = vpop.f32.mrf.mxu1  ;;  %v2468_v60 = vmul.f32 %v4778_v53, %v2318_v15  ;;  %v2562_v28 = vadd.f32 %v2561_v24, %v2465_v8 }
 0x2e2   :  { %v4813_v0 = vpop.eup %3166  ;;  %v2323_v30 = vpop.permute.xlu1 %2322  ;;  %3192 = vtanh.f32 %v2011_v56  ;;  %v2013_v26 = vadd.f32 %v2012_v5, %v4602_v50  ;;  %v2636_v52 = vadd.f32 %v2635_v27, %v2467_v13  ;;  %v2599_v59 = vadd.f32 %v2598_v16, %v2466_v61 }
 0x2e3   :  { %v1759_v12 = vpop.f32.mrf.mxu0  ;;  %v4816_v18 = vpop.eup %3168  ;;  %3194 = vtanh.f32 %v1756_v14  ;;  %v2469_v51 = vmul.f32 %v4781_v40, %v2323_v30  ;;  %v2471_v57 = vmul.f32 %v4784_v43, %v2323_v30  ;;  %v2470_v44 = vmul.f32 %v4788_v35, %v2323_v30 }
 0x2e4   :  { %v1760_v2 = vadd.f32 %v1759_v12, %v4604_v23  ;;  %v2016_v33 = vpop.f32.mrf.mxu1  ;;  %v4820_v25 = vpop.eup %3170  ;;  %3196 = vtanh.f32 %v2013_v26  ;;  %v2472_v40 = vmul.f32 %v4792_v49, %v2323_v30  ;;  %v2673_v41 = vadd.f32 %v2672_v58, %v2468_v60 }
 0x2e5   :  { %v2328_v38 = vpop.permute.xlu0 %2327  ;;  %v2017_v17 = vadd.f32 %v2016_v33, %v4604_v23  ;;  %v1761_v50 = vpop.f32.mrf.mxu0  ;;  %v2563_v22 = vadd.f32 %v2562_v28, %v2469_v51  ;;  %v2637_v21 = vadd.f32 %v2636_v52, %v2471_v57  ;;  %v2600_v30 = vadd.f32 %v2599_v59, %v2470_v44 }
 0x2e6   :  { %v4824_v42 = vpop.eup %3172  ;;  %3198 = vtanh.f32 %v1760_v2  ;;  %v1762_v10 = vadd.f32 %v1761_v50, %v4604_v23  ;;  %v2018_v46 = vpop.f32.mrf.mxu1  ;;  %v2473_v24 = vmul.f32 %v4797_v36, %v2328_v38  ;;  %v2674_v16 = vadd.f32 %v2673_v41, %v2472_v40 }
 0x2e7   :  { %v4829_v55 = vpop.eup %3174  ;;  %3200 = vtanh.f32 %v2017_v17  ;;  %v2019_v32 = vadd.f32 %v2018_v46, %v4604_v23  ;;  %v1765_v29 = vpop.f32.mrf.mxu0  ;;  %v2475_v8 = vmul.f32 %v4802_v34, %v2328_v38  ;;  %v2474_v58 = vmul.f32 %v4806_v47, %v2328_v38 }
 0x2e8   :  { %v4834_v20 = vpop.eup %3176  ;;  %3202 = vtanh.f32 %v1762_v10  ;;  %v1766_v53 = vadd.f32 %v1765_v29, %v4606_v48  ;;  %v2022_v15 = vpop.f32.mrf.mxu1  ;;  %v2476_v13 = vmul.f32 %v4810_v3, %v2328_v38  ;;  %v2564_v47 = vadd.f32 %v2563_v22, %v2473_v24 }
 0x2e9   :  { %v4838_v19 = vpop.eup %3178  ;;  %v2333_v54 = vpop.permute.xlu1 %2332  ;;  %3204 = vtanh.f32 %v2019_v32  ;;  %v2023_v43 = vadd.f32 %v2022_v15, %v4606_v48 }
 0x2ea   :  { %v1767_v23 = vpop.f32.mrf.mxu0  ;;  %v4842_v4 = vpop.eup %3180  ;;  %3206 = vtanh.f32 %v1766_v53  ;;  %v2477_v34 = vmul.f32 %v4813_v0, %v2333_v54  ;;  %v2479_v60 = vmul.f32 %v4816_v18, %v2333_v54  ;;  %v2478_v3 = vmul.f32 %v4820_v25, %v2333_v54 }
 0x2eb   :  { %v1768_v35 = vadd.f32 %v1767_v23, %v4606_v48  ;;  %v2024_v63 = vpop.f32.mrf.mxu1  ;;  %v4845_v56 = vpop.eup %3182  ;;  %3208 = vtanh.f32 %v2023_v43  ;;  %v2638_v0 = vadd.f32 %v2637_v21, %v2475_v8  ;;  %v2480_v18 = vmul.f32 %v4824_v42, %v2333_v54 }
 0x2ec   :  { %v4847_v37 = vpop.permute.xlu0 %2337  ;;  %v2025_v49 = vadd.f32 %v2024_v63, %v4606_v48  ;;  %v1771_v14 = vpop.f32.mrf.mxu0  ;;  %v2601_v53 = vadd.f32 %v2600_v30, %v2474_v58  ;;  %v2675_v15 = vadd.f32 %v2674_v16, %v2476_v13  ;;  %v2565_v43 = vadd.f32 %v2564_v47, %v2477_v34 }
 0x2ed   :  { %v4850_v5 = vpop.eup %3184  ;;  %3210 = vtanh.f32 %v1768_v35  ;;  %v1772_v27 = vadd.f32 %v1771_v14, %v4608_v7  ;;  %v2028_v26 = vpop.f32.mrf.mxu1  ;;  %v2639_v23 = vadd.f32 %v2638_v0, %v2479_v60  ;;  %v2481_v35 = vmul.f32 %v4829_v55, %v4847_v37 }
 0x2ee   :  { %v4854_v12 = vpop.eup %3186  ;;  %3212 = vtanh.f32 %v2025_v49  ;;  %v2029_v2 = vadd.f32 %v2028_v26, %v4608_v7  ;;  %v1773_v33 = vpop.f32.mrf.mxu0  ;;  %v2602_v41 = vadd.f32 %v2601_v53, %v2478_v3  ;;  %v2676_v14 = vadd.f32 %v2675_v15, %v2480_v18 }
 0x2ef   :  { %v4858_v48 = vpop.eup %3188  ;;  %3214 = vtanh.f32 %v1772_v27  ;;  %v1774_v36 = vadd.f32 %v1773_v33, %v4608_v7  ;;  %v2030_v17 = vpop.f32.mrf.mxu1  ;;  %v2483_v30 = vmul.f32 %v4834_v20, %v4847_v37  ;;  %v2482_v55 = vmul.f32 %v4838_v19, %v4847_v37 }
 0x2f0   :  { %v4863_v50 = vpop.eup %3190  ;;  %v4865_v61 = vpop.permute.xlu1 %2342  ;;  %3216 = vtanh.f32 %v2029_v2  ;;  %v2031_v10 = vadd.f32 %v2030_v17, %v4608_v7  ;;  %v2484_v26 = vmul.f32 %v4842_v4, %v4847_v37  ;;  %v2566_v4 = vadd.f32 %v2565_v43, %v2481_v35 }
 0x2f1   :  { %v1777_v46 = vpop.f32.mrf.mxu0  ;;  %v4870_v51 = vpop.eup %3192  ;;  %3218 = vtanh.f32 %v1774_v36  ;;  %v2485_v20 = vmul.f32 %v4845_v56, %v4865_v61  ;;  %v2487_v58 = vmul.f32 %v4850_v5, %v4865_v61  ;;  %v2486_v37 = vmul.f32 %v4854_v12, %v4865_v61 }
 0x2f2   :  { %v1778_v38 = vadd.f32 %v1777_v46, %v4610_v62  ;;  %v2034_v57 = vpop.f32.mrf.mxu1  ;;  %v4874_v32 = vpop.eup %3194  ;;  %3220 = vtanh.f32 %v2031_v10  ;;  %v2640_v56 = vadd.f32 %v2639_v23, %v2483_v30  ;;  %v2488_v5 = vmul.f32 %v4858_v48, %v4865_v61 }
 0x2f3   :  { %v4876_v29 = vpop.permute.xlu0 %2347  ;;  %v2035_v7 = vadd.f32 %v2034_v57, %v4610_v62  ;;  %v1779_v28 = vpop.f32.mrf.mxu0  ;;  %v2603_v47 = vadd.f32 %v2602_v41, %v2482_v55  ;;  %v2677_v3 = vadd.f32 %v2676_v14, %v2484_v26  ;;  %v2567_v18 = vadd.f32 %v2566_v4, %v2485_v20 }
 0x2f4   :  { %v4880_v44 = vpop.eup %3196  ;;  %3222 = vtanh.f32 %v1778_v38  ;;  %v1780_v25 = vadd.f32 %v1779_v28, %v4610_v62  ;;  %v2036_v52 = vpop.f32.mrf.mxu1  ;;  %v2489_v15 = vmul.f32 %v4863_v50, %v4876_v29  ;;  %v2490_v50 = vmul.f32 %v4874_v32, %v4876_v29 }
 0x2f5   :  { %v4883_v40 = vpop.eup %3198  ;;  %3224 = vtanh.f32 %v2035_v7  ;;  %v2037_v59 = vadd.f32 %v2036_v52, %v4610_v62  ;;  %v1783_v42 = vpop.f32.mrf.mxu0  ;;  %v2641_v7 = vadd.f32 %v2640_v56, %v2487_v58  ;;  %v2604_v53 = vadd.f32 %v2603_v47, %v2486_v37 }
 0x2f6   :  { %v4886_v54 = vpop.eup %3200  ;;  %3226 = vtanh.f32 %v1780_v25  ;;  %v1784_v63 = vadd.f32 %v1783_v42, %v4612_v39  ;;  %v2040_v22 = vpop.f32.mrf.mxu1  ;;  %v2491_v42 = vmul.f32 %v4870_v51, %v4876_v29  ;;  %v2568_v26 = vadd.f32 %v2567_v18, %v2489_v15 }
 0x2f7   :  { %v4891_v21 = vpop.eup %3202  ;;  %v4893_v49 = vpop.permute.xlu1 %2352  ;;  %3228 = vtanh.f32 %v2037_v59  ;;  %v2041_v62 = vadd.f32 %v2040_v22, %v4612_v39  ;;  %v2678_v59 = vadd.f32 %v2677_v3, %v2488_v5 }
 0x2f8   :  { %v1785_v24 = vpop.f32.mrf.mxu0  ;;  %v4898_v27 = vpop.eup %3204  ;;  %3230 = vtanh.f32 %v1784_v63  ;;  %v2492_v63 = vmul.f32 %v4880_v44, %v4876_v29  ;;  %v2493_v51 = vmul.f32 %v4883_v40, %v4893_v49  ;;  %v2494_v29 = vmul.f32 %v4891_v21, %v4893_v49 }
 0x2f9   :  { %v1786_v16 = vadd.f32 %v1785_v24, %v4612_v39  ;;  %v2042_v8 = vpop.f32.mrf.mxu1  ;;  %v4905_v2 = vpop.eup %3206  ;;  %3232 = vtanh.f32 %v2041_v62  ;;  %v2495_v62 = vmul.f32 %v4886_v54, %v4893_v49  ;;  %v2642_v20 = vadd.f32 %v2641_v7, %v2491_v42 }
 0x2fa   :  { %v4907_v33 = vpop.permute.xlu0 %2357  ;;  %v2043_v19 = vadd.f32 %v2042_v8, %v4612_v39  ;;  %v1789_v13 = vpop.f32.mrf.mxu0  ;;  %v2496_v54 = vmul.f32 %v4898_v27, %v4893_v49  ;;  %v2679_v21 = vadd.f32 %v2678_v59, %v2492_v63  ;;  %v2569_v56 = vadd.f32 %v2568_v26, %v2493_v51 }
 0x2fb   :  { %v4914_v36 = vpop.eup %3208  ;;  %3234 = vtanh.f32 %v1786_v16  ;;  %v1790_v17 = vadd.f32 %v1789_v13, %v4614_v1  ;;  %v2046_v34 = vpop.f32.mrf.mxu1  ;;  %v2605_v13 = vadd.f32 %v2604_v53, %v2490_v50  ;;  %v2643_v5 = vadd.f32 %v2642_v20, %v2495_v62 }
 0x2fc   :  { %v4919_v60 = vpop.eup %3210  ;;  %3236 = vtanh.f32 %v2043_v19  ;;  %v2047_v39 = vadd.f32 %v2046_v34, %v4614_v1  ;;  %v1791_v10 = vpop.f32.mrf.mxu0  ;;  %v2497_v47 = vmul.f32 %v4905_v2, %v4907_v33  ;;  %v2680_v18 = vadd.f32 %v2679_v21, %v2496_v54 }
 0x2fd   :  { %v4924_v46 = vpop.eup %3212  ;;  %3238 = vtanh.f32 %v1790_v17  ;;  %v1792_v12 = vadd.f32 %v1791_v10, %v4614_v1  ;;  %v2048_v38 = vpop.f32.mrf.mxu1  ;;  %v2606_v10 = vadd.f32 %v2605_v13, %v2494_v29  ;;  %v2499_v7 = vmul.f32 %v4914_v36, %v4907_v33 }
 0x2fe   :  { %v4927_v57 = vpop.eup %3214  ;;  %v4929_v0 = vpop.permute.xlu1 %2362  ;;  %3240 = vtanh.f32 %v2047_v39  ;;  %v2049_v48 = vadd.f32 %v2048_v38, %v4614_v1  ;;  %v2498_v53 = vmul.f32 %v4919_v60, %v4907_v33  ;;  %v2500_v2 = vmul.f32 %v4924_v46, %v4907_v33 }
 0x2ff   :  { %v1795_v61 = vpop.f32.mrf.mxu0  ;;  %v4932_v28 = vpop.eup %3216  ;;  %3242 = vtanh.f32 %v1792_v12  ;;  %v2501_v36 = vmul.f32 %v4927_v57, %v4929_v0  ;;  %v2570_v33 = vadd.f32 %v2569_v56, %v2497_v47 }
 0x300   :  { %v1796_v25 = vadd.f32 %v1795_v61, %v4616_v45  ;;  %v2052_v52 = vpop.f32.mrf.mxu1  ;;  %v4937_v43 = vpop.eup %3218  ;;  %3244 = vtanh.f32 %v2049_v48  ;;  %v2503_v42 = vmul.f32 %v4932_v28, %v4929_v0 }
 0x301   :  { %v4939_v23 = vpop.permute.xlu0 %1573  ;;  %v2053_v1 = vadd.f32 %v2052_v52, %v4616_v45  ;;  %v1797_v41 = vpop.f32.mrf.mxu0  ;;  %v2502_v46 = vmul.f32 %v4937_v43, %v4929_v0  ;;  %v2681_v43 = vadd.f32 %v2680_v18, %v2500_v2 }
 0x302   :  { %v4944_v35 = vpop.eup %3220  ;;  %3246 = vtanh.f32 %v1796_v25  ;;  %v1798_v22 = vadd.f32 %v1797_v41, %v4616_v45  ;;  %v2054_v14 = vpop.f32.mrf.mxu1 }
 0x303   :  { %v4951_v30 = vpop.eup %3222  ;;  %3248 = vtanh.f32 %v2053_v1  ;;  %v2055_v24 = vadd.f32 %v2054_v14, %v4616_v45  ;;  %v1801_v55 = vpop.f32.mrf.mxu0  ;;  %v2644_v14 = vadd.f32 %v2643_v5, %v2499_v7  ;;  %v2504_v28 = vmul.f32 %v4944_v35, %v4929_v0 }
 0x304   :  { %v4958_v32 = vpop.eup %3224  ;;  %3250 = vtanh.f32 %v1798_v22  ;;  %v1802_v44 = vadd.f32 %v1801_v55, %v4629_v11  ;;  %v2058_v16 = vpop.f32.mrf.mxu1 }
 0x305   :  { %v4963_v8 = vpop.eup %3226  ;;  %v4965_v40 = vpop.permute.xlu1 %2367  ;;  %3252 = vtanh.f32 %v2055_v24  ;;  %v2059_v45 = vadd.f32 %v2058_v16, %v4629_v11  ;;  %v2607_v24 = vadd.f32 %v2606_v10, %v2498_v53  ;;  %v2645_v16 = vadd.f32 %v2644_v14, %v2503_v42 }
 0x306   :  { %v1803_v58 = vpop.f32.mrf.mxu0  ;;  %v4970_v19 = vpop.eup %3228  ;;  %3254 = vtanh.f32 %v1802_v44  ;;  %v2571_v44 = vadd.f32 %v2570_v33, %v2501_v36  ;;  %v2507_v56 = vmul.f32 %v4958_v32, %v4965_v40 }
 0x307   :  { %v1804_v4 = vadd.f32 %v1803_v58, %v4629_v11  ;;  %v2060_v37 = vpop.f32.mrf.mxu1  ;;  %v4973_v17 = vpop.eup %3230  ;;  %3256 = vtanh.f32 %v2059_v45  ;;  %v2608_v54 = vadd.f32 %v2607_v24, %v2502_v46  ;;  %v2505_v45 = vmul.f32 %v4951_v30, %v4965_v40 }
 0x308   :  { %v4975_v34 = vpop.permute.xlu0 %1578  ;;  %v2061_v49 = vadd.f32 %v2060_v37, %v4629_v11  ;;  %v1807_v27 = vpop.f32.mrf.mxu0  ;;  %v2682_v37 = vadd.f32 %v2681_v43, %v2504_v28  ;;  %v2506_v30 = vmul.f32 %v4963_v8, %v4965_v40 }
 0x309   :  { %v4978_v39 = vpop.eup %3232  ;;  %3258 = vtanh.f32 %v1804_v4  ;;  %v1808_v3 = vadd.f32 %v1807_v27, %v4634_v9  ;;  %v2064_v12 = vpop.f32.mrf.mxu1  ;;  %v2508_v27 = vmul.f32 %v4970_v19, %v4965_v40  ;;  %v2572_v40 = vadd.f32 %v2571_v44, %v2505_v45 }
 0x30a   :  { %v4983_v38 = vpop.eup %3234  ;;  %3260 = vtanh.f32 %v2061_v49  ;;  %v2065_v11 = vadd.f32 %v2064_v12, %v4634_v9  ;;  %v1809_v48 = vpop.f32.mrf.mxu0  ;;  %v2609_v36 = vadd.f32 %v2608_v54, %v2506_v30 }
 0x30b   :  { %v4988_v61 = vpop.eup %3236  ;;  %3262 = vtanh.f32 %v1808_v3  ;;  %v1810_v15 = vadd.f32 %v1809_v48, %v4634_v9  ;;  %v2066_v25 = vpop.f32.mrf.mxu1  ;;  %v2683_v42 = vadd.f32 %v2682_v37, %v2508_v27 }
 0x30c   :  { %v4995_v52 = vpop.eup %3238  ;;  %v4997_v59 = vpop.permute.xlu1 %2372  ;;  %3264 = vtanh.f32 %v2065_v11  ;;  %v2067_v60 = vadd.f32 %v2066_v25, %v4634_v9 }
 0x30d   :  { %v1813_v1 = vpop.f32.mrf.mxu0  ;;  %v5004_v41 = vpop.eup %3240  ;;  %3266 = vtanh.f32 %v1810_v15  ;;  %v2509_v32 = vmul.f32 %v4973_v17, %v4997_v59  ;;  %v2511_v18 = vmul.f32 %v4978_v39, %v4997_v59  ;;  %v2510_v19 = vmul.f32 %v4983_v38, %v4997_v59 }
 0x30e   :  { %v1814_v50 = vadd.f32 %v1813_v1, %v4643_v31  ;;  %v2070_v63 = vpop.f32.mrf.mxu1  ;;  %v5009_v22 = vpop.eup %3242  ;;  %3268 = vtanh.f32 %v2067_v60  ;;  %v2646_v17 = vadd.f32 %v2645_v16, %v2507_v56  ;;  %v2512_v39 = vmul.f32 %v4988_v61, %v4997_v59 }
 0x30f   :  { %v5011_v57 = vpop.permute.xlu0 %1583  ;;  %v2071_v9 = vadd.f32 %v2070_v63, %v4643_v31  ;;  %v1815_v51 = vpop.f32.mrf.mxu0  ;;  %v2573_v46 = vadd.f32 %v2572_v40, %v2509_v32  ;;  %v2610_v14 = vadd.f32 %v2609_v36, %v2510_v19 }
 0x310   :  { %v5016_v62 = vpop.eup %3244  ;;  %3270 = vtanh.f32 %v1814_v50  ;;  %v1816_v55 = vadd.f32 %v1815_v51, %v4643_v31  ;;  %v2072_v26 = vpop.f32.mrf.mxu1  ;;  %v2647_v50 = vadd.f32 %v2646_v17, %v2511_v18 }
 0x311   :  { %v5019_v29 = vpop.eup %3246  ;;  %3272 = vtanh.f32 %v2071_v9  ;;  %v2073_v20 = vadd.f32 %v2072_v26, %v4643_v31  ;;  %v1819_v0 = vpop.f32.mrf.mxu0 }
 0x312   :  { %v5022_v35 = vpop.eup %3248  ;;  %3274 = vtanh.f32 %v1816_v55  ;;  %v1820_v58 = vadd.f32 %v1819_v0, %v4648_v6  ;;  %v2076_v13 = vpop.f32.mrf.mxu1  ;;  %v2684_v55 = vadd.f32 %v2683_v42, %v2512_v39 }
 0x313   :  { %v5027_v21 = vpop.eup %3250  ;;  %v2378_v4 = vpop.permute.xlu1 %2377  ;;  %3276 = vtanh.f32 %v2073_v20  ;;  %v2077_v31 = vadd.f32 %v2076_v13, %v4648_v6 }
 0x314   :  { %v1821_v5 = vpop.f32.mrf.mxu0  ;;  %v5032_v49 = vpop.eup %3252  ;;  %3278 = vtanh.f32 %v1820_v58  ;;  %v2513_v28 = vmul.f32 %v4995_v52, %v2378_v4  ;;  %v2515_v26 = vmul.f32 %v5004_v41, %v2378_v4  ;;  %v2514_v20 = vmul.f32 %v5009_v22, %v2378_v4 }
 0x315   :  { %v1822_v10 = vadd.f32 %v1821_v5, %v4648_v6  ;;  %v2078_v47 = vpop.f32.mrf.mxu1  ;;  %v5039_v3 = vpop.eup %3254  ;;  %3280 = vtanh.f32 %v2077_v31  ;;  %v2516_v52 = vmul.f32 %v5016_v62, %v2378_v4 }
 0x316   :  { %v5041_v12 = vpop.permute.xlu0 %1588  ;;  %v2079_v8 = vadd.f32 %v2078_v47, %v4648_v6  ;;  %v1825_v7 = vpop.f32.mrf.mxu0  ;;  %v2574_v31 = vadd.f32 %v2573_v46, %v2513_v28  ;;  %v2648_v27 = vadd.f32 %v2647_v50, %v2515_v26 }
 0x317   :  { %v5048_v11 = vpop.eup %3256  ;;  %3282 = vtanh.f32 %v1822_v10  ;;  %v1826_v48 = vadd.f32 %v1825_v7, %v4939_v23  ;;  %v2082_v53 = vpop.f32.mrf.mxu1  ;;  %v2685_v32 = vadd.f32 %v2684_v55, %v2516_v52 }
 0x318   :  { %v5053_v2 = vpop.eup %3258  ;;  %3284 = vtanh.f32 %v2079_v8  ;;  %v2083_v6 = vadd.f32 %v2082_v53, %v4939_v23  ;;  %v1827_v15 = vpop.f32.mrf.mxu0 }
 0x319   :  { %v5058_v25 = vpop.eup %3260  ;;  %3286 = vtanh.f32 %v1826_v48  ;;  %v1828_v38 = vadd.f32 %v1827_v15, %v4939_v23  ;;  %v2084_v60 = vpop.f32.mrf.mxu1 }
 0x31a   :  { %v5061_v1 = vpop.eup %3262  ;;  %v2383_v33 = vpop.permute.xlu1 %2382  ;;  %3288 = vtanh.f32 %v2083_v6  ;;  %v2085_v61 = vadd.f32 %v2084_v60, %v4939_v23 }
 0x31b   :  { %v1831_v59 = vpop.f32.mrf.mxu0  ;;  %v5064_v63 = vpop.eup %3264  ;;  %3290 = vtanh.f32 %v1828_v38  ;;  %v2517_v58 = vmul.f32 %v5019_v29, %v2383_v33  ;;  %v2519_v13 = vmul.f32 %v5022_v35, %v2383_v33  ;;  %v2518_v5 = vmul.f32 %v5027_v21, %v2383_v33 }
 0x31c   :  { %v1832_v9 = vadd.f32 %v1831_v59, %v4975_v34  ;;  %v2088_v51 = vpop.f32.mrf.mxu1  ;;  %v5068_v24 = vpop.eup %3266  ;;  %3292 = vtanh.f32 %v2085_v61  ;;  %v2520_v10 = vmul.f32 %v5032_v49, %v2383_v33 }
 0x31d   :  { %v5070_v43 = vpop.permute.xlu0 %2387  ;;  %v2089_v23 = vadd.f32 %v2088_v51, %v4975_v34  ;;  %v1833_v44 = vpop.f32.mrf.mxu0  ;;  %v2575_v40 = vadd.f32 %v2574_v31, %v2517_v58  ;;  %v2649_v19 = vadd.f32 %v2648_v27, %v2519_v13 }
 0x31e   :  { %v5074_v16 = vpop.eup %3268  ;;  %3294 = vtanh.f32 %v1832_v9  ;;  %v1834_v0 = vadd.f32 %v1833_v44, %v4975_v34  ;;  %v2090_v54 = vpop.f32.mrf.mxu1  ;;  %v2521_v39 = vmul.f32 %v5039_v3, %v5070_v43  ;;  %v2686_v42 = vadd.f32 %v2685_v32, %v2520_v10 }
 0x31f   :  { %v3271_v45 = vpop.eup %3270  ;;  %3296 = vtanh.f32 %v2089_v23  ;;  %v2091_v41 = vadd.f32 %v2090_v54, %v4975_v34  ;;  %v1837_v37 = vpop.f32.mrf.mxu0  ;;  %v2611_v34 = vadd.f32 %v2610_v14, %v2514_v20  ;;  %v2523_v38 = vmul.f32 %v5048_v11, %v5070_v43 }
 0x320   :  { %v3273_v56 = vpop.eup %3272  ;;  %3298 = vtanh.f32 %v1834_v0  ;;  %v1838_v22 = vadd.f32 %v1837_v37, %v5011_v57  ;;  %v2094_v62 = vpop.f32.mrf.mxu1  ;;  %v2522_v46 = vmul.f32 %v5053_v2, %v5070_v43  ;;  %v2524_v28 = vmul.f32 %v5058_v25, %v5070_v43 }
 0x321   :  { %v3275_v4 = vpop.eup %3274  ;;  %v2393_v30 = vpop.permute.xlu1 %2392  ;;  %3300 = vtanh.f32 %v2091_v41  ;;  %v2095_v29 = vadd.f32 %v2094_v62, %v5011_v57  ;;  %v2612_v17 = vadd.f32 %v2611_v34, %v2518_v5  ;;  %v2576_v55 = vadd.f32 %v2575_v40, %v2521_v39 }
 0x322   :  { %v1839_v35 = vpop.f32.mrf.mxu0  ;;  %v3277_v47 = vpop.eup %3276  ;;  %3302 = vtanh.f32 %v1838_v22  ;;  %v2525_v50 = vmul.f32 %v5061_v1, %v2393_v30  ;;  %v2527_v11 = vmul.f32 %v5064_v63, %v2393_v30  ;;  %v2526_v2 = vmul.f32 %v5068_v24, %v2393_v30 }
 0x323   :  { %v1840_v18 = vadd.f32 %v1839_v35, %v5011_v57  ;;  %v2096_v21 = vpop.f32.mrf.mxu1  ;;  %v3279_v8 = vpop.eup %3278  ;;  %3304 = vtanh.f32 %v2095_v29  ;;  %v2650_v44 = vadd.f32 %v2649_v19, %v2523_v38  ;;  %v2528_v20 = vmul.f32 %v5074_v16, %v2393_v30 }
 0x324   :  { %v2398_v7 = vpop.permute.xlu0 %2397  ;;  %v2097_v48 = vadd.f32 %v2096_v21, %v5011_v57  ;;  %v1843_v53 = vpop.f32.mrf.mxu0  ;;  %v2613_v25 = vadd.f32 %v2612_v17, %v2522_v46  ;;  %v2577_v43 = vadd.f32 %v2576_v55, %v2525_v50 }
 0x325   :  { %v3281_v49 = vpop.eup %3280  ;;  %3306 = vtanh.f32 %v1840_v18  ;;  %v1844_v6 = vadd.f32 %v1843_v53, %v5041_v12  ;;  %v2100_v15 = vpop.f32.mrf.mxu1  ;;  %v2529_v26 = vmul.f32 %v3271_v45, %v2398_v7  ;;  %v2531_v52 = vmul.f32 %v3273_v56, %v2398_v7 }
 0x326   :  { %v3283_v36 = vpop.eup %3282  ;;  %3308 = vtanh.f32 %v2097_v48  ;;  %v2101_v60 = vadd.f32 %v2100_v15, %v5041_v12  ;;  %v1845_v33 = vpop.f32.mrf.mxu0  ;;  %v2530_v63 = vmul.f32 %v3275_v4, %v2398_v7  ;;  %v2651_v13 = vadd.f32 %v2650_v44, %v2527_v11 }
 0x327   :  { %v3285_v57 = vpop.eup %3284  ;;  %3310 = vtanh.f32 %v1844_v6  ;;  %v1846_v3 = vadd.f32 %v1845_v33, %v5041_v12  ;;  %v2102_v61 = vpop.f32.mrf.mxu1  ;;  %v2532_v41 = vmul.f32 %v3277_v47, %v2398_v7  ;;  %v2614_v45 = vadd.f32 %v2613_v25, %v2526_v2 }
 0x328   :  { %v3287_v59 = vpop.eup %3286  ;;  %v2403_v14 = vpop.permute.xlu1 %2402  ;;  %3312 = vtanh.f32 %v2101_v60  ;;  %v2103_v9 = vadd.f32 %v2102_v61, %v5041_v12  ;;  %v2687_v12 = vadd.f32 %v2686_v42, %v2524_v28  ;;  %v2578_v31 = vadd.f32 %v2577_v43, %v2529_v26 }
 0x329   :  { %v3289_v51 = vpop.eup %3288  ;;  %3314 = vtanh.f32 %v1846_v3  ;;  %v2408_v23 = vpop.permute.xlu0 %2407  ;;  %v2533_v54 = vmul.f32 %v3279_v8, %v2403_v14  ;;  %v2535_v37 = vmul.f32 %v3281_v49, %v2403_v14  ;;  %v2534_v5 = vmul.f32 %v3283_v36, %v2403_v14 }
 0x32a   :  { %v3291_v1 = vpop.eup %3290  ;;  %3316 = vtanh.f32 %v2103_v9  ;;  %v2537_v22 = vmul.f32 %v3287_v59, %v2408_v23  ;;  %v2688_v16 = vadd.f32 %v2687_v12, %v2528_v20  ;;  %v2652_v56 = vadd.f32 %v2651_v13, %v2531_v52 }
 0x32b   :  { %v3293_v0 = vpop.eup %3292  ;;  %v2536_v30 = vmul.f32 %v3285_v57, %v2403_v14  ;;  %v2539_v10 = vmul.f32 %v3289_v51, %v2408_v23  ;;  %v2615_v35 = vadd.f32 %v2614_v45, %v2530_v63  ;;  %v2579_v4 = vadd.f32 %v2578_v31, %v2533_v54 }
 0x32c   :  { %v3295_v58 = vpop.eup %3294  ;;  %v2413_v27 = vpop.permute.xlu1 %2412  ;;  %v2538_v34 = vmul.f32 %v3291_v1, %v2408_v23  ;;  %v2689_v47 = vadd.f32 %v2688_v16, %v2532_v41  ;;  %v2653_v8 = vadd.f32 %v2652_v56, %v2535_v37  ;;  %v2540_v7 = vmul.f32 %v3293_v0, %v2408_v23 }
 0x32d   :  { %v3297_v24 = vpop.eup %3296  ;;  %v2541_v32 = vmul.f32 %v3295_v58, %v2413_v27  ;;  %v2418_v21 = vpop.permute.xlu0 %2417  ;;  %v2616_v48 = vadd.f32 %v2615_v35, %v2534_v5  ;;  %v2580_v53 = vadd.f32 %v2579_v4, %v2537_v22 }
 0x32e   :  { %v3299_v62 = vpop.eup %3298  ;;  %v2543_v40 = vmul.f32 %v3297_v24, %v2413_v27  ;;  %v2690_v6 = vadd.f32 %v2689_v47, %v2536_v30  ;;  %v2654_v15 = vadd.f32 %v2653_v8, %v2539_v10 }
 0x32f   :  { %v3301_v29 = vpop.eup %3300  ;;  %v2542_v49 = vmul.f32 %v3299_v62, %v2413_v27  ;;  %v2617_v60 = vadd.f32 %v2616_v48, %v2538_v34  ;;  %v2581_v33 = vadd.f32 %v2580_v53, %v2541_v32 }
 0x330   :  { %v3303_v18 = vpop.eup %3302  ;;  %v2544_v36 = vmul.f32 %v3301_v29, %v2413_v27  ;;  %v2423_v50 = vpop.permute.xlu1 %2422  ;;  %v2691_v3 = vadd.f32 %v2690_v6, %v2540_v7  ;;  %v2655_v61 = vadd.f32 %v2654_v15, %v2543_v40  ;;  %v3480_v27 = vmov 1966171168   ;;  %v5242_v7 = vld [vmem:[#allocation39_spill] sm:$0xff] }
 0x331   :  { %v3305_v19 = vpop.eup %3304  ;;  %v2545_v17 = vmul.f32 %v3303_v18, %v2418_v21  ;;  %v2618_v28 = vadd.f32 %v2617_v60, %v2542_v49  ;;  %v2722_v16 = vunpack.c.l.s4 %v3480_v27  ;;  %v2705_v35 = vpop.permute.xlu0 %2704 }
 0x332   :  { %v3307_v39 = vpop.eup %3306  ;;  %v2547_v42 = vmul.f32 %v3305_v19, %v2418_v21  ;;  %v2692_v55 = vadd.f32 %v2691_v3, %v2544_v36  ;;  %v2710_v40 = vrot.slane %v2705_v35, %v5242_v7 }
 0x333   :  { %v3309_v38 = vpop.eup %3308  ;;  %v2546_v57 = vmul.f32 %v3307_v39, %v2418_v21  ;;  %v2582_v11 = vadd.f32 %v2581_v33, %v2545_v17  ;;  %v5243_v17 = vld [vmem:[#allocation36_spill] sm:$0xff] }
 0x334   :  { %v3311_v46 = vpop.eup %3310  ;;  %v2548_v59 = vmul.f32 %v3309_v38, %v2418_v21  ;;  %v2656_v2 = vadd.f32 %v2655_v61, %v2547_v42  ;;  %v2723_v21 = vunpack.c.0.s8 %v2722_v16 }
 0x335   :  { %v3313_v14 = vpop.eup %3312  ;;  %v2549_v9 = vmul.f32 %v3311_v46, %v2423_v50  ;;  %v2619_v23 = vadd.f32 %v2618_v28, %v2546_v57  ;;  %v5244_v57 = vlaneseq }
 0x336   :  { %v3315_v51 = vpop.eup %3314  ;;  %v2551_v26 = vmul.f32 %v3313_v14, %v2423_v50  ;;  %v2693_v52 = vadd.f32 %v2692_v55, %v2548_v59  ;;  %v2726_v39 = vsub.s32 %v2723_v21, %v5243_v17 }
 0x337   :  { %v3317_v1 = vpop.eup %3316  ;;  %v2583_v44 = vadd.f32 %v2582_v11, %v2549_v9  ;;  %v2550_v20 = vmul.f32 %v3315_v51, %v2423_v50  ;;  %vm2746_vm0 = vcmp.lt.s32.totalorder %v5244_v57, 512 }
 0x338   :  { %v2657_v0 = vadd.f32 %v2656_v2, %v2551_v26  ;;  %v2552_v25 = vmul.f32 %v3317_v1, %v2423_v50 }
 0x339   :  { %v2584_v43 = vrot.slane %v2583_v44, 4  ;;  %v2620_v63 = vadd.f32 %v2619_v23, %v2550_v20 }
 0x33a   :  { %v2658_v54 = vrot.slane %v2657_v0, 4  ;;  %v2694_v58 = vadd.f32 %v2693_v52, %v2552_v25 }
 0x33b   :  { %v2585_v12 = vadd.f32 %v2584_v43, %v2583_v44  ;;  %v2621_v13 = vrot.slane %v2620_v63, 4 }
 0x33c   :  { %v2659_v41 = vadd.f32 %v2658_v54, %v2657_v0  ;;  %v2695_v37 = vrot.slane %v2694_v58, 4 }
 0x33d   :  { %v2622_v24 = vadd.f32 %v2621_v13, %v2620_v63  ;;  %v2586_v45 = vrot.slane %v2585_v12, 2 }
 0x33e   :  { %v2696_v31 = vadd.f32 %v2695_v37, %v2694_v58  ;;  %v2660_v5 = vrot.slane %v2659_v41, 2 }
 0x33f   :  { %v2587_v22 = vadd.f32 %v2586_v45, %v2585_v12  ;;  %v2623_v62 = vrot.slane %v2622_v24, 2 }
 0x340   :  { %v2661_v56 = vadd.f32 %v2660_v5, %v2659_v41  ;;  %v2697_v30 = vrot.slane %v2696_v31, 2 }
 0x341   :  { %v2588_v10 = vrot.slane %v2587_v22, 1  ;;  %v2624_v29 = vadd.f32 %v2623_v62, %v2622_v24 }
 0x342   :  { %v2662_v4 = vrot.slane %v2661_v56, 1  ;;  %v2698_v34 = vadd.f32 %v2697_v30, %v2696_v31 }
 0x343   :  { %v2589_v32 = vadd.f32 %v2588_v10, %v2587_v22  ;;  %v2625_v18 = vrot.slane %v2624_v29, 1 }
 0x344   :  { %v2663_v47 = vadd.f32 %v2662_v4, %v2661_v56  ;;  %v2699_v8 = vrot.slane %v2698_v34, 1 }
 0x345   :  { %v2626_v19 = vadd.f32 %v2625_v18, %v2624_v29  ;;  %v2711_v53 = vadd.f32 %v2710_v40, %v2589_v32 }
 0x346   :  { %v2700_v48 = vadd.f32 %v2699_v8, %v2698_v34  ;;  %v2713_v6 = vadd.f32 %v2710_v40, %v2663_v47 }
 0x347   :  { %v2712_v49 = vadd.f32 %v2710_v40, %v2626_v19 }
 0x348   :  { %v2714_v15 = vadd.f32 %v2710_v40, %v2700_v48 }
 0x349   :  { %v2719_v36 = vcombine.low %v2711_v53, %v2712_v49 }
 0x34a   :  { %v2720_v42 = vcombine.low %v2713_v6, %v2714_v15 }
 0x34b   :  { %v2727_v38 = vrot.slane %v2719_v36, %v2726_v39 }
 0x34c   :  { %v2734_v60 = vrot.slane %v2720_v42, %v2726_v39 }
 0x34e   :  { %v2735_v33 = vcombine.low %v2727_v38, %v2734_v60 }
 0x350   :  { %v2742_v46 = vrot.slane %v2735_v33, %v2726_v39 }
 0x352   :  { %2748 = vst.msk [vmem:[#allocation14] sm:$0xf] %vm2746_vm0, %v2742_v46 }
 0x353   :  { %3449 = shalt.err (!%p3446_p6)
}
 0x354   :  { %2758 = dma.vmem_to_hbm [thread:$0]  %s2756_s5, 64, %s5117_s7, [#allocation5]  }
 0x355   :  { %3466 = dma.done.wait [#allocation5], 64  }
 0x356   :  { %3467 = vsyncadd [#allocation5], 4294967232 }
 0x357   :  { %2762 = vsyncpa [#allocation4], 1 }
 0x358   :  { %2763 = vsyncpa [#allocation7], 1 }
 0x359   :  { %2764 = vsyncpa [#allocation10], 1 }
 0x35a   :  { %2765 = vsyncpa [#allocation13], 1 }
 0x35b   :  { %2766 = vsyncpa [#allocation5], 1 }

</bundles_post_ra>
